<compile_context>
chip_gen: v7x
topology: tpu7x:2x2x1
jax: 0.10.0
libtpu: 0.0.40
codegen_flags: <defaults>
</compile_context>

<pallas_src>
import functools

import jax
import jax.numpy as jnp
from jax.experimental import pallas as pl
from jax.experimental.pallas import tpu as pltpu


def _round_up(x, m):
    return (x + m - 1) // m * m


# ----------------------------------------------------------------------------
# Shapes / tiling constants
# ----------------------------------------------------------------------------
LAYER_DIMS = [(10000, 5000), (5000, 700), (700, 128), (128, 1)]

TN1 = 256                            # layer-1 streamed weight tile (N axis)
K1 = 10000                           # layer-1 K, unpadded (full-extent block)
N1P = _round_up(5000, TN1)           # 5120  (== layer-2 padded K)
N2P = _round_up(700, 128)            # 768   (== layer-3 padded K)
N3 = 128                             # layer-3 out (already aligned)
N4P = 128                            # layer-4 out padded 1 -> 128

KP = [K1, N1P, N2P, N3]              # padded in-features per layer
NPAD = [N1P, N2P, N3, N4P]           # padded out-features per layer


# ----------------------------------------------------------------------------
# Kernel 1: layer 1 — y[:, j*tn:(j+1)*tn] = relu(x @ W1[:, j*tn:(j+1)*tn] + b1)
# x (bf16) resident full-K in VMEM; W1 (bf16) streamed in (K, tn) slabs over a
# single "parallel" N grid (no K reduction axis, no accumulator).
# ----------------------------------------------------------------------------
def _layer1_kernel(x_ref, w_ref, b_ref, o_ref):
    out = jnp.dot(x_ref[...], w_ref[...], preferred_element_type=jnp.float32)
    out = jnp.maximum(out + b_ref[...], 0.0)
    o_ref[...] = out.astype(o_ref.dtype)


def layer1_pallas(x, w, b, *, tn=TN1):
    """x: (Mp, K) bf16, w: (K, Np) bf16, b: (1, Np) f32 -> (Mp, Np) bf16."""
    Mp, K = x.shape
    Kw, Np = w.shape
    assert K == Kw and Mp % 8 == 0 and Np % tn == 0

    grid = (Np // tn,)

    # Double-buffered VMEM estimate: x + weight slab + bias slab + out slab.
    vmem_bytes = int(
        2 * (Mp * K * 2 + K * tn * 2 + tn * 4 + Mp * tn * 2) + (8 << 20)
    )

    cost = pl.CostEstimate(
        flops=2 * Mp * K * Np,
        transcendentals=0,
        bytes_accessed=2 * (Mp * K + K * Np + Mp * Np) + 4 * Np,
    )

    return pl.pallas_call(
        _layer1_kernel,
        out_shape=jax.ShapeDtypeStruct((Mp, Np), jnp.bfloat16),
        grid_spec=pltpu.PrefetchScalarGridSpec(
            num_scalar_prefetch=0,
            grid=grid,
            in_specs=[
                pl.BlockSpec((Mp, K), lambda j: (0, 0)),   # full-K activations
                pl.BlockSpec((K, tn), lambda j: (0, j)),   # streamed weight slab
                pl.BlockSpec((1, tn), lambda j: (0, j)),   # bias slab
            ],
            out_specs=pl.BlockSpec((Mp, tn), lambda j: (0, j)),
        ),
        compiler_params=pltpu.CompilerParams(
            dimension_semantics=("parallel",),   # N axis shards across TCs (v7x)
            vmem_limit_bytes=vmem_bytes,
        ),
        cost_estimate=cost,
    )(x, w, b)


# ----------------------------------------------------------------------------
# Kernel 2: fused layers 2 + 3 + 4.  All weights fit in VMEM (w2 bf16 ~7.9 MB),
# so this is a single-block call — removes a launch and the HBM round trip of
# the intermediate activation.
# ----------------------------------------------------------------------------
def _tail_kernel(h_ref, w2_ref, b2_ref, w3_ref, b3_ref, w4_ref, b4_ref, o_ref):
    h2 = jnp.dot(h_ref[...], w2_ref[...], preferred_element_type=jnp.float32)
    h2 = jnp.maximum(h2 + b2_ref[...], 0.0).astype(jnp.bfloat16)
    h3 = jnp.dot(h2, w3_ref[...], preferred_element_type=jnp.float32)
    h3 = jnp.maximum(h3 + b3_ref[...], 0.0).astype(jnp.bfloat16)
    out = jnp.dot(h3, w4_ref[...], preferred_element_type=jnp.float32)
    o_ref[...] = (out + b4_ref[...]).astype(o_ref.dtype)


def tail_pallas(h, w2, b2, w3, b3, w4, b4):
    Mp, K2p = h.shape
    _, N2p = w2.shape
    _, N3_ = w3.shape
    _, N4p = w4.shape
    shapes = [(Mp, K2p), (K2p, N2p), (1, N2p), (N2p, N3_), (1, N3_),
              (N3_, N4p), (1, N4p)]

    in_bytes = (Mp * K2p * 2 + K2p * N2p * 2 + N2p * 4 + N2p * N3_ * 2
                + N3_ * 4 + N3_ * N4p * 2 + N4p * 4 + Mp * N4p * 4)
    vmem_bytes = int(2 * in_bytes + (8 << 20))

    return pl.pallas_call(
        _tail_kernel,
        out_shape=jax.ShapeDtypeStruct((Mp, N4p), jnp.float32),
        grid_spec=pltpu.PrefetchScalarGridSpec(
            num_scalar_prefetch=0,
            grid=(1,),
            in_specs=[pl.BlockSpec(s, lambda i: (0, 0)) for s in shapes],
            out_specs=pl.BlockSpec((Mp, N4p), lambda i: (0, 0)),
        ),
        compiler_params=pltpu.CompilerParams(
            dimension_semantics=("arbitrary",),
            vmem_limit_bytes=vmem_bytes,
        ),
    )(h, w2, b2, w3, b3, w4, b4)


# ----------------------------------------------------------------------------
# Parameter init (PyTorch nn.Linear default: U(-1/sqrt(fan_in), 1/sqrt(fan_in)))
# plus ONE-TIME zero-padding to tile-aligned shapes and bf16 cast of weights.
# ----------------------------------------------------------------------------
def init_raw_params(key):
    keys = jax.random.split(key, len(LAYER_DIMS))
    params = []
    for k, (fi, fo) in zip(keys, LAYER_DIMS):
        kw, kb = jax.random.split(k)
        bound = 1.0 / jnp.sqrt(float(fi))
        w = jax.random.uniform(kw, (fi, fo), jnp.float32, -bound, bound)
        b = jax.random.uniform(kb, (fo,), jnp.float32, -bound, bound)
        params.append((w, b))
    return params


def pad_params(raw_params):
    """Zero-pad to tile-aligned shapes and cast weights to bf16 (once)."""
    padded = []
    for i, (w, b) in enumerate(raw_params):
        fi, fo = w.shape
        wp = jnp.pad(w, ((0, KP[i] - fi), (0, NPAD[i] - fo))).astype(jnp.bfloat16)
        bp = jnp.pad(b, (0, NPAD[i] - fo)).reshape(1, NPAD[i]).astype(jnp.float32)
        padded.append((wp, bp))
    return padded


def net_forward(padded_params, x):
    (w1, b1), (w2, b2), (w3, b3), (w4, b4) = padded_params
    M, K = x.shape
    assert K == K1
    Mp = _round_up(M, 8)
    xp = jnp.pad(x, ((0, Mp - M), (0, 0))).astype(jnp.bfloat16)   # x is tiny
    h = layer1_pallas(xp, w1, b1, tn=TN1)                          # (Mp, 5120) bf16
    out = tail_pallas(h, w2, b2, w3, b3, w4, b4)                   # (Mp, 128) f32
    return out[:M, :1]


# Pure-JAX reference with the SAME precision policy (bf16 weights/activations,
# f32 accumulation) so the tolerance check is meaningful.
def ref_forward(raw_params, x):
    h = x.astype(jnp.bfloat16)
    for i, (w, b) in enumerate(raw_params):
        y = jnp.dot(h, w.astype(jnp.bfloat16),
                    preferred_element_type=jnp.float32) + b
        if i < 3:
            y = jnp.maximum(y, 0.0)
            h = y.astype(jnp.bfloat16)
        else:
            h = y
    return h


if __name__ == "__main__":
    key = jax.random.PRNGKey(0)
    k_params, k_in = jax.random.split(key)

    raw_params = init_raw_params(k_params)
    padded_params = pad_params(raw_params)

    batch = 8
    x = jax.random.normal(k_in, (batch, 10000), jnp.float32)

    out = jax.block_until_ready(net_forward(padded_params, x))

    ref = ref_forward(raw_params, x)

    assert out.shape == (batch, 1)
    err = float(jnp.max(jnp.abs(out - ref)))
    assert jnp.allclose(out, ref, rtol=1e-2, atol=1e-2), f"max abs err {err}"

    print("KERNEL_OK")
</pallas_src>

<mosaic_0001>
module attributes {stable_mosaic.version = 11 : i64} {
  func.func @_layer1_kernel(%arg0: i32, %arg1: memref<8x10000xbf16, #tpu.memory_space<vmem>>, %arg2: memref<10000x256xbf16, #tpu.memory_space<vmem>>, %arg3: memref<1x256xf32, #tpu.memory_space<vmem>>, %arg4: memref<8x256xbf16, #tpu.memory_space<vmem>>) attributes {dimension_semantics = [#tpu.dimension_semantics<parallel>], iteration_bounds = array<i64: 20>, scalar_prefetch = 0 : i64, scratch_operands = 0 : i64, tpu.core_type = #tpu.core_type<tc>, window_params = [{pipeline_mode = #tpu.pipeline_mode<synchronous>, transform_indices = @transform_0, window_bounds = array<i64: 8, 10000>}, {transform_indices = @transform_1, window_bounds = array<i64: 10000, 256>}, {transform_indices = @transform_2, window_bounds = array<i64: 1, 256>}, {transform_indices = @transform_3, window_bounds = array<i64: 8, 256>}]} {
    %c0 = arith.constant 0 : index
    %c0_0 = arith.constant 0 : index
    %0 = vector.load %arg1[%c0, %c0_0] : memref<8x10000xbf16, #tpu.memory_space<vmem>>, vector<8x10000xbf16>
    %c0_1 = arith.constant 0 : index
    %c0_2 = arith.constant 0 : index
    %1 = vector.load %arg2[%c0_1, %c0_2] : memref<10000x256xbf16, #tpu.memory_space<vmem>>, vector<10000x256xbf16>
    %cst = arith.constant dense<0.000000e+00> : vector<8x256xf32>
    %2 = tpu.matmul %0, %1, %cst {dimension_numbers = #tpu.dot_dimension_numbers<[1], [0], [0], [1], [0, 0, 1, 1], [], []>} : vector<8x10000xbf16>, vector<10000x256xbf16>, vector<8x256xf32> -> vector<8x256xf32>
    %c0_3 = arith.constant 0 : index
    %c0_4 = arith.constant 0 : index
    %3 = vector.load %arg3[%c0_3, %c0_4] : memref<1x256xf32, #tpu.memory_space<vmem>>, vector<1x256xf32>
    %4 = vector.broadcast %3 : vector<1x256xf32> to vector<8x256xf32>
    %5 = arith.addf %2, %4 : vector<8x256xf32>
    %cst_5 = arith.constant 0.000000e+00 : f32
    %6 = vector.broadcast %cst_5 : f32 to vector<8x256xf32>
    %7 = arith.maximumf %5, %6 : vector<8x256xf32>
    %8 = arith.truncf %7 : vector<8x256xf32> to vector<8x256xbf16>
    %c0_6 = arith.constant 0 : index
    %c0_7 = arith.constant 0 : index
    %9 = vector.load %arg4[%c0_6, %c0_7] : memref<8x256xbf16, #tpu.memory_space<vmem>>, vector<8x256xbf16>
    tpu.vector_store %arg4[%c0_6, %c0_7], %8 {strides = array<i32>} : memref<8x256xbf16, #tpu.memory_space<vmem>>, vector<8x256xbf16>,
    return
  }
  func.func @transform_0(%arg0: i32) -> (i32, i32) {
    %c0_i32 = arith.constant 0 : i32
    %c0_i32_0 = arith.constant 0 : i32
    %c0_i32_1 = arith.constant 0 : i32
    return %c0_i32, %c0_i32_0 : i32, i32
  }
  func.func @transform_1(%arg0: i32) -> (i32, i32) {
    %c0_i32 = arith.constant 0 : i32
    %c0_i32_0 = arith.constant 0 : i32
    return %c0_i32, %arg0 : i32, i32
  }
  func.func @transform_2(%arg0: i32) -> (i32, i32) {
    %c0_i32 = arith.constant 0 : i32
    %c0_i32_0 = arith.constant 0 : i32
    return %c0_i32, %arg0 : i32, i32
  }
  func.func @transform_3(%arg0: i32) -> (i32, i32) {
    %c0_i32 = arith.constant 0 : i32
    %c0_i32_0 = arith.constant 0 : i32
    return %c0_i32, %arg0 : i32, i32
  }
}

</mosaic_0001>

<bundles_post_ra>
// kernel: tpu_custom_call.1
= control target key start
LH: loop header
LB: loop body
LE: loop exit
PB: predicated region body
PF: predicated region fallthrough
CT: control target
= control target key end

     0   :  { %8 = vsyncpa [#allocation3], 0  ;;  %s15267_s0 = inlined_call_operand.hbm [shape: bf16[8,10000], index: 0, kind: input, shape index: {}]   ;;  %s15268_s1 = inlined_call_operand.hbm [shape: bf16[10000,5120], index: 1, kind: input, shape index: {}]   ;;  %s15269_s2 = inlined_call_operand.hbm [shape: f32[1,5120], index: 2, kind: input, shape index: {}]   ;;  %s15270_s3 = inlined_call_operand.hbm [shape: bf16[8,5120], index: 3, kind: output, shape index: {}]  }
   0x1   :  { %9 = vsyncpa [#allocation6], 0 }
   0x2   :  { %11 = vsyncpa [#allocation6 + $0x1], 0 }
   0x3   :  { %12 = vsyncpa [#allocation4], 0 }
   0x4   :  { %14 = vsyncpa [#allocation4 + $0x1], 0  ;;  %s13560_s12 = smov 0   ;;  %s13562_s13 = smov 0  }
   0x5   :  { %s13564_s14 = smov 0   ;;  %s13566_s15 = smov 0  }
   0x6 LB: > { %s13581_s16 = sadd.s32 1, %s13530_s15   ;;  %s48_s17 = sadd.s32 1, %s13526_s14  ;;  %s13530_s15 = sphi %s13566_s15, %s15296_s15   ;;  %s13526_s14 = sphi %s13564_s14, %s15295_s14   ;;  %s13522_s13 = sphi %s13562_s13, %s15294_s13   ;;  %s13518_s12 = sphi %s13560_s12, %s15293_s12  }
   0x7   : > { %s45_s18 = ssub.s32 %s13530_s15, %s13581_s16  ;;  %p55_p0 = scmp.ne.s32.totalorder %s13526_s14, %s13522_s13 }
   0x8   : > { %p46_p1 = scmp.eq.s32.totalorder %s45_s18, 0  ;;  %p56_p2 = scmp.eq.s32.totalorder %s13530_s15, 0 }
   0x9   : > { %p11378_p3 = scmp.lt.s32.totalorder %s13530_s15, 20  ;;  %s148_s20 = sand.u32 1, %s13530_s15  }
   0xa   : > { %s13591_s19 = scalar_select %p46_p1, %s13526_s14, %s48_s17  }
   0xb   : > { %p57_p4 = por %p56_p2, %p55_p0  ;;  %s150_s21 = sand.u32 1, %s13526_s14  }
   0xc   : > { %s11350_s22 = smul.u32 10000, %s150_s21  ;;  %s11190_s23 = sshll.u32 %s13530_s15, 7 }
   0xd   : > { %s13604_s26 = scalar_lea.hbm %s15268_s1, %s11190_s23  ;;  %p13606_p5 = pnand %p11378_p3, %p57_p4 }
   0xe   : > { %s152_s28 = scalar_lea.vmem [#allocation5], %s11350_s22  ;;  %s13612_s30 = scalar_lea.sflag [#allocation6], %s148_s20 }
   0xf   : > { %s15278_s27 = scalar_select %p13606_p5, 1, 0 }
  0x10   : > { %s159_s29 = sshll.u32 %s152_s28, 4  ;;  %s13372_s4 = scalar_lea.hbm %s13604_s26, 160000  ;;  %s13610_s29 = int_to_ptr.vmem [resolvable:$true] %s159_s29 }
  0x11   : > { %p13373_p6 = scmp.ne.s32.totalorder %s13604_s26, %s13372_s4  ;;  %p15272_p7 = pneg %p13606_p5 }
  0x12   : > { %s13377_s7 = scalar_lea.hbm %s15268_s1, 3200000  ;;  %p13378_p10 = scmp.lt.u32.totalorder %s13604_s26, %s15268_s1 }
  0x13   : > { %p13375_p8 = pnand %p15272_p7, %p13373_p6  ;;  %p13379_p11 = scmp.lt.u32.totalorder %s13377_s7, %s13372_s4 }
  0x14   : > { %p13381_p13 = scmp.lt.u32.totalorder %s13372_s4, %s13604_s26 }
  0x15   : > { %p13376_p9 = pneg %p13375_p8  ;;  %p13380_p12 = por %p13379_p11, %p13378_p10 }
  0x17   : > { %p13382_p1 = por %p13381_p13, %p13380_p12 }
  0x19   : > { %p13383_p2 = pnand %p13382_p1, %p13376_p9 }
  0x1b   : > { %13386 = shalt.err (!%p13383_p2)
}
  0x1c   : > { %s13387_s10 = scalar_lea.vmem %s13610_s29, 160000  ;;  %s13532_s11 = smov [#allocation5]  }
  0x1d   : > { %p13388_p3 = scmp.ne.s32.totalorder %s13610_s29, %s13387_s10  ;;  %s13392_s17 = sshll.u32 %s13532_s11, 4  ;;  %s13393_s17 = int_to_ptr.vmem [resolvable:$false] %s13392_s17 }
  0x1e   : > { %s13394_s18 = scalar_lea.vmem %s13393_s17, 320000  ;;  %p13395_p8 = scmp.lt.s32.totalorder %s13610_s29, %s13393_s17 }
  0x1f   : > { %p13390_p4 = pnand %p13388_p3, %p15272_p7  ;;  %p13396_p10 = scmp.lt.s32.totalorder %s13394_s18, %s13387_s10 }
  0x21   : > { %p13391_p6 = pneg %p13390_p4  ;;  %p13397_p11 = por %p13396_p10, %p13395_p8 }
  0x23   : > { %p13398_p12 = pnand %p13397_p11, %p13391_p6 }
  0x25   : > { %13401 = shalt.err (!%p13398_p12)
}
  0x26   : > { %s13533_s20 = smov 2560   ;;  %s13534_s22 = smov 128  }
  0x27   : > { %s13535_s23 = smov 8   ;;  %s13641_s24 = sadd.s32 4294967295, %s13530_s15  }
  0x28   : > { %11369 = dma.hbm_to_vmem [thread:$0]  (!%p13606_p5), %s13604_s26, 160000, %s13610_s29, %s13612_s30, %s13533_s20, %s13534_s22, %s13535_s23  }
  0x29   : > { %s9841_s25 = sadd.s32 4294967294, %s13530_s15   ;;  %p61_p9 = scmp.ne.s32.totalorder %s13522_s13, %s13518_s12 }
  0x2a   : > { %p15271_p13 = scmp.eq.s32.totalorder %s13641_s24, 0  ;;  %p111_p1 = scmp.eq.s32.totalorder %s13641_s24, 19 }
  0x2b   : > { %p117_p2 = scmp.eq.s32.totalorder %s9841_s25, 19  ;;  %p9842_p3 = scmp.ge.s32.totalorder %s13530_s15, 1 }
  0x2c   : > { %p13651_p4 = por %p15271_p13, %p61_p9  ;;  %p13658_p6 = por %p111_p1, %p55_p0 }
  0x2d   : > { %p13662_p8 = por %p117_p2, %p61_p9  ;;  %p124_p10 = scmp.lt.s32.totalorder %s13530_s15, 21 }
  0x2e   : > { %s15279_s28 = scalar_select %p13651_p4, 1, 0 }
  0x2f   : > { %s15280_s26 = scalar_select %p13658_p6, 1, 0 }
  0x30   : > { %s15281_s29 = scalar_select %p13662_p8, 1, 0 }
  0x31   : > { %p13667_p11 = pnand %p9842_p3, %p124_p10  ;;  %s13536_s5 = smov [#allocation2]  }
  0x32   : > { %s137_s6 = sshll.u32 %s13536_s5, 4  ;;  %s9847_s7 = sshll.u32 %s150_s21, 1  ;;  %s138_s6 = int_to_ptr.vmem [resolvable:$true] %s137_s6 }
  0x33   : > { %s15282_s4 = scalar_select %p13667_p11, 1, 0 }
  0x34   : > { %p11362_p12 = pneg %p13667_p11  ;;  %s11191_s8 = sshll.u32 %s13530_s15, 5 }
  0x35   : > { %s173_s9 = scalar_lea.vmem [#allocation7], %s9847_s7  ;;  %s13685_s20 = scalar_lea.hbm %s15269_s2, %s11191_s8 }
  0x36   : > { %s181_s10 = sshll.u32 %s173_s9, 4  ;;  %p13678_p0 = pnand %p11362_p12, %p15271_p13  ;;  %s13687_s10 = int_to_ptr.vmem [resolvable:$true] %s181_s10 }
  0x37   : > { %s13402_s23 = scalar_lea.hbm %s15267_s0, 5056 }
  0x38   : > { %p13403_p9 = scmp.ne.s32.totalorder %s15267_s0, %s13402_s23  ;;  %p13404_p1 = pneg %p13678_p0 }
  0x39   : > { %p13409_p10 = scmp.lt.u32.totalorder %s13402_s23, %s15267_s0 }
  0x3a   : > { %p13405_p2 = pnand %p13404_p1, %p13403_p9 }
  0x3c   : > { %p13406_p3 = pneg %p13405_p2 }
  0x3e   : > { %p13411_p12 = pnand %p13409_p10, %p13406_p3 }
  0x40   : > { %13414 = shalt.err (!%p13411_p12)
}
  0x41   : > { %s13415_s8 = scalar_lea.vmem %s138_s6, 5056  ;;  %p13423_p6 = scmp.lt.s32.totalorder %s138_s6, %s138_s6 }
  0x42   : > { %p13416_p13 = scmp.ne.s32.totalorder %s138_s6, %s13415_s8  ;;  %p13424_p4 = scmp.lt.s32.totalorder %s13415_s8, %s13415_s8 }
  0x44   : > { %p13418_p7 = pnand %p13416_p13, %p13404_p1  ;;  %p13425_p11 = por %p13424_p4, %p13423_p6 }
  0x46   : > { %p13419_p8 = pneg %p13418_p7 }
  0x48   : > { %p13426_p5 = pnand %p13425_p11, %p13419_p8 }
  0x4a   : > { %13429 = shalt.err (!%p13426_p5)
}
  0x4b   : > { %11365 = dma.hbm_to_vmem [thread:$0]  (!%p13678_p0), %s15267_s0, 5056, %s138_s6, [#allocation3]  }
  0x4c   : > { %s13430_s21 = scalar_lea.hbm %s13685_s20, 32  ;;  %p15284_p13 = scmp.ne.s32.totalorder %s15278_s27, 0 }
  0x4d   : > { %p13431_p9 = scmp.ne.s32.totalorder %s13685_s20, %s13430_s21  ;;  %s13435_s25 = scalar_lea.hbm %s15269_s2, 640 }
  0x4e   : > { %p15285_p7 = pneg %p15284_p13  ;;  %p13436_p5 = scmp.lt.u32.totalorder %s13685_s20, %s15269_s2 }
  0x4f   : > { %p13437_p4 = scmp.lt.u32.totalorder %s13435_s25, %s13430_s21  ;;  %p13439_p8 = scmp.lt.u32.totalorder %s13430_s21, %s13685_s20 }
  0x50   : > { %p13433_p1 = pnand %p13431_p9, %p15285_p7 }
  0x51   : > { %p13438_p6 = por %p13437_p4, %p13436_p5 }
  0x52   : > { %p13434_p2 = pneg %p13433_p1 }
  0x53   : > { %p13440_p11 = por %p13439_p8, %p13438_p6 }
  0x55   : > { %p13441_p3 = pnand %p13440_p11, %p13434_p2 }
  0x57   : > { %13444 = shalt.err (!%p13441_p3)
}
  0x58   : > { %s13445_s6 = scalar_lea.vmem %s13687_s10, 32  ;;  %p15286_p10 = pmov %p15285_p7 }
  0x59   : > { %p13446_p0 = scmp.ne.s32.totalorder %s13687_s10, %s13445_s6  ;;  %s13537_s7 = smov [#allocation7]  }
  0x5a   : > { %s13450_s9 = sshll.u32 %s13537_s7, 4  ;;  %s13451_s9 = int_to_ptr.vmem [resolvable:$false] %s13450_s9 }
  0x5b   : > { %p13448_p12 = pnand %p13446_p0, %p15286_p10  ;;  %s13452_s8 = scalar_lea.vmem %s13451_s9, 64 }
  0x5c   : > { %p13453_p7 = scmp.lt.s32.totalorder %s13687_s10, %s13451_s9  ;;  %p13454_p1 = scmp.lt.s32.totalorder %s13452_s8, %s13445_s6 }
  0x5d   : > { %p13449_p9 = pneg %p13448_p12 }
  0x5e   : > { %p13455_p5 = por %p13454_p1, %p13453_p7 }
  0x60   : > { %p13456_p4 = pnand %p13455_p5, %p13449_p9 }
  0x62   : > { %13459 = shalt.err (!%p13456_p4)
}
  0x63   : > { %11372 = dma.hbm_to_vmem [thread:$0]  (!%p15284_p13), %s13685_s20, 32, %s13687_s10, %s13612_s30  }
  0x64   : > { %p15287_p2 = scmp.ne.s32.totalorder %s15282_s4, 0 }
  0x65   : > { %p15288_p6 = scmp.eq.s32.totalorder (!%p15287_p2), %s13641_s24, 0 }
  0x66   : > { %190 = sbr.rel (%p15287_p2) target bundleno = 1631 (0x65f), region = 32 }
  0x6d   : > { %13505 = dma.done.wait (%p15288_p6), [#allocation3], 5056   ;;  %p15289_p8 = pmov %p15288_p6 }
  0x6e   : > { %s196_s17 = sand.u32 1, %s13641_s24   ;;  %s13737_s18 = sand.u32 1, %s13522_s13  }
  0x6f   : > { %13507 = vsyncadd (%p15289_p8), [#allocation3], 4294962240  ;;  %s11351_s27 = smul.u32 10000, %s13737_s18  ;;  %s197_s21 = scalar_lea.sflag [#allocation6], %s196_s17 }
  0x70   : > { %p15290_p13 = scmp.ne.s32.totalorder %s15279_s28, 0 }
  0x71   : > { %s13740_s22 = scalar_lea.vmem [#allocation5], %s11351_s27 }
  0x72   : > { %13509 = dma.done.wait (%p15290_p13), %s197_s21, 160032  }
  0x73   : > { %13511 = vsyncadd (%p15290_p13), %s197_s21, 4294807264  ;;  %v11418_v0 = vld [vmem:[%s13740_s22 + $0x4] ss:$8 sps:$4 sm:$0xff]   ;;  %v11422_v2 = vld [vmem:[%s13740_s22] ss:$8 sps:$4 sm:$0xff]   ;;  %vm8069_vm0 = vcmask 130048  }
  0x74   : > { %v11420_v1 = vld [vmem:[%s13740_s22 + $0x1404] ss:$8 sps:$4 sm:$0xff]   ;;  %8073 = vmatprep.subr.bf16.mxu1 %v11418_v0  ;;  %v11423_v3 = vld [vmem:[%s13740_s22 + $0x1400] ss:$8 sps:$4 sm:$0xff]   ;;  %v11424_v4 = vld [vmem:[%s13740_s22 + $0x14] ss:$8 sps:$4 sm:$0xff]  }
  0x75   : > { %8893 = vmatprep.subr.bf16.mxu0 %v11420_v1  ;;  %8074 = vmatpush1.bf16.msra.mxu1 %v11422_v2  ;;  %v11426_v5 = vld [vmem:[%s13740_s22 + $0x1414] ss:$8 sps:$4 sm:$0xff]   ;;  %v11428_v6 = vld [vmem:[%s13740_s22 + $0x10] ss:$8 sps:$4 sm:$0xff]   ;;  %v11430_v8 = vld [vmem:[%s13740_s22 + $0x24] ss:$8 sps:$4 sm:$0xff]  }
  0x76   : > { %8894 = vmatpush1.bf16.msra.mxu0 %v11423_v3  ;;  %8075 = vmatprep.subr.bf16.mxu1 %v11424_v4  ;;  %v11429_v7 = vld [vmem:[%s13740_s22 + $0x1410] ss:$8 sps:$4 sm:$0xff]   ;;  %v11432_v9 = vld [vmem:[%s13740_s22 + $0x1424] ss:$8 sps:$4 sm:$0xff]   ;;  %v11434_v10 = vld [vmem:[%s13740_s22 + $0x20] ss:$8 sps:$4 sm:$0xff]  }
  0x77   : > { %8895 = vmatprep.subr.bf16.mxu0 %v11426_v5  ;;  %v11435_v11 = vld [vmem:[%s13740_s22 + $0x1420] ss:$8 sps:$4 sm:$0xff]   ;;  %v11436_v12 = vld [vmem:[%s13740_s22 + $0x34] ss:$8 sps:$4 sm:$0xff]   ;;  %v11440_v14 = vld [vmem:[%s13740_s22 + $0x30] ss:$8 sps:$4 sm:$0xff]  }
  0x78   : > { %v11438_v13 = vld [vmem:[%s13740_s22 + $0x1434] ss:$8 sps:$4 sm:$0xff]   ;;  %v11441_v15 = vld [vmem:[%s13740_s22 + $0x1430] ss:$8 sps:$4 sm:$0xff]   ;;  %v11442_v16 = vld [vmem:[%s13740_s22 + $0x44] ss:$8 sps:$4 sm:$0xff]  }
  0x79   : > { %8076 = vmatpush1.bf16.msra.mxu1 %v11428_v6  ;;  %v11444_v17 = vld [vmem:[%s13740_s22 + $0x1444] ss:$8 sps:$4 sm:$0xff]   ;;  %v11446_v18 = vld [vmem:[%s13740_s22 + $0x40] ss:$8 sps:$4 sm:$0xff]   ;;  %v11448_v20 = vld [vmem:[%s13740_s22 + $0x54] ss:$8 sps:$4 sm:$0xff]  }
  0x7a   : > { %8896 = vmatpush1.bf16.msra.mxu0 %v11429_v7  ;;  %8077 = vmatprep.subr.bf16.mxu1 %v11430_v8  ;;  %v11447_v19 = vld [vmem:[%s13740_s22 + $0x1440] ss:$8 sps:$4 sm:$0xff]   ;;  %v11450_v21 = vld [vmem:[%s13740_s22 + $0x1454] ss:$8 sps:$4 sm:$0xff]   ;;  %v11452_v22 = vld [vmem:[%s13740_s22 + $0x50] ss:$8 sps:$4 sm:$0xff]  }
  0x7b   : > { %8897 = vmatprep.subr.bf16.mxu0 %v11432_v9  ;;  %v11453_v23 = vld [vmem:[%s13740_s22 + $0x1450] ss:$8 sps:$4 sm:$0xff]   ;;  %v11454_v24 = vld [vmem:[%s13740_s22 + $0x64] ss:$8 sps:$4 sm:$0xff]   ;;  %v11458_v26 = vld [vmem:[%s13740_s22 + $0x60] ss:$8 sps:$4 sm:$0xff]  }
  0x7c   : > { %v11456_v25 = vld [vmem:[%s13740_s22 + $0x1464] ss:$8 sps:$4 sm:$0xff]   ;;  %v11459_v27 = vld [vmem:[%s13740_s22 + $0x1460] ss:$8 sps:$4 sm:$0xff]   ;;  %v11460_v28 = vld [vmem:[%s13740_s22 + $0x74] ss:$8 sps:$4 sm:$0xff]  }
  0x7d   : > { %8078 = vmatpush1.bf16.msra.mxu1 %v11434_v10  ;;  %v11462_v29 = vld [vmem:[%s13740_s22 + $0x1474] ss:$8 sps:$4 sm:$0xff]   ;;  %v11464_v30 = vld [vmem:[%s13740_s22 + $0x70] ss:$8 sps:$4 sm:$0xff]   ;;  %v11466_v32 = vld [vmem:[%s13740_s22 + $0x84] ss:$8 sps:$4 sm:$0xff]  }
  0x7e   : > { %8898 = vmatpush1.bf16.msra.mxu0 %v11435_v11  ;;  %8079 = vmatprep.subr.bf16.mxu1 %v11436_v12  ;;  %v11465_v31 = vld [vmem:[%s13740_s22 + $0x1470] ss:$8 sps:$4 sm:$0xff]   ;;  %v11468_v33 = vld [vmem:[%s13740_s22 + $0x1484] ss:$8 sps:$4 sm:$0xff]   ;;  %v11470_v34 = vld [vmem:[%s13740_s22 + $0x80] ss:$8 sps:$4 sm:$0xff]  }
  0x7f   : > { %8899 = vmatprep.subr.bf16.mxu0 %v11438_v13  ;;  %v11471_v35 = vld [vmem:[%s13740_s22 + $0x1480] ss:$8 sps:$4 sm:$0xff]   ;;  %v11472_v36 = vld [vmem:[%s13740_s22 + $0x94] ss:$8 sps:$4 sm:$0xff]   ;;  %v11476_v38 = vld [vmem:[%s13740_s22 + $0x90] ss:$8 sps:$4 sm:$0xff]  }
  0x80   : > { %v11474_v37 = vld [vmem:[%s13740_s22 + $0x1494] ss:$8 sps:$4 sm:$0xff]   ;;  %v11477_v39 = vld [vmem:[%s13740_s22 + $0x1490] ss:$8 sps:$4 sm:$0xff]   ;;  %v11478_v40 = vld [vmem:[%s13740_s22 + $0xa4] ss:$8 sps:$4 sm:$0xff]  }
  0x81   : > { %8080 = vmatpush1.bf16.msra.mxu1 %v11440_v14  ;;  %v11480_v41 = vld [vmem:[%s13740_s22 + $0x14a4] ss:$8 sps:$4 sm:$0xff]   ;;  %v11482_v42 = vld [vmem:[%s13740_s22 + $0xa0] ss:$8 sps:$4 sm:$0xff]   ;;  %v11484_v44 = vld [vmem:[%s13740_s22 + $0xb4] ss:$8 sps:$4 sm:$0xff]  }
  0x82   : > { %8900 = vmatpush1.bf16.msra.mxu0 %v11441_v15  ;;  %8081 = vmatprep.subr.bf16.mxu1 %v11442_v16  ;;  %v11483_v43 = vld [vmem:[%s13740_s22 + $0x14a0] ss:$8 sps:$4 sm:$0xff]   ;;  %v11486_v45 = vld [vmem:[%s13740_s22 + $0x14b4] ss:$8 sps:$4 sm:$0xff]   ;;  %v11488_v47 = vld [vmem:[%s13740_s22 + $0xb0] ss:$8 sps:$4 sm:$0xff]  }
  0x83   : > { %8901 = vmatprep.subr.bf16.mxu0 %v11444_v17  ;;  %v241_v46 = vld [vmem:[#allocation2] sm:$0xff]  ;;  %s9852_s30 = sshll.u32 %s13737_s18, 1  ;;  %s9853_s4 = sshll.u32 %s13737_s18, 3 }
  0x84   : > { %v9855_v48 = vcombine.high %v241_v46, %v241_v46  ;;  %v11489_v49 = vld [vmem:[%s13740_s22 + $0x14b0] ss:$8 sps:$4 sm:$0xff]   ;;  %v11490_v51 = vld [vmem:[%s13740_s22 + $0xc4] ss:$8 sps:$4 sm:$0xff]   ;;  %v11494_v54 = vld [vmem:[%s13740_s22 + $0xc0] ss:$8 sps:$4 sm:$0xff]   ;;  %v9854_v6 = vcombine.low %v241_v46, %v241_v46 }
  0x85   : > { %8082 = vmatpush1.bf16.msra.mxu1 %v11446_v18  ;;  %v261_v50 = vld [vmem:[#allocation2 + $0xa0] sm:$0xff]  ;;  %s209_s28 = scalar_lea.vmem [#allocation7], %s9852_s30  ;;  %s11193_s10 = sshll.u32 %s13641_s24, 7 }
  0x86   : > { %8902 = vmatpush1.bf16.msra.mxu0 %v11447_v19  ;;  %8083 = vmatprep.subr.bf16.mxu1 %v11448_v20  ;;  %v11492_v52 = vld [vmem:[%s13740_s22 + $0x14c4] ss:$8 sps:$4 sm:$0xff]   ;;  %v9895_v53 = vcombine.high %v261_v50, %v261_v50  ;;  %v11495_v55 = vld [vmem:[%s13740_s22 + $0x14c0] ss:$8 sps:$4 sm:$0xff]   ;;  %v11496_v56 = vld [vmem:[%s13740_s22 + $0xd4] ss:$8 sps:$4 sm:$0xff]   ;;  %v9894_v7 = vcombine.low %v261_v50, %v261_v50  ;;  %s15224_s5 = scalar_lea.hbm %s15270_s3, %s11193_s10 }
  0x87   : > { %8903 = vmatprep.subr.bf16.mxu0 %v11450_v21  ;;  %8105 = vmatprep.mubr.bf16.mxu1 %v9855_v48  ;;  %v11498_v57 = vld [vmem:[%s13740_s22 + $0x14d4] ss:$8 sps:$4 sm:$0xff]   ;;  %v11500_v58 = vld [vmem:[%s13740_s22 + $0xd0] ss:$8 sps:$4 sm:$0xff]   ;;  %v11502_v60 = vld [vmem:[%s13740_s22 + $0xe4] ss:$8 sps:$4 sm:$0xff]  }
  0x88   : > { %8925 = vmatprep.mubr.bf16.mxu0 %v9895_v53  ;;  %v11501_v59 = vld [vmem:[%s13740_s22 + $0x14d0] ss:$8 sps:$4 sm:$0xff]   ;;  %v11504_v61 = vld [vmem:[%s13740_s22 + $0x14e4] ss:$8 sps:$4 sm:$0xff]   ;;  %v11506_v62 = vld [vmem:[%s13740_s22 + $0xe0] ss:$8 sps:$4 sm:$0xff]  }
  0x89   : > { %8084 = vmatpush1.bf16.msra.mxu1 %v11452_v22  ;;  %v11507_v63 = vld [vmem:[%s13740_s22 + $0x14e0] ss:$8 sps:$4 sm:$0xff]   ;;  %v11508_v0 = vld [vmem:[%s13740_s22 + $0xf4] ss:$8 sps:$4 sm:$0xff]   ;;  %v11512_v2 = vld [vmem:[%s13740_s22 + $0xf0] ss:$8 sps:$4 sm:$0xff]  }
  0x8a   : > { %8904 = vmatpush1.bf16.msra.mxu0 %v11453_v23  ;;  %8085 = vmatprep.subr.bf16.mxu1 %v11454_v24  ;;  %v11510_v1 = vld [vmem:[%s13740_s22 + $0x14f4] ss:$8 sps:$4 sm:$0xff]   ;;  %v11513_v3 = vld [vmem:[%s13740_s22 + $0x14f0] ss:$8 sps:$4 sm:$0xff]   ;;  %v11518_v4 = vld [vmem:[%s13740_s22 + $0x104] ss:$8 sps:$4 sm:$0xff]  }
  0x8b   : > { %8905 = vmatprep.subr.bf16.mxu0 %v11456_v25  ;;  %v11523_v5 = vld [vmem:[%s13740_s22 + $0x1504] ss:$8 sps:$4 sm:$0xff]   ;;  %v11516_v8 = vld [vmem:[%s13740_s22 + $0x100] ss:$8 sps:$4 sm:$0xff]   ;;  %v11526_v10 = vld [vmem:[%s13740_s22 + $0x114] ss:$8 sps:$4 sm:$0xff]  }
  0x8c   : > { %v11521_v9 = vld [vmem:[%s13740_s22 + $0x1500] ss:$8 sps:$4 sm:$0xff]   ;;  %v11529_v11 = vld [vmem:[%s13740_s22 + $0x1514] ss:$8 sps:$4 sm:$0xff]   ;;  %v11524_v12 = vld [vmem:[%s13740_s22 + $0x110] ss:$8 sps:$4 sm:$0xff]  }
  0x8d   : > { %8086 = vmatpush1.bf16.msra.mxu1 %v11458_v26  ;;  %v11527_v13 = vld [vmem:[%s13740_s22 + $0x1510] ss:$8 sps:$4 sm:$0xff]   ;;  %v11532_v14 = vld [vmem:[%s13740_s22 + $0x124] ss:$8 sps:$4 sm:$0xff]   ;;  %v11530_v16 = vld [vmem:[%s13740_s22 + $0x120] ss:$8 sps:$4 sm:$0xff]  }
  0x8e   : > { %8906 = vmatpush1.bf16.msra.mxu0 %v11459_v27  ;;  %8087 = vmatprep.subr.bf16.mxu1 %v11460_v28  ;;  %v11535_v15 = vld [vmem:[%s13740_s22 + $0x1524] ss:$8 sps:$4 sm:$0xff]   ;;  %v11533_v17 = vld [vmem:[%s13740_s22 + $0x1520] ss:$8 sps:$4 sm:$0xff]   ;;  %v11538_v18 = vld [vmem:[%s13740_s22 + $0x134] ss:$8 sps:$4 sm:$0xff]  }
  0x8f   : > { %8907 = vmatprep.subr.bf16.mxu0 %v11462_v29  ;;  %v11541_v19 = vld [vmem:[%s13740_s22 + $0x1534] ss:$8 sps:$4 sm:$0xff]   ;;  %v11536_v20 = vld [vmem:[%s13740_s22 + $0x130] ss:$8 sps:$4 sm:$0xff]   ;;  %v11544_v22 = vld [vmem:[%s13740_s22 + $0x144] ss:$8 sps:$4 sm:$0xff]  }
  0x90   : > { %v11539_v21 = vld [vmem:[%s13740_s22 + $0x1530] ss:$8 sps:$4 sm:$0xff]   ;;  %v11547_v23 = vld [vmem:[%s13740_s22 + $0x1544] ss:$8 sps:$4 sm:$0xff]   ;;  %v11542_v24 = vld [vmem:[%s13740_s22 + $0x140] ss:$8 sps:$4 sm:$0xff]  }
  0x91   : > { %8088 = vmatpush1.bf16.msra.mxu1 %v11464_v30  ;;  %v11545_v25 = vld [vmem:[%s13740_s22 + $0x1540] ss:$8 sps:$4 sm:$0xff]   ;;  %v11550_v26 = vld [vmem:[%s13740_s22 + $0x154] ss:$8 sps:$4 sm:$0xff]   ;;  %v11548_v28 = vld [vmem:[%s13740_s22 + $0x150] ss:$8 sps:$4 sm:$0xff]  }
  0x92   : > { %8908 = vmatpush1.bf16.msra.mxu0 %v11465_v31  ;;  %8089 = vmatprep.subr.bf16.mxu1 %v11466_v32  ;;  %v11553_v27 = vld [vmem:[%s13740_s22 + $0x1554] ss:$8 sps:$4 sm:$0xff]   ;;  %v11551_v29 = vld [vmem:[%s13740_s22 + $0x1550] ss:$8 sps:$4 sm:$0xff]   ;;  %v11556_v30 = vld [vmem:[%s13740_s22 + $0x164] ss:$8 sps:$4 sm:$0xff]  }
  0x93   : > { %8909 = vmatprep.subr.bf16.mxu0 %v11468_v33  ;;  %v11559_v31 = vld [vmem:[%s13740_s22 + $0x1564] ss:$8 sps:$4 sm:$0xff]   ;;  %v11554_v33 = vld [vmem:[%s13740_s22 + $0x160] ss:$8 sps:$4 sm:$0xff]   ;;  %v11574_v46 = vld [vmem:[%s13740_s22 + $0x194] ss:$8 sps:$4 sm:$0xff]  }
  0x94   : > { %v13836_v32 = vld [vmem:[#allocation2 + $0x8] sm:$0xff]  ;;  %s236_s20 = scalar_lea.vmem [#allocation8], %s9853_s4  ;;  %s9725_s6 = scalar_lea.sflag [#allocation4], %s13737_s18 }
  0x95   : > { %8090 = vmatpush1.bf16.msra.mxu1 %v11470_v34  ;;  %v11557_v34 = vld [vmem:[%s13740_s22 + $0x1560] ss:$8 sps:$4 sm:$0xff]   ;;  %v11572_v48 = vld [vmem:[%s13740_s22 + $0x190] ss:$8 sps:$4 sm:$0xff]   ;;  %v11580_v50 = vld [vmem:[%s13740_s22 + $0x1a4] ss:$8 sps:$4 sm:$0xff]  }
  0x96   : > { %8910 = vmatpush1.bf16.msra.mxu0 %v11471_v35  ;;  %8091 = vmatprep.subr.bf16.mxu1 %v11472_v36  ;;  %v9857_v35 = vcombine.high %v13836_v32, %v13836_v32  ;;  %v13842_v36 = vld [vmem:[#allocation2 + $0xa8] sm:$0xff]  ;;  %s9739_s23 = sshll.u32 %s236_s20, 4  ;;  %p15291_p3 = scmp.ne.s32.totalorder %s15280_s26, 0  ;;  %s15226_s23 = int_to_ptr.vmem [resolvable:$true] %s9739_s23 }
  0x97   : > { %8911 = vmatprep.subr.bf16.mxu0 %v11474_v37  ;;  %v11562_v37 = vld [vmem:[%s13740_s22 + $0x174] ss:$8 sps:$4 sm:$0xff]   ;;  %v11581_v53 = vld [vmem:[%s13740_s22 + $0x15a0] ss:$8 sps:$4 sm:$0xff]   ;;  %s13460_s7 = scalar_lea.vmem %s15226_s23, 128  ;;  %s13539_s24 = smov [#allocation8]  }
  0x98   : > { %p13461_p11 = scmp.ne.s32.totalorder %s15226_s23, %s13460_s7  ;;  %s13464_s9 = sshll.u32 %s13539_s24, 4  ;;  %s13465_s9 = int_to_ptr.vmem [resolvable:$false] %s13464_s9 }
  0x99   : > { %8092 = vmatpush1.bf16.msra.mxu1 %v11476_v38  ;;  %v9897_v38 = vcombine.high %v13842_v36, %v13842_v36  ;;  %s13466_s8 = scalar_lea.vmem %s13465_s9, 256  ;;  %p13467_p12 = scmp.lt.s32.totalorder %s15226_s23, %s13465_s9 }
  0x9a   : > { %8912 = vmatpush1.bf16.msra.mxu0 %v11477_v39  ;;  %8093 = vmatprep.subr.bf16.mxu1 %v11478_v40  ;;  %v11565_v39 = vld [vmem:[%s13740_s22 + $0x1574] ss:$8 sps:$4 sm:$0xff]   ;;  %v11560_v40 = vld [vmem:[%s13740_s22 + $0x170] ss:$8 sps:$4 sm:$0xff]   ;;  %p13462_p0 = pnand %p13461_p11, %p15291_p3  ;;  %p13468_p9 = scmp.lt.s32.totalorder %s13466_s8, %s13460_s7 }
  0x9b   : > { %8913 = vmatprep.subr.bf16.mxu0 %v11480_v41  ;;  %v11563_v41 = vld [vmem:[%s13740_s22 + $0x1570] ss:$8 sps:$4 sm:$0xff]  }
  0x9c   : > { %p13463_p10 = pneg %p13462_p0  ;;  %p13469_p7 = por %p13468_p9, %p13467_p12 }
  0x9d   : > { %8094 = vmatpush1.bf16.msra.mxu1 %v11482_v42  ;;  %v11568_v42 = vld [vmem:[%s13740_s22 + $0x184] ss:$8 sps:$4 sm:$0xff]  }
  0x9e   : > { %8914 = vmatpush1.bf16.msra.mxu0 %v11483_v43  ;;  %8095 = vmatprep.subr.bf16.mxu1 %v11484_v44  ;;  %v11571_v43 = vld [vmem:[%s13740_s22 + $0x1584] ss:$8 sps:$4 sm:$0xff]   ;;  %v11566_v44 = vld [vmem:[%s13740_s22 + $0x180] ss:$8 sps:$4 sm:$0xff]   ;;  %p13470_p1 = pnand %p13469_p7, %p13463_p10 }
  0x9f   : > { %8915 = vmatprep.subr.bf16.mxu0 %v11486_v45  ;;  %v11569_v45 = vld [vmem:[%s13740_s22 + $0x1580] ss:$8 sps:$4 sm:$0xff]  }
  0xa1   : > { %8096 = vmatpush1.bf16.msra.mxu1 %v11488_v47  ;;  %v11577_v47 = vld [vmem:[%s13740_s22 + $0x1594] ss:$8 sps:$4 sm:$0xff]  }
  0xa2   : > { %8916 = vmatpush1.bf16.msra.mxu0 %v11489_v49  ;;  %8097 = vmatprep.subr.bf16.mxu1 %v11490_v51  ;;  %v11575_v49 = vld [vmem:[%s13740_s22 + $0x1590] ss:$8 sps:$4 sm:$0xff]   ;;  %v11583_v51 = vld [vmem:[%s13740_s22 + $0x15a4] ss:$8 sps:$4 sm:$0xff]  }
  0xa3   : > { %8917 = vmatprep.subr.bf16.mxu0 %v11492_v52  ;;  %v11578_v52 = vld [vmem:[%s13740_s22 + $0x1a0] ss:$8 sps:$4 sm:$0xff]  }
  0xa5   : > { %8098 = vmatpush1.bf16.msra.mxu1 %v11494_v54  ;;  %v11586_v54 = vld [vmem:[%s13740_s22 + $0x1b4] ss:$8 sps:$4 sm:$0xff]  }
  0xa6   : > { %8918 = vmatpush1.bf16.msra.mxu0 %v11495_v55  ;;  %8099 = vmatprep.subr.bf16.mxu1 %v11496_v56  ;;  %v11589_v55 = vld [vmem:[%s13740_s22 + $0x15b4] ss:$8 sps:$4 sm:$0xff]   ;;  %v11584_v56 = vld [vmem:[%s13740_s22 + $0x1b0] ss:$8 sps:$4 sm:$0xff]  }
  0xa7   : > { %8919 = vmatprep.subr.bf16.mxu0 %v11498_v57  ;;  %v11587_v57 = vld [vmem:[%s13740_s22 + $0x15b0] ss:$8 sps:$4 sm:$0xff]  }
  0xa9   : > { %8100 = vmatpush1.bf16.msra.mxu1 %v11500_v58  ;;  %v11592_v58 = vld [vmem:[%s13740_s22 + $0x1c4] ss:$8 sps:$4 sm:$0xff]  }
  0xaa   : > { %8920 = vmatpush1.bf16.msra.mxu0 %v11501_v59  ;;  %8101 = vmatprep.subr.bf16.mxu1 %v11502_v60  ;;  %v11595_v59 = vld [vmem:[%s13740_s22 + $0x15c4] ss:$8 sps:$4 sm:$0xff]   ;;  %v11590_v60 = vld [vmem:[%s13740_s22 + $0x1c0] ss:$8 sps:$4 sm:$0xff]  }
  0xab   : > { %8921 = vmatprep.subr.bf16.mxu0 %v11504_v61  ;;  %v11593_v61 = vld [vmem:[%s13740_s22 + $0x15c0] ss:$8 sps:$4 sm:$0xff]  }
  0xad   : > { %8102 = vmatpush1.bf16.msra.mxu1 %v11506_v62  ;;  %v11598_v62 = vld [vmem:[%s13740_s22 + $0x1d4] ss:$8 sps:$4 sm:$0xff]  }
  0xae   : > { %8922 = vmatpush1.bf16.msra.mxu0 %v11507_v63  ;;  %8103 = vmatprep.subr.bf16.mxu1 %v11508_v0  ;;  %v11601_v63 = vld [vmem:[%s13740_s22 + $0x15d4] ss:$8 sps:$4 sm:$0xff]   ;;  %v11596_v0 = vld [vmem:[%s13740_s22 + $0x1d0] ss:$8 sps:$4 sm:$0xff]  }
  0xaf   : > { %8923 = vmatprep.subr.bf16.mxu0 %v11510_v1  ;;  %v11599_v1 = vld [vmem:[%s13740_s22 + $0x15d0] ss:$8 sps:$4 sm:$0xff]  }
  0xb1   : > { %8104 = vmatpush1.bf16.msra.mxu1 %v11512_v2  ;;  %v11604_v2 = vld [vmem:[%s13740_s22 + $0x1e4] ss:$8 sps:$4 sm:$0xff]  }
  0xb2   : > { %8924 = vmatpush1.bf16.msra.mxu0 %v11513_v3  ;;  %8114 = vmatprep.subr.bf16.mxu1 %v11518_v4  ;;  %v11607_v3 = vld [vmem:[%s13740_s22 + $0x15e4] ss:$8 sps:$4 sm:$0xff]   ;;  %v11602_v4 = vld [vmem:[%s13740_s22 + $0x1e0] ss:$8 sps:$4 sm:$0xff]  }
  0xb3   : > { %8934 = vmatprep.subr.bf16.mxu0 %v11523_v5  ;;  %v11605_v5 = vld [vmem:[%s13740_s22 + $0x15e0] ss:$8 sps:$4 sm:$0xff]  }
  0xb4   : > { %8106 = vmatmul.mubr.bf16.vlgmr.msra.gmra.mrb[0].mxu1 %v9854_v6  ;;  %v11610_v6 = vld [vmem:[%s13740_s22 + $0x1f4] ss:$8 sps:$4 sm:$0xff]  }
  0xb5   : > { %8926 = vmatmul.mubr.bf16.vlgmr.msra.gmra.mrb[0].mxu0 %v9894_v7  ;;  %8115 = vmatpush1.bf16.msra.mxu1 %v11516_v8  ;;  %v11613_v7 = vld [vmem:[%s13740_s22 + $0x15f4] ss:$8 sps:$4 sm:$0xff]   ;;  %v11608_v8 = vld [vmem:[%s13740_s22 + $0x1f0] ss:$8 sps:$4 sm:$0xff]  }
  0xb6   : > { %8935 = vmatpush1.bf16.msra.mxu0 %v11521_v9  ;;  %8116 = vmatprep.subr.bf16.mxu1 %v11526_v10  ;;  %v11611_v9 = vld [vmem:[%s13740_s22 + $0x15f0] ss:$8 sps:$4 sm:$0xff]   ;;  %v11618_v10 = vld [vmem:[%s13740_s22 + $0x204] ss:$8 sps:$4 sm:$0xff]  }
  0xb7   : > { %8936 = vmatprep.subr.bf16.mxu0 %v11529_v11  ;;  %8146 = vmatprep.mubr.bf16.mxu1 %v9857_v35  ;;  %v11623_v11 = vld [vmem:[%s13740_s22 + $0x1604] ss:$8 sps:$4 sm:$0xff]   ;;  %v11645_v35 = vld [vmem:[%s13740_s22 + $0x1640] ss:$8 sps:$4 sm:$0xff]  }
  0xb8   : > { %8966 = vmatprep.mubr.bf16.mxu0 %v9897_v38  ;;  %v11648_v38 = vld [vmem:[%s13740_s22 + $0x250] ss:$8 sps:$4 sm:$0xff]  }
  0xb9   : > { %8117 = vmatpush1.bf16.msra.mxu1 %v11524_v12  ;;  %v9856_v12 = vcombine.low %v13836_v32, %v13836_v32  ;;  %v11644_v32 = vld [vmem:[%s13740_s22 + $0x244] ss:$8 sps:$4 sm:$0xff]  }
  0xba   : > { %8937 = vmatpush1.bf16.msra.mxu0 %v11527_v13  ;;  %8118 = vmatprep.subr.bf16.mxu1 %v11532_v14  ;;  %v11616_v13 = vld [vmem:[%s13740_s22 + $0x200] ss:$8 sps:$4 sm:$0xff]   ;;  %v9896_v14 = vcombine.low %v13842_v36, %v13842_v36  ;;  %v11650_v36 = vld [vmem:[%s13740_s22 + $0x254] ss:$8 sps:$4 sm:$0xff]  }
  0xbb   : > { %8938 = vmatprep.subr.bf16.mxu0 %v11535_v15  ;;  %v11621_v15 = vld [vmem:[%s13740_s22 + $0x1600] ss:$8 sps:$4 sm:$0xff]  }
  0xbd   : > { %8119 = vmatpush1.bf16.msra.mxu1 %v11530_v16  ;;  %v11626_v16 = vld [vmem:[%s13740_s22 + $0x214] ss:$8 sps:$4 sm:$0xff]  }
  0xbe   : > { %8939 = vmatpush1.bf16.msra.mxu0 %v11533_v17  ;;  %8120 = vmatprep.subr.bf16.mxu1 %v11538_v18  ;;  %v11629_v17 = vld [vmem:[%s13740_s22 + $0x1614] ss:$8 sps:$4 sm:$0xff]  }
  0xbf   : > { %8940 = vmatprep.subr.bf16.mxu0 %v11541_v19  ;;  %v13892_v18 = vld [vmem:[#allocation2 + $0x10] sm:$0xff] }
  0xc0   : > { %v9859_v19 = vcombine.high %v13892_v18, %v13892_v18 }
  0xc1   : > { %8121 = vmatpush1.bf16.msra.mxu1 %v11536_v20  ;;  %v13896_v20 = vld [vmem:[#allocation2 + $0xb0] sm:$0xff] }
  0xc2   : > { %8941 = vmatpush1.bf16.msra.mxu0 %v11539_v21  ;;  %8122 = vmatprep.subr.bf16.mxu1 %v11544_v22  ;;  %v11624_v21 = vld [vmem:[%s13740_s22 + $0x210] ss:$8 sps:$4 sm:$0xff]  }
  0xc3   : > { %8942 = vmatprep.subr.bf16.mxu0 %v11547_v23  ;;  %v11627_v22 = vld [vmem:[%s13740_s22 + $0x1610] ss:$8 sps:$4 sm:$0xff]   ;;  %v9899_v23 = vcombine.high %v13896_v20, %v13896_v20 }
  0xc5   : > { %8123 = vmatpush1.bf16.msra.mxu1 %v11542_v24  ;;  %v11632_v24 = vld [vmem:[%s13740_s22 + $0x224] ss:$8 sps:$4 sm:$0xff]  }
  0xc6   : > { %8943 = vmatpush1.bf16.msra.mxu0 %v11545_v25  ;;  %8124 = vmatprep.subr.bf16.mxu1 %v11550_v26  ;;  %v11635_v25 = vld [vmem:[%s13740_s22 + $0x1624] ss:$8 sps:$4 sm:$0xff]   ;;  %v11630_v26 = vld [vmem:[%s13740_s22 + $0x220] ss:$8 sps:$4 sm:$0xff]  }
  0xc7   : > { %8944 = vmatprep.subr.bf16.mxu0 %v11553_v27  ;;  %v11633_v27 = vld [vmem:[%s13740_s22 + $0x1620] ss:$8 sps:$4 sm:$0xff]  }
  0xc9   : > { %8125 = vmatpush1.bf16.msra.mxu1 %v11548_v28  ;;  %v11638_v28 = vld [vmem:[%s13740_s22 + $0x234] ss:$8 sps:$4 sm:$0xff]  }
  0xca   : > { %8945 = vmatpush1.bf16.msra.mxu0 %v11551_v29  ;;  %8126 = vmatprep.subr.bf16.mxu1 %v11556_v30  ;;  %v11641_v29 = vld [vmem:[%s13740_s22 + $0x1634] ss:$8 sps:$4 sm:$0xff]   ;;  %v11636_v30 = vld [vmem:[%s13740_s22 + $0x230] ss:$8 sps:$4 sm:$0xff]  }
  0xcb   : > { %8946 = vmatprep.subr.bf16.mxu0 %v11559_v31  ;;  %v11639_v31 = vld [vmem:[%s13740_s22 + $0x1630] ss:$8 sps:$4 sm:$0xff]  }
  0xcd   : > { %8127 = vmatpush1.bf16.msra.mxu1 %v11554_v33  ;;  %v11647_v33 = vld [vmem:[%s13740_s22 + $0x1644] ss:$8 sps:$4 sm:$0xff]  }
  0xce   : > { %8947 = vmatpush1.bf16.msra.mxu0 %v11557_v34  ;;  %8128 = vmatprep.subr.bf16.mxu1 %v11562_v37  ;;  %v11642_v34 = vld [vmem:[%s13740_s22 + $0x240] ss:$8 sps:$4 sm:$0xff]   ;;  %v11653_v37 = vld [vmem:[%s13740_s22 + $0x1654] ss:$8 sps:$4 sm:$0xff]  }
  0xcf   : > { %8948 = vmatprep.subr.bf16.mxu0 %v11565_v39  ;;  %v11651_v39 = vld [vmem:[%s13740_s22 + $0x1650] ss:$8 sps:$4 sm:$0xff]  }
  0xd1   : > { %8129 = vmatpush1.bf16.msra.mxu1 %v11560_v40  ;;  %v11656_v40 = vld [vmem:[%s13740_s22 + $0x264] ss:$8 sps:$4 sm:$0xff]  }
  0xd2   : > { %8949 = vmatpush1.bf16.msra.mxu0 %v11563_v41  ;;  %8130 = vmatprep.subr.bf16.mxu1 %v11568_v42  ;;  %v11659_v41 = vld [vmem:[%s13740_s22 + $0x1664] ss:$8 sps:$4 sm:$0xff]   ;;  %v11654_v42 = vld [vmem:[%s13740_s22 + $0x260] ss:$8 sps:$4 sm:$0xff]  }
  0xd3   : > { %8950 = vmatprep.subr.bf16.mxu0 %v11571_v43  ;;  %v11657_v43 = vld [vmem:[%s13740_s22 + $0x1660] ss:$8 sps:$4 sm:$0xff]  }
  0xd5   : > { %8131 = vmatpush1.bf16.msra.mxu1 %v11566_v44  ;;  %v11662_v44 = vld [vmem:[%s13740_s22 + $0x274] ss:$8 sps:$4 sm:$0xff]  }
  0xd6   : > { %8951 = vmatpush1.bf16.msra.mxu0 %v11569_v45  ;;  %8132 = vmatprep.subr.bf16.mxu1 %v11574_v46  ;;  %v11665_v45 = vld [vmem:[%s13740_s22 + $0x1674] ss:$8 sps:$4 sm:$0xff]   ;;  %v11660_v46 = vld [vmem:[%s13740_s22 + $0x270] ss:$8 sps:$4 sm:$0xff]  }
  0xd7   : > { %8952 = vmatprep.subr.bf16.mxu0 %v11577_v47  ;;  %v11663_v47 = vld [vmem:[%s13740_s22 + $0x1670] ss:$8 sps:$4 sm:$0xff]  }
  0xd9   : > { %8133 = vmatpush1.bf16.msra.mxu1 %v11572_v48  ;;  %v11668_v48 = vld [vmem:[%s13740_s22 + $0x284] ss:$8 sps:$4 sm:$0xff]  }
  0xda   : > { %8953 = vmatpush1.bf16.msra.mxu0 %v11575_v49  ;;  %8134 = vmatprep.subr.bf16.mxu1 %v11580_v50  ;;  %v11671_v49 = vld [vmem:[%s13740_s22 + $0x1684] ss:$8 sps:$4 sm:$0xff]   ;;  %v11666_v50 = vld [vmem:[%s13740_s22 + $0x280] ss:$8 sps:$4 sm:$0xff]  }
  0xdb   : > { %8954 = vmatprep.subr.bf16.mxu0 %v11583_v51  ;;  %v11669_v51 = vld [vmem:[%s13740_s22 + $0x1680] ss:$8 sps:$4 sm:$0xff]  }
  0xdd   : > { %8135 = vmatpush1.bf16.msra.mxu1 %v11578_v52  ;;  %v11674_v52 = vld [vmem:[%s13740_s22 + $0x294] ss:$8 sps:$4 sm:$0xff]  }
  0xde   : > { %8955 = vmatpush1.bf16.msra.mxu0 %v11581_v53  ;;  %8136 = vmatprep.subr.bf16.mxu1 %v11586_v54  ;;  %v11677_v53 = vld [vmem:[%s13740_s22 + $0x1694] ss:$8 sps:$4 sm:$0xff]   ;;  %v11672_v54 = vld [vmem:[%s13740_s22 + $0x290] ss:$8 sps:$4 sm:$0xff]  }
  0xdf   : > { %8956 = vmatprep.subr.bf16.mxu0 %v11589_v55  ;;  %v11675_v55 = vld [vmem:[%s13740_s22 + $0x1690] ss:$8 sps:$4 sm:$0xff]  }
  0xe1   : > { %8137 = vmatpush1.bf16.msra.mxu1 %v11584_v56  ;;  %v11680_v56 = vld [vmem:[%s13740_s22 + $0x2a4] ss:$8 sps:$4 sm:$0xff]  }
  0xe2   : > { %8957 = vmatpush1.bf16.msra.mxu0 %v11587_v57  ;;  %8138 = vmatprep.subr.bf16.mxu1 %v11592_v58  ;;  %v11683_v57 = vld [vmem:[%s13740_s22 + $0x16a4] ss:$8 sps:$4 sm:$0xff]   ;;  %v11678_v58 = vld [vmem:[%s13740_s22 + $0x2a0] ss:$8 sps:$4 sm:$0xff]  }
  0xe3   : > { %8958 = vmatprep.subr.bf16.mxu0 %v11595_v59  ;;  %v11681_v59 = vld [vmem:[%s13740_s22 + $0x16a0] ss:$8 sps:$4 sm:$0xff]  }
  0xe5   : > { %8139 = vmatpush1.bf16.msra.mxu1 %v11590_v60  ;;  %v11686_v60 = vld [vmem:[%s13740_s22 + $0x2b4] ss:$8 sps:$4 sm:$0xff]  }
  0xe6   : > { %8959 = vmatpush1.bf16.msra.mxu0 %v11593_v61  ;;  %8140 = vmatprep.subr.bf16.mxu1 %v11598_v62  ;;  %v11689_v61 = vld [vmem:[%s13740_s22 + $0x16b4] ss:$8 sps:$4 sm:$0xff]   ;;  %v11684_v62 = vld [vmem:[%s13740_s22 + $0x2b0] ss:$8 sps:$4 sm:$0xff]  }
  0xe7   : > { %8960 = vmatprep.subr.bf16.mxu0 %v11601_v63  ;;  %v11687_v63 = vld [vmem:[%s13740_s22 + $0x16b0] ss:$8 sps:$4 sm:$0xff]  }
  0xe9   : > { %8141 = vmatpush1.bf16.msra.mxu1 %v11596_v0  ;;  %v11692_v0 = vld [vmem:[%s13740_s22 + $0x2c4] ss:$8 sps:$4 sm:$0xff]  }
  0xea   : > { %8961 = vmatpush1.bf16.msra.mxu0 %v11599_v1  ;;  %8142 = vmatprep.subr.bf16.mxu1 %v11604_v2  ;;  %v11695_v1 = vld [vmem:[%s13740_s22 + $0x16c4] ss:$8 sps:$4 sm:$0xff]   ;;  %v11690_v2 = vld [vmem:[%s13740_s22 + $0x2c0] ss:$8 sps:$4 sm:$0xff]  }
  0xeb   : > { %8962 = vmatprep.subr.bf16.mxu0 %v11607_v3  ;;  %v11693_v3 = vld [vmem:[%s13740_s22 + $0x16c0] ss:$8 sps:$4 sm:$0xff]  }
  0xed   : > { %8143 = vmatpush1.bf16.msra.mxu1 %v11602_v4  ;;  %v11698_v4 = vld [vmem:[%s13740_s22 + $0x2d4] ss:$8 sps:$4 sm:$0xff]  }
  0xee   : > { %8963 = vmatpush1.bf16.msra.mxu0 %v11605_v5  ;;  %8144 = vmatprep.subr.bf16.mxu1 %v11610_v6  ;;  %v11701_v5 = vld [vmem:[%s13740_s22 + $0x16d4] ss:$8 sps:$4 sm:$0xff]   ;;  %v11696_v6 = vld [vmem:[%s13740_s22 + $0x2d0] ss:$8 sps:$4 sm:$0xff]  }
  0xef   : > { %8964 = vmatprep.subr.bf16.mxu0 %v11613_v7  ;;  %v11699_v7 = vld [vmem:[%s13740_s22 + $0x16d0] ss:$8 sps:$4 sm:$0xff]  }
  0xf1   : > { %8145 = vmatpush1.bf16.msra.mxu1 %v11608_v8  ;;  %v11704_v8 = vld [vmem:[%s13740_s22 + $0x2e4] ss:$8 sps:$4 sm:$0xff]  }
  0xf2   : > { %8965 = vmatpush1.bf16.msra.mxu0 %v11611_v9  ;;  %8155 = vmatprep.subr.bf16.mxu1 %v11618_v10  ;;  %v11707_v9 = vld [vmem:[%s13740_s22 + $0x16e4] ss:$8 sps:$4 sm:$0xff]   ;;  %v11702_v10 = vld [vmem:[%s13740_s22 + $0x2e0] ss:$8 sps:$4 sm:$0xff]  }
  0xf3   : > { %8975 = vmatprep.subr.bf16.mxu0 %v11623_v11  ;;  %v11705_v11 = vld [vmem:[%s13740_s22 + $0x16e0] ss:$8 sps:$4 sm:$0xff]  }
  0xf4   : > { %8147 = vmatmul.mubr.bf16.vlgmr.msra.gmra.mrb[0].mxu1 %v9856_v12  ;;  %v11710_v12 = vld [vmem:[%s13740_s22 + $0x2f4] ss:$8 sps:$4 sm:$0xff]  }
  0xf5   : > { %8967 = vmatmul.mubr.bf16.vlgmr.msra.gmra.mrb[0].mxu0 %v9896_v14  ;;  %8156 = vmatpush1.bf16.msra.mxu1 %v11616_v13  ;;  %v11713_v13 = vld [vmem:[%s13740_s22 + $0x16f4] ss:$8 sps:$4 sm:$0xff]   ;;  %v11708_v14 = vld [vmem:[%s13740_s22 + $0x2f0] ss:$8 sps:$4 sm:$0xff]  }
  0xf6   : > { %8976 = vmatpush1.bf16.msra.mxu0 %v11621_v15  ;;  %8157 = vmatprep.subr.bf16.mxu1 %v11626_v16  ;;  %v11711_v15 = vld [vmem:[%s13740_s22 + $0x16f0] ss:$8 sps:$4 sm:$0xff]   ;;  %v11718_v16 = vld [vmem:[%s13740_s22 + $0x304] ss:$8 sps:$4 sm:$0xff]  }
  0xf7   : > { %8977 = vmatprep.subr.bf16.mxu0 %v11629_v17  ;;  %8187 = vmatprep.mubr.bf16.mxu1 %v9859_v19  ;;  %v11723_v17 = vld [vmem:[%s13740_s22 + $0x1704] ss:$8 sps:$4 sm:$0xff]   ;;  %v11716_v19 = vld [vmem:[%s13740_s22 + $0x300] ss:$8 sps:$4 sm:$0xff]  }
  0xf8   : > { %9007 = vmatprep.mubr.bf16.mxu0 %v9899_v23  ;;  %v9898_v23 = vcombine.low %v13896_v20, %v13896_v20 }
  0xf9   : > { %8158 = vmatpush1.bf16.msra.mxu1 %v11624_v21  ;;  %v11721_v21 = vld [vmem:[%s13740_s22 + $0x1700] ss:$8 sps:$4 sm:$0xff]  }
  0xfa   : > { %8978 = vmatpush1.bf16.msra.mxu0 %v11627_v22  ;;  %8159 = vmatprep.subr.bf16.mxu1 %v11632_v24  ;;  %v9858_v22 = vcombine.low %v13892_v18, %v13892_v18  ;;  %v13966_v24 = vld [vmem:[#allocation2 + $0x18] sm:$0xff] }
  0xfb   : > { %8979 = vmatprep.subr.bf16.mxu0 %v11635_v25  ;;  %v13968_v25 = vld [vmem:[#allocation2 + $0xb8] sm:$0xff]  ;;  %v9861_v18 = vcombine.high %v13966_v24, %v13966_v24 }
  0xfc   : > { %v9901_v20 = vcombine.high %v13968_v25, %v13968_v25 }
  0xfd   : > { %8160 = vmatpush1.bf16.msra.mxu1 %v11630_v26  ;;  %v11726_v26 = vld [vmem:[%s13740_s22 + $0x314] ss:$8 sps:$4 sm:$0xff]  }
  0xfe   : > { %8980 = vmatpush1.bf16.msra.mxu0 %v11633_v27  ;;  %8161 = vmatprep.subr.bf16.mxu1 %v11638_v28  ;;  %v11729_v27 = vld [vmem:[%s13740_s22 + $0x1714] ss:$8 sps:$4 sm:$0xff]   ;;  %v11724_v28 = vld [vmem:[%s13740_s22 + $0x310] ss:$8 sps:$4 sm:$0xff]  }
  0xff   : > { %8981 = vmatprep.subr.bf16.mxu0 %v11641_v29  ;;  %v11727_v29 = vld [vmem:[%s13740_s22 + $0x1710] ss:$8 sps:$4 sm:$0xff]  }
 0x101   : > { %8162 = vmatpush1.bf16.msra.mxu1 %v11636_v30  ;;  %v11732_v30 = vld [vmem:[%s13740_s22 + $0x324] ss:$8 sps:$4 sm:$0xff]  }
 0x102   : > { %8982 = vmatpush1.bf16.msra.mxu0 %v11639_v31  ;;  %8163 = vmatprep.subr.bf16.mxu1 %v11644_v32  ;;  %v11735_v31 = vld [vmem:[%s13740_s22 + $0x1724] ss:$8 sps:$4 sm:$0xff]   ;;  %v11730_v32 = vld [vmem:[%s13740_s22 + $0x320] ss:$8 sps:$4 sm:$0xff]  }
 0x103   : > { %8983 = vmatprep.subr.bf16.mxu0 %v11647_v33  ;;  %v11733_v33 = vld [vmem:[%s13740_s22 + $0x1720] ss:$8 sps:$4 sm:$0xff]  }
 0x105   : > { %8164 = vmatpush1.bf16.msra.mxu1 %v11642_v34  ;;  %v11738_v34 = vld [vmem:[%s13740_s22 + $0x334] ss:$8 sps:$4 sm:$0xff]  }
 0x106   : > { %8984 = vmatpush1.bf16.msra.mxu0 %v11645_v35  ;;  %8165 = vmatprep.subr.bf16.mxu1 %v11650_v36  ;;  %v11741_v35 = vld [vmem:[%s13740_s22 + $0x1734] ss:$8 sps:$4 sm:$0xff]   ;;  %v11736_v36 = vld [vmem:[%s13740_s22 + $0x330] ss:$8 sps:$4 sm:$0xff]  }
 0x107   : > { %8985 = vmatprep.subr.bf16.mxu0 %v11653_v37  ;;  %v11739_v37 = vld [vmem:[%s13740_s22 + $0x1730] ss:$8 sps:$4 sm:$0xff]  }
 0x109   : > { %8166 = vmatpush1.bf16.msra.mxu1 %v11648_v38  ;;  %v11744_v38 = vld [vmem:[%s13740_s22 + $0x344] ss:$8 sps:$4 sm:$0xff]  }
 0x10a   : > { %8986 = vmatpush1.bf16.msra.mxu0 %v11651_v39  ;;  %8167 = vmatprep.subr.bf16.mxu1 %v11656_v40  ;;  %v11747_v39 = vld [vmem:[%s13740_s22 + $0x1744] ss:$8 sps:$4 sm:$0xff]   ;;  %v11742_v40 = vld [vmem:[%s13740_s22 + $0x340] ss:$8 sps:$4 sm:$0xff]  }
 0x10b   : > { %8987 = vmatprep.subr.bf16.mxu0 %v11659_v41  ;;  %v11745_v41 = vld [vmem:[%s13740_s22 + $0x1740] ss:$8 sps:$4 sm:$0xff]  }
 0x10d   : > { %8168 = vmatpush1.bf16.msra.mxu1 %v11654_v42  ;;  %v11750_v42 = vld [vmem:[%s13740_s22 + $0x354] ss:$8 sps:$4 sm:$0xff]  }
 0x10e   : > { %8988 = vmatpush1.bf16.msra.mxu0 %v11657_v43  ;;  %8169 = vmatprep.subr.bf16.mxu1 %v11662_v44  ;;  %v11753_v43 = vld [vmem:[%s13740_s22 + $0x1754] ss:$8 sps:$4 sm:$0xff]   ;;  %v11748_v44 = vld [vmem:[%s13740_s22 + $0x350] ss:$8 sps:$4 sm:$0xff]  }
 0x10f   : > { %8989 = vmatprep.subr.bf16.mxu0 %v11665_v45  ;;  %v11751_v45 = vld [vmem:[%s13740_s22 + $0x1750] ss:$8 sps:$4 sm:$0xff]  }
 0x111   : > { %8170 = vmatpush1.bf16.msra.mxu1 %v11660_v46  ;;  %v11756_v46 = vld [vmem:[%s13740_s22 + $0x364] ss:$8 sps:$4 sm:$0xff]  }
 0x112   : > { %8990 = vmatpush1.bf16.msra.mxu0 %v11663_v47  ;;  %8171 = vmatprep.subr.bf16.mxu1 %v11668_v48  ;;  %v11759_v47 = vld [vmem:[%s13740_s22 + $0x1764] ss:$8 sps:$4 sm:$0xff]   ;;  %v11754_v48 = vld [vmem:[%s13740_s22 + $0x360] ss:$8 sps:$4 sm:$0xff]  }
 0x113   : > { %8991 = vmatprep.subr.bf16.mxu0 %v11671_v49  ;;  %v11757_v49 = vld [vmem:[%s13740_s22 + $0x1760] ss:$8 sps:$4 sm:$0xff]  }
 0x115   : > { %8172 = vmatpush1.bf16.msra.mxu1 %v11666_v50  ;;  %v11762_v50 = vld [vmem:[%s13740_s22 + $0x374] ss:$8 sps:$4 sm:$0xff]  }
 0x116   : > { %8992 = vmatpush1.bf16.msra.mxu0 %v11669_v51  ;;  %8173 = vmatprep.subr.bf16.mxu1 %v11674_v52  ;;  %v11765_v51 = vld [vmem:[%s13740_s22 + $0x1774] ss:$8 sps:$4 sm:$0xff]   ;;  %v11760_v52 = vld [vmem:[%s13740_s22 + $0x370] ss:$8 sps:$4 sm:$0xff]  }
 0x117   : > { %8993 = vmatprep.subr.bf16.mxu0 %v11677_v53  ;;  %v11763_v53 = vld [vmem:[%s13740_s22 + $0x1770] ss:$8 sps:$4 sm:$0xff]  }
 0x119   : > { %8174 = vmatpush1.bf16.msra.mxu1 %v11672_v54  ;;  %v11768_v54 = vld [vmem:[%s13740_s22 + $0x384] ss:$8 sps:$4 sm:$0xff]  }
 0x11a   : > { %8994 = vmatpush1.bf16.msra.mxu0 %v11675_v55  ;;  %8175 = vmatprep.subr.bf16.mxu1 %v11680_v56  ;;  %v11771_v55 = vld [vmem:[%s13740_s22 + $0x1784] ss:$8 sps:$4 sm:$0xff]   ;;  %v11766_v56 = vld [vmem:[%s13740_s22 + $0x380] ss:$8 sps:$4 sm:$0xff]  }
 0x11b   : > { %8995 = vmatprep.subr.bf16.mxu0 %v11683_v57  ;;  %v11769_v57 = vld [vmem:[%s13740_s22 + $0x1780] ss:$8 sps:$4 sm:$0xff]  }
 0x11d   : > { %8176 = vmatpush1.bf16.msra.mxu1 %v11678_v58  ;;  %v11774_v58 = vld [vmem:[%s13740_s22 + $0x394] ss:$8 sps:$4 sm:$0xff]  }
 0x11e   : > { %8996 = vmatpush1.bf16.msra.mxu0 %v11681_v59  ;;  %8177 = vmatprep.subr.bf16.mxu1 %v11686_v60  ;;  %v11777_v59 = vld [vmem:[%s13740_s22 + $0x1794] ss:$8 sps:$4 sm:$0xff]   ;;  %v11772_v60 = vld [vmem:[%s13740_s22 + $0x390] ss:$8 sps:$4 sm:$0xff]  }
 0x11f   : > { %8997 = vmatprep.subr.bf16.mxu0 %v11689_v61  ;;  %v11775_v61 = vld [vmem:[%s13740_s22 + $0x1790] ss:$8 sps:$4 sm:$0xff]  }
 0x121   : > { %8178 = vmatpush1.bf16.msra.mxu1 %v11684_v62  ;;  %v11780_v62 = vld [vmem:[%s13740_s22 + $0x3a4] ss:$8 sps:$4 sm:$0xff]  }
 0x122   : > { %8998 = vmatpush1.bf16.msra.mxu0 %v11687_v63  ;;  %8179 = vmatprep.subr.bf16.mxu1 %v11692_v0  ;;  %v11783_v63 = vld [vmem:[%s13740_s22 + $0x17a4] ss:$8 sps:$4 sm:$0xff]   ;;  %v11778_v0 = vld [vmem:[%s13740_s22 + $0x3a0] ss:$8 sps:$4 sm:$0xff]  }
 0x123   : > { %8999 = vmatprep.subr.bf16.mxu0 %v11695_v1  ;;  %v11781_v1 = vld [vmem:[%s13740_s22 + $0x17a0] ss:$8 sps:$4 sm:$0xff]  }
 0x125   : > { %8180 = vmatpush1.bf16.msra.mxu1 %v11690_v2  ;;  %v11786_v2 = vld [vmem:[%s13740_s22 + $0x3b4] ss:$8 sps:$4 sm:$0xff]  }
 0x126   : > { %9000 = vmatpush1.bf16.msra.mxu0 %v11693_v3  ;;  %8181 = vmatprep.subr.bf16.mxu1 %v11698_v4  ;;  %v11789_v3 = vld [vmem:[%s13740_s22 + $0x17b4] ss:$8 sps:$4 sm:$0xff]   ;;  %v11784_v4 = vld [vmem:[%s13740_s22 + $0x3b0] ss:$8 sps:$4 sm:$0xff]  }
 0x127   : > { %9001 = vmatprep.subr.bf16.mxu0 %v11701_v5  ;;  %v11787_v5 = vld [vmem:[%s13740_s22 + $0x17b0] ss:$8 sps:$4 sm:$0xff]  }
 0x129   : > { %8182 = vmatpush1.bf16.msra.mxu1 %v11696_v6  ;;  %v11792_v6 = vld [vmem:[%s13740_s22 + $0x3c4] ss:$8 sps:$4 sm:$0xff]  }
 0x12a   : > { %9002 = vmatpush1.bf16.msra.mxu0 %v11699_v7  ;;  %8183 = vmatprep.subr.bf16.mxu1 %v11704_v8  ;;  %v11795_v7 = vld [vmem:[%s13740_s22 + $0x17c4] ss:$8 sps:$4 sm:$0xff]   ;;  %v11790_v8 = vld [vmem:[%s13740_s22 + $0x3c0] ss:$8 sps:$4 sm:$0xff]  }
 0x12b   : > { %9003 = vmatprep.subr.bf16.mxu0 %v11707_v9  ;;  %v11793_v9 = vld [vmem:[%s13740_s22 + $0x17c0] ss:$8 sps:$4 sm:$0xff]  }
 0x12d   : > { %8184 = vmatpush1.bf16.msra.mxu1 %v11702_v10  ;;  %v11798_v10 = vld [vmem:[%s13740_s22 + $0x3d4] ss:$8 sps:$4 sm:$0xff]  }
 0x12e   : > { %9004 = vmatpush1.bf16.msra.mxu0 %v11705_v11  ;;  %8185 = vmatprep.subr.bf16.mxu1 %v11710_v12  ;;  %v11801_v11 = vld [vmem:[%s13740_s22 + $0x17d4] ss:$8 sps:$4 sm:$0xff]   ;;  %v11796_v12 = vld [vmem:[%s13740_s22 + $0x3d0] ss:$8 sps:$4 sm:$0xff]  }
 0x12f   : > { %9005 = vmatprep.subr.bf16.mxu0 %v11713_v13  ;;  %v11799_v13 = vld [vmem:[%s13740_s22 + $0x17d0] ss:$8 sps:$4 sm:$0xff]  }
 0x131   : > { %8186 = vmatpush1.bf16.msra.mxu1 %v11708_v14  ;;  %v11804_v14 = vld [vmem:[%s13740_s22 + $0x3e4] ss:$8 sps:$4 sm:$0xff]  }
 0x132   : > { %9006 = vmatpush1.bf16.msra.mxu0 %v11711_v15  ;;  %8196 = vmatprep.subr.bf16.mxu1 %v11718_v16  ;;  %v11807_v15 = vld [vmem:[%s13740_s22 + $0x17e4] ss:$8 sps:$4 sm:$0xff]   ;;  %v11802_v16 = vld [vmem:[%s13740_s22 + $0x3e0] ss:$8 sps:$4 sm:$0xff]  }
 0x133   : > { %9016 = vmatprep.subr.bf16.mxu0 %v11723_v17  ;;  %v11805_v17 = vld [vmem:[%s13740_s22 + $0x17e0] ss:$8 sps:$4 sm:$0xff]  }
 0x134   : > { %8188 = vmatmul.mubr.bf16.vlgmr.msra.gmra.mrb[0].mxu1 %v9858_v22  ;;  %v11808_v22 = vld [vmem:[%s13740_s22 + $0x3f0] ss:$8 sps:$4 sm:$0xff]  }
 0x135   : > { %9008 = vmatmul.mubr.bf16.vlgmr.msra.gmra.mrb[0].mxu0 %v9898_v23  ;;  %8197 = vmatpush1.bf16.msra.mxu1 %v11716_v19  ;;  %v11810_v19 = vld [vmem:[%s13740_s22 + $0x3f4] ss:$8 sps:$4 sm:$0xff]   ;;  %v11811_v23 = vld [vmem:[%s13740_s22 + $0x17f0] ss:$8 sps:$4 sm:$0xff]  }
 0x136   : > { %9017 = vmatpush1.bf16.msra.mxu0 %v11721_v21  ;;  %8198 = vmatprep.subr.bf16.mxu1 %v11726_v26  ;;  %v11813_v21 = vld [vmem:[%s13740_s22 + $0x17f4] ss:$8 sps:$4 sm:$0xff]   ;;  %v11818_v26 = vld [vmem:[%s13740_s22 + $0x404] ss:$8 sps:$4 sm:$0xff]  }
 0x137   : > { %9018 = vmatprep.subr.bf16.mxu0 %v11729_v27  ;;  %8228 = vmatprep.mubr.bf16.mxu1 %v9861_v18  ;;  %v11823_v27 = vld [vmem:[%s13740_s22 + $0x1804] ss:$8 sps:$4 sm:$0xff]  }
 0x138   : > { %9048 = vmatprep.mubr.bf16.mxu0 %v9901_v20  ;;  %v14036_v18 = vld [vmem:[#allocation2 + $0x20] sm:$0xff]  ;;  %v9860_v20 = vcombine.low %v13966_v24, %v13966_v24 }
 0x139   : > { %8199 = vmatpush1.bf16.msra.mxu1 %v11724_v28  ;;  %v9900_v28 = vcombine.low %v13968_v25, %v13968_v25  ;;  %v9863_v24 = vcombine.high %v14036_v18, %v14036_v18 }
 0x13a   : > { %9019 = vmatpush1.bf16.msra.mxu0 %v11727_v29  ;;  %8200 = vmatprep.subr.bf16.mxu1 %v11732_v30  ;;  %v14042_v29 = vld [vmem:[#allocation2 + $0xc0] sm:$0xff] }
 0x13b   : > { %9020 = vmatprep.subr.bf16.mxu0 %v11735_v31  ;;  %v11816_v30 = vld [vmem:[%s13740_s22 + $0x400] ss:$8 sps:$4 sm:$0xff]   ;;  %v9903_v25 = vcombine.high %v14042_v29, %v14042_v29 }
 0x13c   : > { %v11821_v31 = vld [vmem:[%s13740_s22 + $0x1800] ss:$8 sps:$4 sm:$0xff]  }
 0x13d   : > { %8201 = vmatpush1.bf16.msra.mxu1 %v11730_v32  ;;  %v11826_v32 = vld [vmem:[%s13740_s22 + $0x414] ss:$8 sps:$4 sm:$0xff]  }
 0x13e   : > { %9021 = vmatpush1.bf16.msra.mxu0 %v11733_v33  ;;  %8202 = vmatprep.subr.bf16.mxu1 %v11738_v34  ;;  %v11829_v33 = vld [vmem:[%s13740_s22 + $0x1814] ss:$8 sps:$4 sm:$0xff]   ;;  %v11824_v34 = vld [vmem:[%s13740_s22 + $0x410] ss:$8 sps:$4 sm:$0xff]  }
 0x13f   : > { %9022 = vmatprep.subr.bf16.mxu0 %v11741_v35  ;;  %v11827_v35 = vld [vmem:[%s13740_s22 + $0x1810] ss:$8 sps:$4 sm:$0xff]  }
 0x141   : > { %8203 = vmatpush1.bf16.msra.mxu1 %v11736_v36  ;;  %v11832_v36 = vld [vmem:[%s13740_s22 + $0x424] ss:$8 sps:$4 sm:$0xff]  }
 0x142   : > { %9023 = vmatpush1.bf16.msra.mxu0 %v11739_v37  ;;  %8204 = vmatprep.subr.bf16.mxu1 %v11744_v38  ;;  %v11835_v37 = vld [vmem:[%s13740_s22 + $0x1824] ss:$8 sps:$4 sm:$0xff]   ;;  %v11830_v38 = vld [vmem:[%s13740_s22 + $0x420] ss:$8 sps:$4 sm:$0xff]  }
 0x143   : > { %9024 = vmatprep.subr.bf16.mxu0 %v11747_v39  ;;  %v11833_v39 = vld [vmem:[%s13740_s22 + $0x1820] ss:$8 sps:$4 sm:$0xff]  }
 0x145   : > { %8205 = vmatpush1.bf16.msra.mxu1 %v11742_v40  ;;  %v11838_v40 = vld [vmem:[%s13740_s22 + $0x434] ss:$8 sps:$4 sm:$0xff]  }
 0x146   : > { %9025 = vmatpush1.bf16.msra.mxu0 %v11745_v41  ;;  %8206 = vmatprep.subr.bf16.mxu1 %v11750_v42  ;;  %v11841_v41 = vld [vmem:[%s13740_s22 + $0x1834] ss:$8 sps:$4 sm:$0xff]   ;;  %v11836_v42 = vld [vmem:[%s13740_s22 + $0x430] ss:$8 sps:$4 sm:$0xff]  }
 0x147   : > { %9026 = vmatprep.subr.bf16.mxu0 %v11753_v43  ;;  %v11839_v43 = vld [vmem:[%s13740_s22 + $0x1830] ss:$8 sps:$4 sm:$0xff]  }
 0x149   : > { %8207 = vmatpush1.bf16.msra.mxu1 %v11748_v44  ;;  %v11844_v44 = vld [vmem:[%s13740_s22 + $0x444] ss:$8 sps:$4 sm:$0xff]  }
 0x14a   : > { %9027 = vmatpush1.bf16.msra.mxu0 %v11751_v45  ;;  %8208 = vmatprep.subr.bf16.mxu1 %v11756_v46  ;;  %v11847_v45 = vld [vmem:[%s13740_s22 + $0x1844] ss:$8 sps:$4 sm:$0xff]   ;;  %v11842_v46 = vld [vmem:[%s13740_s22 + $0x440] ss:$8 sps:$4 sm:$0xff]  }
 0x14b   : > { %9028 = vmatprep.subr.bf16.mxu0 %v11759_v47  ;;  %v11845_v47 = vld [vmem:[%s13740_s22 + $0x1840] ss:$8 sps:$4 sm:$0xff]  }
 0x14d   : > { %8209 = vmatpush1.bf16.msra.mxu1 %v11754_v48  ;;  %v11850_v48 = vld [vmem:[%s13740_s22 + $0x454] ss:$8 sps:$4 sm:$0xff]  }
 0x14e   : > { %9029 = vmatpush1.bf16.msra.mxu0 %v11757_v49  ;;  %8210 = vmatprep.subr.bf16.mxu1 %v11762_v50  ;;  %v11853_v49 = vld [vmem:[%s13740_s22 + $0x1854] ss:$8 sps:$4 sm:$0xff]   ;;  %v11848_v50 = vld [vmem:[%s13740_s22 + $0x450] ss:$8 sps:$4 sm:$0xff]  }
 0x14f   : > { %9030 = vmatprep.subr.bf16.mxu0 %v11765_v51  ;;  %v11851_v51 = vld [vmem:[%s13740_s22 + $0x1850] ss:$8 sps:$4 sm:$0xff]  }
 0x151   : > { %8211 = vmatpush1.bf16.msra.mxu1 %v11760_v52  ;;  %v11856_v52 = vld [vmem:[%s13740_s22 + $0x464] ss:$8 sps:$4 sm:$0xff]  }
 0x152   : > { %9031 = vmatpush1.bf16.msra.mxu0 %v11763_v53  ;;  %8212 = vmatprep.subr.bf16.mxu1 %v11768_v54  ;;  %v11859_v53 = vld [vmem:[%s13740_s22 + $0x1864] ss:$8 sps:$4 sm:$0xff]   ;;  %v11854_v54 = vld [vmem:[%s13740_s22 + $0x460] ss:$8 sps:$4 sm:$0xff]  }
 0x153   : > { %9032 = vmatprep.subr.bf16.mxu0 %v11771_v55  ;;  %v11857_v55 = vld [vmem:[%s13740_s22 + $0x1860] ss:$8 sps:$4 sm:$0xff]  }
 0x155   : > { %8213 = vmatpush1.bf16.msra.mxu1 %v11766_v56  ;;  %v11862_v56 = vld [vmem:[%s13740_s22 + $0x474] ss:$8 sps:$4 sm:$0xff]  }
 0x156   : > { %9033 = vmatpush1.bf16.msra.mxu0 %v11769_v57  ;;  %8214 = vmatprep.subr.bf16.mxu1 %v11774_v58  ;;  %v11865_v57 = vld [vmem:[%s13740_s22 + $0x1874] ss:$8 sps:$4 sm:$0xff]   ;;  %v11860_v58 = vld [vmem:[%s13740_s22 + $0x470] ss:$8 sps:$4 sm:$0xff]  }
 0x157   : > { %9034 = vmatprep.subr.bf16.mxu0 %v11777_v59  ;;  %v11863_v59 = vld [vmem:[%s13740_s22 + $0x1870] ss:$8 sps:$4 sm:$0xff]  }
 0x159   : > { %8215 = vmatpush1.bf16.msra.mxu1 %v11772_v60  ;;  %v11868_v60 = vld [vmem:[%s13740_s22 + $0x484] ss:$8 sps:$4 sm:$0xff]  }
 0x15a   : > { %9035 = vmatpush1.bf16.msra.mxu0 %v11775_v61  ;;  %8216 = vmatprep.subr.bf16.mxu1 %v11780_v62  ;;  %v11871_v61 = vld [vmem:[%s13740_s22 + $0x1884] ss:$8 sps:$4 sm:$0xff]   ;;  %v11866_v62 = vld [vmem:[%s13740_s22 + $0x480] ss:$8 sps:$4 sm:$0xff]  }
 0x15b   : > { %9036 = vmatprep.subr.bf16.mxu0 %v11783_v63  ;;  %v11869_v63 = vld [vmem:[%s13740_s22 + $0x1880] ss:$8 sps:$4 sm:$0xff]  }
 0x15d   : > { %8217 = vmatpush1.bf16.msra.mxu1 %v11778_v0  ;;  %v11874_v0 = vld [vmem:[%s13740_s22 + $0x494] ss:$8 sps:$4 sm:$0xff]  }
 0x15e   : > { %9037 = vmatpush1.bf16.msra.mxu0 %v11781_v1  ;;  %8218 = vmatprep.subr.bf16.mxu1 %v11786_v2  ;;  %v11877_v1 = vld [vmem:[%s13740_s22 + $0x1894] ss:$8 sps:$4 sm:$0xff]   ;;  %v11872_v2 = vld [vmem:[%s13740_s22 + $0x490] ss:$8 sps:$4 sm:$0xff]  }
 0x15f   : > { %9038 = vmatprep.subr.bf16.mxu0 %v11789_v3  ;;  %v11875_v3 = vld [vmem:[%s13740_s22 + $0x1890] ss:$8 sps:$4 sm:$0xff]  }
 0x161   : > { %8219 = vmatpush1.bf16.msra.mxu1 %v11784_v4  ;;  %v11880_v4 = vld [vmem:[%s13740_s22 + $0x4a4] ss:$8 sps:$4 sm:$0xff]  }
 0x162   : > { %9039 = vmatpush1.bf16.msra.mxu0 %v11787_v5  ;;  %8220 = vmatprep.subr.bf16.mxu1 %v11792_v6  ;;  %v11883_v5 = vld [vmem:[%s13740_s22 + $0x18a4] ss:$8 sps:$4 sm:$0xff]   ;;  %v11878_v6 = vld [vmem:[%s13740_s22 + $0x4a0] ss:$8 sps:$4 sm:$0xff]  }
 0x163   : > { %9040 = vmatprep.subr.bf16.mxu0 %v11795_v7  ;;  %v11881_v7 = vld [vmem:[%s13740_s22 + $0x18a0] ss:$8 sps:$4 sm:$0xff]  }
 0x165   : > { %8221 = vmatpush1.bf16.msra.mxu1 %v11790_v8  ;;  %v11886_v8 = vld [vmem:[%s13740_s22 + $0x4b4] ss:$8 sps:$4 sm:$0xff]  }
 0x166   : > { %9041 = vmatpush1.bf16.msra.mxu0 %v11793_v9  ;;  %8222 = vmatprep.subr.bf16.mxu1 %v11798_v10  ;;  %v11889_v9 = vld [vmem:[%s13740_s22 + $0x18b4] ss:$8 sps:$4 sm:$0xff]   ;;  %v11884_v10 = vld [vmem:[%s13740_s22 + $0x4b0] ss:$8 sps:$4 sm:$0xff]  }
 0x167   : > { %9042 = vmatprep.subr.bf16.mxu0 %v11801_v11  ;;  %v11887_v11 = vld [vmem:[%s13740_s22 + $0x18b0] ss:$8 sps:$4 sm:$0xff]  }
 0x169   : > { %8223 = vmatpush1.bf16.msra.mxu1 %v11796_v12  ;;  %v11892_v12 = vld [vmem:[%s13740_s22 + $0x4c4] ss:$8 sps:$4 sm:$0xff]  }
 0x16a   : > { %9043 = vmatpush1.bf16.msra.mxu0 %v11799_v13  ;;  %8224 = vmatprep.subr.bf16.mxu1 %v11804_v14  ;;  %v11895_v13 = vld [vmem:[%s13740_s22 + $0x18c4] ss:$8 sps:$4 sm:$0xff]   ;;  %v11890_v14 = vld [vmem:[%s13740_s22 + $0x4c0] ss:$8 sps:$4 sm:$0xff]  }
 0x16b   : > { %9044 = vmatprep.subr.bf16.mxu0 %v11807_v15  ;;  %v11893_v15 = vld [vmem:[%s13740_s22 + $0x18c0] ss:$8 sps:$4 sm:$0xff]  }
 0x16d   : > { %8225 = vmatpush1.bf16.msra.mxu1 %v11802_v16  ;;  %v11898_v16 = vld [vmem:[%s13740_s22 + $0x4d4] ss:$8 sps:$4 sm:$0xff]  }
 0x16e   : > { %9045 = vmatpush1.bf16.msra.mxu0 %v11805_v17  ;;  %8226 = vmatprep.subr.bf16.mxu1 %v11810_v19  ;;  %v11901_v17 = vld [vmem:[%s13740_s22 + $0x18d4] ss:$8 sps:$4 sm:$0xff]   ;;  %v11896_v19 = vld [vmem:[%s13740_s22 + $0x4d0] ss:$8 sps:$4 sm:$0xff]  }
 0x16f   : > { %9046 = vmatprep.subr.bf16.mxu0 %v11813_v21  ;;  %v11899_v21 = vld [vmem:[%s13740_s22 + $0x18d0] ss:$8 sps:$4 sm:$0xff]  }
 0x171   : > { %8227 = vmatpush1.bf16.msra.mxu1 %v11808_v22  ;;  %v11904_v22 = vld [vmem:[%s13740_s22 + $0x4e4] ss:$8 sps:$4 sm:$0xff]  }
 0x172   : > { %9047 = vmatpush1.bf16.msra.mxu0 %v11811_v23  ;;  %8237 = vmatprep.subr.bf16.mxu1 %v11818_v26  ;;  %v11907_v23 = vld [vmem:[%s13740_s22 + $0x18e4] ss:$8 sps:$4 sm:$0xff]   ;;  %v11902_v26 = vld [vmem:[%s13740_s22 + $0x4e0] ss:$8 sps:$4 sm:$0xff]  }
 0x173   : > { %9057 = vmatprep.subr.bf16.mxu0 %v11823_v27  ;;  %v11905_v27 = vld [vmem:[%s13740_s22 + $0x18e0] ss:$8 sps:$4 sm:$0xff]  }
 0x174   : > { %8229 = vmatmul.mubr.bf16.vlgmr.msra.gmra.mrb[0].mxu1 %v9860_v20  ;;  %v11910_v20 = vld [vmem:[%s13740_s22 + $0x4f4] ss:$8 sps:$4 sm:$0xff]  }
 0x175   : > { %9049 = vmatmul.mubr.bf16.vlgmr.msra.gmra.mrb[0].mxu0 %v9900_v28  ;;  %8238 = vmatpush1.bf16.msra.mxu1 %v11816_v30  ;;  %v11913_v28 = vld [vmem:[%s13740_s22 + $0x18f4] ss:$8 sps:$4 sm:$0xff]   ;;  %v11908_v30 = vld [vmem:[%s13740_s22 + $0x4f0] ss:$8 sps:$4 sm:$0xff]  }
 0x176   : > { %9058 = vmatpush1.bf16.msra.mxu0 %v11821_v31  ;;  %8239 = vmatprep.subr.bf16.mxu1 %v11826_v32  ;;  %v11911_v31 = vld [vmem:[%s13740_s22 + $0x18f0] ss:$8 sps:$4 sm:$0xff]   ;;  %v11918_v32 = vld [vmem:[%s13740_s22 + $0x504] ss:$8 sps:$4 sm:$0xff]  }
 0x177   : > { %9059 = vmatprep.subr.bf16.mxu0 %v11829_v33  ;;  %8269 = vmatprep.mubr.bf16.mxu1 %v9863_v24  ;;  %v11923_v33 = vld [vmem:[%s13740_s22 + $0x1904] ss:$8 sps:$4 sm:$0xff]  }
 0x178   : > { %9089 = vmatprep.mubr.bf16.mxu0 %v9903_v25  ;;  %v14112_v24 = vld [vmem:[#allocation2 + $0x28] sm:$0xff] }
 0x179   : > { %8240 = vmatpush1.bf16.msra.mxu1 %v11824_v34  ;;  %v14114_v25 = vld [vmem:[#allocation2 + $0xc8] sm:$0xff]  ;;  %v9862_v34 = vcombine.low %v14036_v18, %v14036_v18 }
 0x17a   : > { %9060 = vmatpush1.bf16.msra.mxu0 %v11827_v35  ;;  %8241 = vmatprep.subr.bf16.mxu1 %v11832_v36  ;;  %v9902_v35 = vcombine.low %v14042_v29, %v14042_v29  ;;  %v11916_v36 = vld [vmem:[%s13740_s22 + $0x500] ss:$8 sps:$4 sm:$0xff]   ;;  %v9905_v18 = vcombine.high %v14114_v25, %v14114_v25  ;;  %v11924_v29 = vld [vmem:[%s13740_s22 + $0x510] ss:$8 sps:$4 sm:$0xff]  }
 0x17b   : > { %9061 = vmatprep.subr.bf16.mxu0 %v11835_v37  ;;  %v11921_v37 = vld [vmem:[%s13740_s22 + $0x1900] ss:$8 sps:$4 sm:$0xff]  }
 0x17d   : > { %8242 = vmatpush1.bf16.msra.mxu1 %v11830_v38  ;;  %v11926_v38 = vld [vmem:[%s13740_s22 + $0x514] ss:$8 sps:$4 sm:$0xff]  }
 0x17e   : > { %9062 = vmatpush1.bf16.msra.mxu0 %v11833_v39  ;;  %8243 = vmatprep.subr.bf16.mxu1 %v11838_v40  ;;  %v11929_v39 = vld [vmem:[%s13740_s22 + $0x1914] ss:$8 sps:$4 sm:$0xff]   ;;  %v9865_v40 = vcombine.high %v14112_v24, %v14112_v24 }
 0x17f   : > { %9063 = vmatprep.subr.bf16.mxu0 %v11841_v41  ;;  %v11927_v41 = vld [vmem:[%s13740_s22 + $0x1910] ss:$8 sps:$4 sm:$0xff]  }
 0x181   : > { %8244 = vmatpush1.bf16.msra.mxu1 %v11836_v42  ;;  %v11932_v42 = vld [vmem:[%s13740_s22 + $0x524] ss:$8 sps:$4 sm:$0xff]  }
 0x182   : > { %9064 = vmatpush1.bf16.msra.mxu0 %v11839_v43  ;;  %8245 = vmatprep.subr.bf16.mxu1 %v11844_v44  ;;  %v11935_v43 = vld [vmem:[%s13740_s22 + $0x1924] ss:$8 sps:$4 sm:$0xff]   ;;  %v11930_v44 = vld [vmem:[%s13740_s22 + $0x520] ss:$8 sps:$4 sm:$0xff]  }
 0x183   : > { %9065 = vmatprep.subr.bf16.mxu0 %v11847_v45  ;;  %v11933_v45 = vld [vmem:[%s13740_s22 + $0x1920] ss:$8 sps:$4 sm:$0xff]  }
 0x185   : > { %8246 = vmatpush1.bf16.msra.mxu1 %v11842_v46  ;;  %v11938_v46 = vld [vmem:[%s13740_s22 + $0x534] ss:$8 sps:$4 sm:$0xff]  }
 0x186   : > { %9066 = vmatpush1.bf16.msra.mxu0 %v11845_v47  ;;  %8247 = vmatprep.subr.bf16.mxu1 %v11850_v48  ;;  %v11941_v47 = vld [vmem:[%s13740_s22 + $0x1934] ss:$8 sps:$4 sm:$0xff]   ;;  %v11936_v48 = vld [vmem:[%s13740_s22 + $0x530] ss:$8 sps:$4 sm:$0xff]  }
 0x187   : > { %9067 = vmatprep.subr.bf16.mxu0 %v11853_v49  ;;  %v11939_v49 = vld [vmem:[%s13740_s22 + $0x1930] ss:$8 sps:$4 sm:$0xff]  }
 0x189   : > { %8248 = vmatpush1.bf16.msra.mxu1 %v11848_v50  ;;  %v11944_v50 = vld [vmem:[%s13740_s22 + $0x544] ss:$8 sps:$4 sm:$0xff]  }
 0x18a   : > { %9068 = vmatpush1.bf16.msra.mxu0 %v11851_v51  ;;  %8249 = vmatprep.subr.bf16.mxu1 %v11856_v52  ;;  %v11947_v51 = vld [vmem:[%s13740_s22 + $0x1944] ss:$8 sps:$4 sm:$0xff]   ;;  %v11942_v52 = vld [vmem:[%s13740_s22 + $0x540] ss:$8 sps:$4 sm:$0xff]  }
 0x18b   : > { %9069 = vmatprep.subr.bf16.mxu0 %v11859_v53  ;;  %v11945_v53 = vld [vmem:[%s13740_s22 + $0x1940] ss:$8 sps:$4 sm:$0xff]  }
 0x18d   : > { %8250 = vmatpush1.bf16.msra.mxu1 %v11854_v54  ;;  %v11950_v54 = vld [vmem:[%s13740_s22 + $0x554] ss:$8 sps:$4 sm:$0xff]  }
 0x18e   : > { %9070 = vmatpush1.bf16.msra.mxu0 %v11857_v55  ;;  %8251 = vmatprep.subr.bf16.mxu1 %v11862_v56  ;;  %v11953_v55 = vld [vmem:[%s13740_s22 + $0x1954] ss:$8 sps:$4 sm:$0xff]   ;;  %v11948_v56 = vld [vmem:[%s13740_s22 + $0x550] ss:$8 sps:$4 sm:$0xff]  }
 0x18f   : > { %9071 = vmatprep.subr.bf16.mxu0 %v11865_v57  ;;  %v11951_v57 = vld [vmem:[%s13740_s22 + $0x1950] ss:$8 sps:$4 sm:$0xff]  }
 0x191   : > { %8252 = vmatpush1.bf16.msra.mxu1 %v11860_v58  ;;  %v11956_v58 = vld [vmem:[%s13740_s22 + $0x564] ss:$8 sps:$4 sm:$0xff]  }
 0x192   : > { %9072 = vmatpush1.bf16.msra.mxu0 %v11863_v59  ;;  %8253 = vmatprep.subr.bf16.mxu1 %v11868_v60  ;;  %v11959_v59 = vld [vmem:[%s13740_s22 + $0x1964] ss:$8 sps:$4 sm:$0xff]   ;;  %v11954_v60 = vld [vmem:[%s13740_s22 + $0x560] ss:$8 sps:$4 sm:$0xff]  }
 0x193   : > { %9073 = vmatprep.subr.bf16.mxu0 %v11871_v61  ;;  %v11957_v61 = vld [vmem:[%s13740_s22 + $0x1960] ss:$8 sps:$4 sm:$0xff]  }
 0x195   : > { %8254 = vmatpush1.bf16.msra.mxu1 %v11866_v62  ;;  %v11962_v62 = vld [vmem:[%s13740_s22 + $0x574] ss:$8 sps:$4 sm:$0xff]  }
 0x196   : > { %9074 = vmatpush1.bf16.msra.mxu0 %v11869_v63  ;;  %8255 = vmatprep.subr.bf16.mxu1 %v11874_v0  ;;  %v11965_v63 = vld [vmem:[%s13740_s22 + $0x1974] ss:$8 sps:$4 sm:$0xff]   ;;  %v11960_v0 = vld [vmem:[%s13740_s22 + $0x570] ss:$8 sps:$4 sm:$0xff]  }
 0x197   : > { %9075 = vmatprep.subr.bf16.mxu0 %v11877_v1  ;;  %v11963_v1 = vld [vmem:[%s13740_s22 + $0x1970] ss:$8 sps:$4 sm:$0xff]  }
 0x199   : > { %8256 = vmatpush1.bf16.msra.mxu1 %v11872_v2  ;;  %v11968_v2 = vld [vmem:[%s13740_s22 + $0x584] ss:$8 sps:$4 sm:$0xff]  }
 0x19a   : > { %9076 = vmatpush1.bf16.msra.mxu0 %v11875_v3  ;;  %8257 = vmatprep.subr.bf16.mxu1 %v11880_v4  ;;  %v11971_v3 = vld [vmem:[%s13740_s22 + $0x1984] ss:$8 sps:$4 sm:$0xff]   ;;  %v11966_v4 = vld [vmem:[%s13740_s22 + $0x580] ss:$8 sps:$4 sm:$0xff]  }
 0x19b   : > { %9077 = vmatprep.subr.bf16.mxu0 %v11883_v5  ;;  %v11969_v5 = vld [vmem:[%s13740_s22 + $0x1980] ss:$8 sps:$4 sm:$0xff]  }
 0x19d   : > { %8258 = vmatpush1.bf16.msra.mxu1 %v11878_v6  ;;  %v11974_v6 = vld [vmem:[%s13740_s22 + $0x594] ss:$8 sps:$4 sm:$0xff]  }
 0x19e   : > { %9078 = vmatpush1.bf16.msra.mxu0 %v11881_v7  ;;  %8259 = vmatprep.subr.bf16.mxu1 %v11886_v8  ;;  %v11977_v7 = vld [vmem:[%s13740_s22 + $0x1994] ss:$8 sps:$4 sm:$0xff]   ;;  %v11972_v8 = vld [vmem:[%s13740_s22 + $0x590] ss:$8 sps:$4 sm:$0xff]  }
 0x19f   : > { %9079 = vmatprep.subr.bf16.mxu0 %v11889_v9  ;;  %v11975_v9 = vld [vmem:[%s13740_s22 + $0x1990] ss:$8 sps:$4 sm:$0xff]  }
 0x1a1   : > { %8260 = vmatpush1.bf16.msra.mxu1 %v11884_v10  ;;  %v11980_v10 = vld [vmem:[%s13740_s22 + $0x5a4] ss:$8 sps:$4 sm:$0xff]  }
 0x1a2   : > { %9080 = vmatpush1.bf16.msra.mxu0 %v11887_v11  ;;  %8261 = vmatprep.subr.bf16.mxu1 %v11892_v12  ;;  %v11983_v11 = vld [vmem:[%s13740_s22 + $0x19a4] ss:$8 sps:$4 sm:$0xff]   ;;  %v11978_v12 = vld [vmem:[%s13740_s22 + $0x5a0] ss:$8 sps:$4 sm:$0xff]  }
 0x1a3   : > { %9081 = vmatprep.subr.bf16.mxu0 %v11895_v13  ;;  %v11981_v13 = vld [vmem:[%s13740_s22 + $0x19a0] ss:$8 sps:$4 sm:$0xff]  }
 0x1a5   : > { %8262 = vmatpush1.bf16.msra.mxu1 %v11890_v14  ;;  %v11986_v14 = vld [vmem:[%s13740_s22 + $0x5b4] ss:$8 sps:$4 sm:$0xff]  }
 0x1a6   : > { %9082 = vmatpush1.bf16.msra.mxu0 %v11893_v15  ;;  %8263 = vmatprep.subr.bf16.mxu1 %v11898_v16  ;;  %v11989_v15 = vld [vmem:[%s13740_s22 + $0x19b4] ss:$8 sps:$4 sm:$0xff]   ;;  %v11984_v16 = vld [vmem:[%s13740_s22 + $0x5b0] ss:$8 sps:$4 sm:$0xff]  }
 0x1a7   : > { %9083 = vmatprep.subr.bf16.mxu0 %v11901_v17  ;;  %v11987_v17 = vld [vmem:[%s13740_s22 + $0x19b0] ss:$8 sps:$4 sm:$0xff]  }
 0x1a9   : > { %8264 = vmatpush1.bf16.msra.mxu1 %v11896_v19  ;;  %v11992_v19 = vld [vmem:[%s13740_s22 + $0x5c4] ss:$8 sps:$4 sm:$0xff]  }
 0x1aa   : > { %9084 = vmatpush1.bf16.msra.mxu0 %v11899_v21  ;;  %8265 = vmatprep.subr.bf16.mxu1 %v11904_v22  ;;  %v11995_v21 = vld [vmem:[%s13740_s22 + $0x19c4] ss:$8 sps:$4 sm:$0xff]   ;;  %v11990_v22 = vld [vmem:[%s13740_s22 + $0x5c0] ss:$8 sps:$4 sm:$0xff]  }
 0x1ab   : > { %9085 = vmatprep.subr.bf16.mxu0 %v11907_v23  ;;  %v11993_v23 = vld [vmem:[%s13740_s22 + $0x19c0] ss:$8 sps:$4 sm:$0xff]  }
 0x1ad   : > { %8266 = vmatpush1.bf16.msra.mxu1 %v11902_v26  ;;  %v11998_v26 = vld [vmem:[%s13740_s22 + $0x5d4] ss:$8 sps:$4 sm:$0xff]  }
 0x1ae   : > { %9086 = vmatpush1.bf16.msra.mxu0 %v11905_v27  ;;  %8267 = vmatprep.subr.bf16.mxu1 %v11910_v20  ;;  %v12001_v27 = vld [vmem:[%s13740_s22 + $0x19d4] ss:$8 sps:$4 sm:$0xff]   ;;  %v11996_v20 = vld [vmem:[%s13740_s22 + $0x5d0] ss:$8 sps:$4 sm:$0xff]  }
 0x1af   : > { %9087 = vmatprep.subr.bf16.mxu0 %v11913_v28  ;;  %v11999_v28 = vld [vmem:[%s13740_s22 + $0x19d0] ss:$8 sps:$4 sm:$0xff]  }
 0x1b1   : > { %8268 = vmatpush1.bf16.msra.mxu1 %v11908_v30  ;;  %v12004_v30 = vld [vmem:[%s13740_s22 + $0x5e4] ss:$8 sps:$4 sm:$0xff]  }
 0x1b2   : > { %9088 = vmatpush1.bf16.msra.mxu0 %v11911_v31  ;;  %8278 = vmatprep.subr.bf16.mxu1 %v11918_v32  ;;  %v12007_v31 = vld [vmem:[%s13740_s22 + $0x19e4] ss:$8 sps:$4 sm:$0xff]   ;;  %v12002_v32 = vld [vmem:[%s13740_s22 + $0x5e0] ss:$8 sps:$4 sm:$0xff]  }
 0x1b3   : > { %9098 = vmatprep.subr.bf16.mxu0 %v11923_v33  ;;  %v12005_v33 = vld [vmem:[%s13740_s22 + $0x19e0] ss:$8 sps:$4 sm:$0xff]  }
 0x1b4   : > { %8270 = vmatmul.mubr.bf16.vlgmr.msra.gmra.mrb[0].mxu1 %v9862_v34  ;;  %v12010_v34 = vld [vmem:[%s13740_s22 + $0x5f4] ss:$8 sps:$4 sm:$0xff]  }
 0x1b5   : > { %9090 = vmatmul.mubr.bf16.vlgmr.msra.gmra.mrb[0].mxu0 %v9902_v35  ;;  %8279 = vmatpush1.bf16.msra.mxu1 %v11916_v36  ;;  %v12013_v35 = vld [vmem:[%s13740_s22 + $0x19f4] ss:$8 sps:$4 sm:$0xff]   ;;  %v12008_v36 = vld [vmem:[%s13740_s22 + $0x5f0] ss:$8 sps:$4 sm:$0xff]  }
 0x1b6   : > { %9099 = vmatpush1.bf16.msra.mxu0 %v11921_v37  ;;  %8280 = vmatprep.subr.bf16.mxu1 %v11926_v38  ;;  %v12011_v37 = vld [vmem:[%s13740_s22 + $0x19f0] ss:$8 sps:$4 sm:$0xff]   ;;  %v12018_v38 = vld [vmem:[%s13740_s22 + $0x604] ss:$8 sps:$4 sm:$0xff]  }
 0x1b7   : > { %9100 = vmatprep.subr.bf16.mxu0 %v11929_v39  ;;  %8310 = vmatprep.mubr.bf16.mxu1 %v9865_v40  ;;  %v12023_v39 = vld [vmem:[%s13740_s22 + $0x1a04] ss:$8 sps:$4 sm:$0xff]  }
 0x1b8   : > { %9130 = vmatprep.mubr.bf16.mxu0 %v9905_v18  ;;  %v14188_v40 = vld [vmem:[#allocation2 + $0x30] sm:$0xff] }
 0x1b9   : > { %8281 = vmatpush1.bf16.msra.mxu1 %v11924_v29  ;;  %v14190_v18 = vld [vmem:[#allocation2 + $0xd0] sm:$0xff]  ;;  %v9864_v29 = vcombine.low %v14112_v24, %v14112_v24 }
 0x1ba   : > { %9101 = vmatpush1.bf16.msra.mxu0 %v11927_v41  ;;  %8282 = vmatprep.subr.bf16.mxu1 %v11932_v42  ;;  %v9904_v41 = vcombine.low %v14114_v25, %v14114_v25  ;;  %v12016_v42 = vld [vmem:[%s13740_s22 + $0x600] ss:$8 sps:$4 sm:$0xff]   ;;  %v9907_v24 = vcombine.high %v14190_v18, %v14190_v18  ;;  %v12024_v25 = vld [vmem:[%s13740_s22 + $0x610] ss:$8 sps:$4 sm:$0xff]  }
 0x1bb   : > { %9102 = vmatprep.subr.bf16.mxu0 %v11935_v43  ;;  %v12021_v43 = vld [vmem:[%s13740_s22 + $0x1a00] ss:$8 sps:$4 sm:$0xff]  }
 0x1bd   : > { %8283 = vmatpush1.bf16.msra.mxu1 %v11930_v44  ;;  %v12026_v44 = vld [vmem:[%s13740_s22 + $0x614] ss:$8 sps:$4 sm:$0xff]  }
 0x1be   : > { %9103 = vmatpush1.bf16.msra.mxu0 %v11933_v45  ;;  %8284 = vmatprep.subr.bf16.mxu1 %v11938_v46  ;;  %v12029_v45 = vld [vmem:[%s13740_s22 + $0x1a14] ss:$8 sps:$4 sm:$0xff]   ;;  %v9867_v46 = vcombine.high %v14188_v40, %v14188_v40 }
 0x1bf   : > { %9104 = vmatprep.subr.bf16.mxu0 %v11941_v47  ;;  %v12027_v47 = vld [vmem:[%s13740_s22 + $0x1a10] ss:$8 sps:$4 sm:$0xff]  }
 0x1c1   : > { %8285 = vmatpush1.bf16.msra.mxu1 %v11936_v48  ;;  %v12032_v48 = vld [vmem:[%s13740_s22 + $0x624] ss:$8 sps:$4 sm:$0xff]  }
 0x1c2   : > { %9105 = vmatpush1.bf16.msra.mxu0 %v11939_v49  ;;  %8286 = vmatprep.subr.bf16.mxu1 %v11944_v50  ;;  %v12035_v49 = vld [vmem:[%s13740_s22 + $0x1a24] ss:$8 sps:$4 sm:$0xff]   ;;  %v12030_v50 = vld [vmem:[%s13740_s22 + $0x620] ss:$8 sps:$4 sm:$0xff]  }
 0x1c3   : > { %9106 = vmatprep.subr.bf16.mxu0 %v11947_v51  ;;  %v12033_v51 = vld [vmem:[%s13740_s22 + $0x1a20] ss:$8 sps:$4 sm:$0xff]  }
 0x1c5   : > { %8287 = vmatpush1.bf16.msra.mxu1 %v11942_v52  ;;  %v12038_v52 = vld [vmem:[%s13740_s22 + $0x634] ss:$8 sps:$4 sm:$0xff]  }
 0x1c6   : > { %9107 = vmatpush1.bf16.msra.mxu0 %v11945_v53  ;;  %8288 = vmatprep.subr.bf16.mxu1 %v11950_v54  ;;  %v12041_v53 = vld [vmem:[%s13740_s22 + $0x1a34] ss:$8 sps:$4 sm:$0xff]   ;;  %v12036_v54 = vld [vmem:[%s13740_s22 + $0x630] ss:$8 sps:$4 sm:$0xff]  }
 0x1c7   : > { %9108 = vmatprep.subr.bf16.mxu0 %v11953_v55  ;;  %v12039_v55 = vld [vmem:[%s13740_s22 + $0x1a30] ss:$8 sps:$4 sm:$0xff]  }
 0x1c9   : > { %8289 = vmatpush1.bf16.msra.mxu1 %v11948_v56  ;;  %v12044_v56 = vld [vmem:[%s13740_s22 + $0x644] ss:$8 sps:$4 sm:$0xff]  }
 0x1ca   : > { %9109 = vmatpush1.bf16.msra.mxu0 %v11951_v57  ;;  %8290 = vmatprep.subr.bf16.mxu1 %v11956_v58  ;;  %v12047_v57 = vld [vmem:[%s13740_s22 + $0x1a44] ss:$8 sps:$4 sm:$0xff]   ;;  %v12042_v58 = vld [vmem:[%s13740_s22 + $0x640] ss:$8 sps:$4 sm:$0xff]  }
 0x1cb   : > { %9110 = vmatprep.subr.bf16.mxu0 %v11959_v59  ;;  %v12045_v59 = vld [vmem:[%s13740_s22 + $0x1a40] ss:$8 sps:$4 sm:$0xff]  }
 0x1cd   : > { %8291 = vmatpush1.bf16.msra.mxu1 %v11954_v60  ;;  %v12050_v60 = vld [vmem:[%s13740_s22 + $0x654] ss:$8 sps:$4 sm:$0xff]  }
 0x1ce   : > { %9111 = vmatpush1.bf16.msra.mxu0 %v11957_v61  ;;  %8292 = vmatprep.subr.bf16.mxu1 %v11962_v62  ;;  %v12053_v61 = vld [vmem:[%s13740_s22 + $0x1a54] ss:$8 sps:$4 sm:$0xff]   ;;  %v12048_v62 = vld [vmem:[%s13740_s22 + $0x650] ss:$8 sps:$4 sm:$0xff]  }
 0x1cf   : > { %9112 = vmatprep.subr.bf16.mxu0 %v11965_v63  ;;  %v12051_v63 = vld [vmem:[%s13740_s22 + $0x1a50] ss:$8 sps:$4 sm:$0xff]  }
 0x1d1   : > { %8293 = vmatpush1.bf16.msra.mxu1 %v11960_v0  ;;  %v12056_v0 = vld [vmem:[%s13740_s22 + $0x664] ss:$8 sps:$4 sm:$0xff]  }
 0x1d2   : > { %9113 = vmatpush1.bf16.msra.mxu0 %v11963_v1  ;;  %8294 = vmatprep.subr.bf16.mxu1 %v11968_v2  ;;  %v12059_v1 = vld [vmem:[%s13740_s22 + $0x1a64] ss:$8 sps:$4 sm:$0xff]   ;;  %v12054_v2 = vld [vmem:[%s13740_s22 + $0x660] ss:$8 sps:$4 sm:$0xff]  }
 0x1d3   : > { %9114 = vmatprep.subr.bf16.mxu0 %v11971_v3  ;;  %v12057_v3 = vld [vmem:[%s13740_s22 + $0x1a60] ss:$8 sps:$4 sm:$0xff]  }
 0x1d5   : > { %8295 = vmatpush1.bf16.msra.mxu1 %v11966_v4  ;;  %v12062_v4 = vld [vmem:[%s13740_s22 + $0x674] ss:$8 sps:$4 sm:$0xff]  }
 0x1d6   : > { %9115 = vmatpush1.bf16.msra.mxu0 %v11969_v5  ;;  %8296 = vmatprep.subr.bf16.mxu1 %v11974_v6  ;;  %v12065_v5 = vld [vmem:[%s13740_s22 + $0x1a74] ss:$8 sps:$4 sm:$0xff]   ;;  %v12060_v6 = vld [vmem:[%s13740_s22 + $0x670] ss:$8 sps:$4 sm:$0xff]  }
 0x1d7   : > { %9116 = vmatprep.subr.bf16.mxu0 %v11977_v7  ;;  %v12063_v7 = vld [vmem:[%s13740_s22 + $0x1a70] ss:$8 sps:$4 sm:$0xff]  }
 0x1d9   : > { %8297 = vmatpush1.bf16.msra.mxu1 %v11972_v8  ;;  %v12068_v8 = vld [vmem:[%s13740_s22 + $0x684] ss:$8 sps:$4 sm:$0xff]  }
 0x1da   : > { %9117 = vmatpush1.bf16.msra.mxu0 %v11975_v9  ;;  %8298 = vmatprep.subr.bf16.mxu1 %v11980_v10  ;;  %v12071_v9 = vld [vmem:[%s13740_s22 + $0x1a84] ss:$8 sps:$4 sm:$0xff]   ;;  %v12066_v10 = vld [vmem:[%s13740_s22 + $0x680] ss:$8 sps:$4 sm:$0xff]  }
 0x1db   : > { %9118 = vmatprep.subr.bf16.mxu0 %v11983_v11  ;;  %v12069_v11 = vld [vmem:[%s13740_s22 + $0x1a80] ss:$8 sps:$4 sm:$0xff]  }
 0x1dd   : > { %8299 = vmatpush1.bf16.msra.mxu1 %v11978_v12  ;;  %v12074_v12 = vld [vmem:[%s13740_s22 + $0x694] ss:$8 sps:$4 sm:$0xff]  }
 0x1de   : > { %9119 = vmatpush1.bf16.msra.mxu0 %v11981_v13  ;;  %8300 = vmatprep.subr.bf16.mxu1 %v11986_v14  ;;  %v12077_v13 = vld [vmem:[%s13740_s22 + $0x1a94] ss:$8 sps:$4 sm:$0xff]   ;;  %v12072_v14 = vld [vmem:[%s13740_s22 + $0x690] ss:$8 sps:$4 sm:$0xff]  }
 0x1df   : > { %9120 = vmatprep.subr.bf16.mxu0 %v11989_v15  ;;  %v12075_v15 = vld [vmem:[%s13740_s22 + $0x1a90] ss:$8 sps:$4 sm:$0xff]  }
 0x1e1   : > { %8301 = vmatpush1.bf16.msra.mxu1 %v11984_v16  ;;  %v12080_v16 = vld [vmem:[%s13740_s22 + $0x6a4] ss:$8 sps:$4 sm:$0xff]  }
 0x1e2   : > { %9121 = vmatpush1.bf16.msra.mxu0 %v11987_v17  ;;  %8302 = vmatprep.subr.bf16.mxu1 %v11992_v19  ;;  %v12083_v17 = vld [vmem:[%s13740_s22 + $0x1aa4] ss:$8 sps:$4 sm:$0xff]   ;;  %v12078_v19 = vld [vmem:[%s13740_s22 + $0x6a0] ss:$8 sps:$4 sm:$0xff]  }
 0x1e3   : > { %9122 = vmatprep.subr.bf16.mxu0 %v11995_v21  ;;  %v12081_v21 = vld [vmem:[%s13740_s22 + $0x1aa0] ss:$8 sps:$4 sm:$0xff]  }
 0x1e5   : > { %8303 = vmatpush1.bf16.msra.mxu1 %v11990_v22  ;;  %v12086_v22 = vld [vmem:[%s13740_s22 + $0x6b4] ss:$8 sps:$4 sm:$0xff]  }
 0x1e6   : > { %9123 = vmatpush1.bf16.msra.mxu0 %v11993_v23  ;;  %8304 = vmatprep.subr.bf16.mxu1 %v11998_v26  ;;  %v12089_v23 = vld [vmem:[%s13740_s22 + $0x1ab4] ss:$8 sps:$4 sm:$0xff]   ;;  %v12084_v26 = vld [vmem:[%s13740_s22 + $0x6b0] ss:$8 sps:$4 sm:$0xff]  }
 0x1e7   : > { %9124 = vmatprep.subr.bf16.mxu0 %v12001_v27  ;;  %v12087_v27 = vld [vmem:[%s13740_s22 + $0x1ab0] ss:$8 sps:$4 sm:$0xff]  }
 0x1e9   : > { %8305 = vmatpush1.bf16.msra.mxu1 %v11996_v20  ;;  %v12092_v20 = vld [vmem:[%s13740_s22 + $0x6c4] ss:$8 sps:$4 sm:$0xff]  }
 0x1ea   : > { %9125 = vmatpush1.bf16.msra.mxu0 %v11999_v28  ;;  %8306 = vmatprep.subr.bf16.mxu1 %v12004_v30  ;;  %v12095_v28 = vld [vmem:[%s13740_s22 + $0x1ac4] ss:$8 sps:$4 sm:$0xff]   ;;  %v12090_v30 = vld [vmem:[%s13740_s22 + $0x6c0] ss:$8 sps:$4 sm:$0xff]  }
 0x1eb   : > { %9126 = vmatprep.subr.bf16.mxu0 %v12007_v31  ;;  %v12093_v31 = vld [vmem:[%s13740_s22 + $0x1ac0] ss:$8 sps:$4 sm:$0xff]  }
 0x1ed   : > { %8307 = vmatpush1.bf16.msra.mxu1 %v12002_v32  ;;  %v12098_v32 = vld [vmem:[%s13740_s22 + $0x6d4] ss:$8 sps:$4 sm:$0xff]  }
 0x1ee   : > { %9127 = vmatpush1.bf16.msra.mxu0 %v12005_v33  ;;  %8308 = vmatprep.subr.bf16.mxu1 %v12010_v34  ;;  %v12101_v33 = vld [vmem:[%s13740_s22 + $0x1ad4] ss:$8 sps:$4 sm:$0xff]   ;;  %v12096_v34 = vld [vmem:[%s13740_s22 + $0x6d0] ss:$8 sps:$4 sm:$0xff]  }
 0x1ef   : > { %9128 = vmatprep.subr.bf16.mxu0 %v12013_v35  ;;  %v12099_v35 = vld [vmem:[%s13740_s22 + $0x1ad0] ss:$8 sps:$4 sm:$0xff]  }
 0x1f1   : > { %8309 = vmatpush1.bf16.msra.mxu1 %v12008_v36  ;;  %v12104_v36 = vld [vmem:[%s13740_s22 + $0x6e4] ss:$8 sps:$4 sm:$0xff]  }
 0x1f2   : > { %9129 = vmatpush1.bf16.msra.mxu0 %v12011_v37  ;;  %8319 = vmatprep.subr.bf16.mxu1 %v12018_v38  ;;  %v12107_v37 = vld [vmem:[%s13740_s22 + $0x1ae4] ss:$8 sps:$4 sm:$0xff]   ;;  %v12102_v38 = vld [vmem:[%s13740_s22 + $0x6e0] ss:$8 sps:$4 sm:$0xff]  }
 0x1f3   : > { %9139 = vmatprep.subr.bf16.mxu0 %v12023_v39  ;;  %v12105_v39 = vld [vmem:[%s13740_s22 + $0x1ae0] ss:$8 sps:$4 sm:$0xff]  }
 0x1f4   : > { %8311 = vmatmul.mubr.bf16.vlgmr.msra.gmra.mrb[0].mxu1 %v9864_v29  ;;  %v12110_v29 = vld [vmem:[%s13740_s22 + $0x6f4] ss:$8 sps:$4 sm:$0xff]  }
 0x1f5   : > { %9131 = vmatmul.mubr.bf16.vlgmr.msra.gmra.mrb[0].mxu0 %v9904_v41  ;;  %8320 = vmatpush1.bf16.msra.mxu1 %v12016_v42  ;;  %v12113_v41 = vld [vmem:[%s13740_s22 + $0x1af4] ss:$8 sps:$4 sm:$0xff]   ;;  %v12108_v42 = vld [vmem:[%s13740_s22 + $0x6f0] ss:$8 sps:$4 sm:$0xff]  }
 0x1f6   : > { %9140 = vmatpush1.bf16.msra.mxu0 %v12021_v43  ;;  %8321 = vmatprep.subr.bf16.mxu1 %v12026_v44  ;;  %v12111_v43 = vld [vmem:[%s13740_s22 + $0x1af0] ss:$8 sps:$4 sm:$0xff]   ;;  %v12118_v44 = vld [vmem:[%s13740_s22 + $0x704] ss:$8 sps:$4 sm:$0xff]  }
 0x1f7   : > { %9141 = vmatprep.subr.bf16.mxu0 %v12029_v45  ;;  %8351 = vmatprep.mubr.bf16.mxu1 %v9867_v46  ;;  %v12123_v45 = vld [vmem:[%s13740_s22 + $0x1b04] ss:$8 sps:$4 sm:$0xff]  }
 0x1f8   : > { %9171 = vmatprep.mubr.bf16.mxu0 %v9907_v24  ;;  %v14264_v46 = vld [vmem:[#allocation2 + $0x38] sm:$0xff] }
 0x1f9   : > { %8322 = vmatpush1.bf16.msra.mxu1 %v12024_v25  ;;  %v14266_v24 = vld [vmem:[#allocation2 + $0xd8] sm:$0xff]  ;;  %v9866_v25 = vcombine.low %v14188_v40, %v14188_v40 }
 0x1fa   : > { %9142 = vmatpush1.bf16.msra.mxu0 %v12027_v47  ;;  %8323 = vmatprep.subr.bf16.mxu1 %v12032_v48  ;;  %v9906_v47 = vcombine.low %v14190_v18, %v14190_v18  ;;  %v12116_v48 = vld [vmem:[%s13740_s22 + $0x700] ss:$8 sps:$4 sm:$0xff]   ;;  %v9909_v40 = vcombine.high %v14266_v24, %v14266_v24  ;;  %v12124_v18 = vld [vmem:[%s13740_s22 + $0x710] ss:$8 sps:$4 sm:$0xff]  }
 0x1fb   : > { %9143 = vmatprep.subr.bf16.mxu0 %v12035_v49  ;;  %v12121_v49 = vld [vmem:[%s13740_s22 + $0x1b00] ss:$8 sps:$4 sm:$0xff]  }
 0x1fd   : > { %8324 = vmatpush1.bf16.msra.mxu1 %v12030_v50  ;;  %v12126_v50 = vld [vmem:[%s13740_s22 + $0x714] ss:$8 sps:$4 sm:$0xff]  }
 0x1fe   : > { %9144 = vmatpush1.bf16.msra.mxu0 %v12033_v51  ;;  %8325 = vmatprep.subr.bf16.mxu1 %v12038_v52  ;;  %v12129_v51 = vld [vmem:[%s13740_s22 + $0x1b14] ss:$8 sps:$4 sm:$0xff]   ;;  %v9869_v52 = vcombine.high %v14264_v46, %v14264_v46 }
 0x1ff   : > { %9145 = vmatprep.subr.bf16.mxu0 %v12041_v53  ;;  %v12127_v53 = vld [vmem:[%s13740_s22 + $0x1b10] ss:$8 sps:$4 sm:$0xff]  }
 0x201   : > { %8326 = vmatpush1.bf16.msra.mxu1 %v12036_v54  ;;  %v12132_v54 = vld [vmem:[%s13740_s22 + $0x724] ss:$8 sps:$4 sm:$0xff]  }
 0x202   : > { %9146 = vmatpush1.bf16.msra.mxu0 %v12039_v55  ;;  %8327 = vmatprep.subr.bf16.mxu1 %v12044_v56  ;;  %v12135_v55 = vld [vmem:[%s13740_s22 + $0x1b24] ss:$8 sps:$4 sm:$0xff]   ;;  %v12130_v56 = vld [vmem:[%s13740_s22 + $0x720] ss:$8 sps:$4 sm:$0xff]  }
 0x203   : > { %9147 = vmatprep.subr.bf16.mxu0 %v12047_v57  ;;  %v12133_v57 = vld [vmem:[%s13740_s22 + $0x1b20] ss:$8 sps:$4 sm:$0xff]  }
 0x205   : > { %8328 = vmatpush1.bf16.msra.mxu1 %v12042_v58  ;;  %v12138_v58 = vld [vmem:[%s13740_s22 + $0x734] ss:$8 sps:$4 sm:$0xff]  }
 0x206   : > { %9148 = vmatpush1.bf16.msra.mxu0 %v12045_v59  ;;  %8329 = vmatprep.subr.bf16.mxu1 %v12050_v60  ;;  %v12141_v59 = vld [vmem:[%s13740_s22 + $0x1b34] ss:$8 sps:$4 sm:$0xff]   ;;  %v12136_v60 = vld [vmem:[%s13740_s22 + $0x730] ss:$8 sps:$4 sm:$0xff]  }
 0x207   : > { %9149 = vmatprep.subr.bf16.mxu0 %v12053_v61  ;;  %v12139_v61 = vld [vmem:[%s13740_s22 + $0x1b30] ss:$8 sps:$4 sm:$0xff]  }
 0x209   : > { %8330 = vmatpush1.bf16.msra.mxu1 %v12048_v62  ;;  %v12144_v62 = vld [vmem:[%s13740_s22 + $0x744] ss:$8 sps:$4 sm:$0xff]  }
 0x20a   : > { %9150 = vmatpush1.bf16.msra.mxu0 %v12051_v63  ;;  %8331 = vmatprep.subr.bf16.mxu1 %v12056_v0  ;;  %v12147_v63 = vld [vmem:[%s13740_s22 + $0x1b44] ss:$8 sps:$4 sm:$0xff]   ;;  %v12142_v0 = vld [vmem:[%s13740_s22 + $0x740] ss:$8 sps:$4 sm:$0xff]  }
 0x20b   : > { %9151 = vmatprep.subr.bf16.mxu0 %v12059_v1  ;;  %v12145_v1 = vld [vmem:[%s13740_s22 + $0x1b40] ss:$8 sps:$4 sm:$0xff]  }
 0x20d   : > { %8332 = vmatpush1.bf16.msra.mxu1 %v12054_v2  ;;  %v12150_v2 = vld [vmem:[%s13740_s22 + $0x754] ss:$8 sps:$4 sm:$0xff]  }
 0x20e   : > { %9152 = vmatpush1.bf16.msra.mxu0 %v12057_v3  ;;  %8333 = vmatprep.subr.bf16.mxu1 %v12062_v4  ;;  %v12153_v3 = vld [vmem:[%s13740_s22 + $0x1b54] ss:$8 sps:$4 sm:$0xff]   ;;  %v12148_v4 = vld [vmem:[%s13740_s22 + $0x750] ss:$8 sps:$4 sm:$0xff]  }
 0x20f   : > { %9153 = vmatprep.subr.bf16.mxu0 %v12065_v5  ;;  %v12151_v5 = vld [vmem:[%s13740_s22 + $0x1b50] ss:$8 sps:$4 sm:$0xff]  }
 0x211   : > { %8334 = vmatpush1.bf16.msra.mxu1 %v12060_v6  ;;  %v12156_v6 = vld [vmem:[%s13740_s22 + $0x764] ss:$8 sps:$4 sm:$0xff]  }
 0x212   : > { %9154 = vmatpush1.bf16.msra.mxu0 %v12063_v7  ;;  %8335 = vmatprep.subr.bf16.mxu1 %v12068_v8  ;;  %v12159_v7 = vld [vmem:[%s13740_s22 + $0x1b64] ss:$8 sps:$4 sm:$0xff]   ;;  %v12154_v8 = vld [vmem:[%s13740_s22 + $0x760] ss:$8 sps:$4 sm:$0xff]  }
 0x213   : > { %9155 = vmatprep.subr.bf16.mxu0 %v12071_v9  ;;  %v12157_v9 = vld [vmem:[%s13740_s22 + $0x1b60] ss:$8 sps:$4 sm:$0xff]  }
 0x215   : > { %8336 = vmatpush1.bf16.msra.mxu1 %v12066_v10  ;;  %v12162_v10 = vld [vmem:[%s13740_s22 + $0x774] ss:$8 sps:$4 sm:$0xff]  }
 0x216   : > { %9156 = vmatpush1.bf16.msra.mxu0 %v12069_v11  ;;  %8337 = vmatprep.subr.bf16.mxu1 %v12074_v12  ;;  %v12165_v11 = vld [vmem:[%s13740_s22 + $0x1b74] ss:$8 sps:$4 sm:$0xff]   ;;  %v12160_v12 = vld [vmem:[%s13740_s22 + $0x770] ss:$8 sps:$4 sm:$0xff]  }
 0x217   : > { %9157 = vmatprep.subr.bf16.mxu0 %v12077_v13  ;;  %v12163_v13 = vld [vmem:[%s13740_s22 + $0x1b70] ss:$8 sps:$4 sm:$0xff]  }
 0x219   : > { %8338 = vmatpush1.bf16.msra.mxu1 %v12072_v14  ;;  %v12168_v14 = vld [vmem:[%s13740_s22 + $0x784] ss:$8 sps:$4 sm:$0xff]  }
 0x21a   : > { %9158 = vmatpush1.bf16.msra.mxu0 %v12075_v15  ;;  %8339 = vmatprep.subr.bf16.mxu1 %v12080_v16  ;;  %v12171_v15 = vld [vmem:[%s13740_s22 + $0x1b84] ss:$8 sps:$4 sm:$0xff]   ;;  %v12166_v16 = vld [vmem:[%s13740_s22 + $0x780] ss:$8 sps:$4 sm:$0xff]  }
 0x21b   : > { %9159 = vmatprep.subr.bf16.mxu0 %v12083_v17  ;;  %v12169_v17 = vld [vmem:[%s13740_s22 + $0x1b80] ss:$8 sps:$4 sm:$0xff]  }
 0x21d   : > { %8340 = vmatpush1.bf16.msra.mxu1 %v12078_v19  ;;  %v12174_v19 = vld [vmem:[%s13740_s22 + $0x794] ss:$8 sps:$4 sm:$0xff]  }
 0x21e   : > { %9160 = vmatpush1.bf16.msra.mxu0 %v12081_v21  ;;  %8341 = vmatprep.subr.bf16.mxu1 %v12086_v22  ;;  %v12177_v21 = vld [vmem:[%s13740_s22 + $0x1b94] ss:$8 sps:$4 sm:$0xff]   ;;  %v12172_v22 = vld [vmem:[%s13740_s22 + $0x790] ss:$8 sps:$4 sm:$0xff]  }
 0x21f   : > { %9161 = vmatprep.subr.bf16.mxu0 %v12089_v23  ;;  %v12175_v23 = vld [vmem:[%s13740_s22 + $0x1b90] ss:$8 sps:$4 sm:$0xff]  }
 0x221   : > { %8342 = vmatpush1.bf16.msra.mxu1 %v12084_v26  ;;  %v12180_v26 = vld [vmem:[%s13740_s22 + $0x7a4] ss:$8 sps:$4 sm:$0xff]  }
 0x222   : > { %9162 = vmatpush1.bf16.msra.mxu0 %v12087_v27  ;;  %8343 = vmatprep.subr.bf16.mxu1 %v12092_v20  ;;  %v12183_v27 = vld [vmem:[%s13740_s22 + $0x1ba4] ss:$8 sps:$4 sm:$0xff]   ;;  %v12178_v20 = vld [vmem:[%s13740_s22 + $0x7a0] ss:$8 sps:$4 sm:$0xff]  }
 0x223   : > { %9163 = vmatprep.subr.bf16.mxu0 %v12095_v28  ;;  %v12181_v28 = vld [vmem:[%s13740_s22 + $0x1ba0] ss:$8 sps:$4 sm:$0xff]  }
 0x225   : > { %8344 = vmatpush1.bf16.msra.mxu1 %v12090_v30  ;;  %v12186_v30 = vld [vmem:[%s13740_s22 + $0x7b4] ss:$8 sps:$4 sm:$0xff]  }
 0x226   : > { %9164 = vmatpush1.bf16.msra.mxu0 %v12093_v31  ;;  %8345 = vmatprep.subr.bf16.mxu1 %v12098_v32  ;;  %v12189_v31 = vld [vmem:[%s13740_s22 + $0x1bb4] ss:$8 sps:$4 sm:$0xff]   ;;  %v12184_v32 = vld [vmem:[%s13740_s22 + $0x7b0] ss:$8 sps:$4 sm:$0xff]  }
 0x227   : > { %9165 = vmatprep.subr.bf16.mxu0 %v12101_v33  ;;  %v12187_v33 = vld [vmem:[%s13740_s22 + $0x1bb0] ss:$8 sps:$4 sm:$0xff]  }
 0x229   : > { %8346 = vmatpush1.bf16.msra.mxu1 %v12096_v34  ;;  %v12192_v34 = vld [vmem:[%s13740_s22 + $0x7c4] ss:$8 sps:$4 sm:$0xff]  }
 0x22a   : > { %9166 = vmatpush1.bf16.msra.mxu0 %v12099_v35  ;;  %8347 = vmatprep.subr.bf16.mxu1 %v12104_v36  ;;  %v12195_v35 = vld [vmem:[%s13740_s22 + $0x1bc4] ss:$8 sps:$4 sm:$0xff]   ;;  %v12190_v36 = vld [vmem:[%s13740_s22 + $0x7c0] ss:$8 sps:$4 sm:$0xff]  }
 0x22b   : > { %9167 = vmatprep.subr.bf16.mxu0 %v12107_v37  ;;  %v12193_v37 = vld [vmem:[%s13740_s22 + $0x1bc0] ss:$8 sps:$4 sm:$0xff]  }
 0x22d   : > { %8348 = vmatpush1.bf16.msra.mxu1 %v12102_v38  ;;  %v12198_v38 = vld [vmem:[%s13740_s22 + $0x7d4] ss:$8 sps:$4 sm:$0xff]  }
 0x22e   : > { %9168 = vmatpush1.bf16.msra.mxu0 %v12105_v39  ;;  %8349 = vmatprep.subr.bf16.mxu1 %v12110_v29  ;;  %v12201_v39 = vld [vmem:[%s13740_s22 + $0x1bd4] ss:$8 sps:$4 sm:$0xff]   ;;  %v12196_v29 = vld [vmem:[%s13740_s22 + $0x7d0] ss:$8 sps:$4 sm:$0xff]  }
 0x22f   : > { %9169 = vmatprep.subr.bf16.mxu0 %v12113_v41  ;;  %v12199_v41 = vld [vmem:[%s13740_s22 + $0x1bd0] ss:$8 sps:$4 sm:$0xff]  }
 0x231   : > { %8350 = vmatpush1.bf16.msra.mxu1 %v12108_v42  ;;  %v12204_v42 = vld [vmem:[%s13740_s22 + $0x7e4] ss:$8 sps:$4 sm:$0xff]  }
 0x232   : > { %9170 = vmatpush1.bf16.msra.mxu0 %v12111_v43  ;;  %8360 = vmatprep.subr.bf16.mxu1 %v12118_v44  ;;  %v12207_v43 = vld [vmem:[%s13740_s22 + $0x1be4] ss:$8 sps:$4 sm:$0xff]   ;;  %v12202_v44 = vld [vmem:[%s13740_s22 + $0x7e0] ss:$8 sps:$4 sm:$0xff]  }
 0x233   : > { %9180 = vmatprep.subr.bf16.mxu0 %v12123_v45  ;;  %v12205_v45 = vld [vmem:[%s13740_s22 + $0x1be0] ss:$8 sps:$4 sm:$0xff]  }
 0x234   : > { %8352 = vmatmul.mubr.bf16.vlgmr.msra.gmra.mrb[0].mxu1 %v9866_v25  ;;  %v12210_v25 = vld [vmem:[%s13740_s22 + $0x7f4] ss:$8 sps:$4 sm:$0xff]  }
 0x235   : > { %9172 = vmatmul.mubr.bf16.vlgmr.msra.gmra.mrb[0].mxu0 %v9906_v47  ;;  %8361 = vmatpush1.bf16.msra.mxu1 %v12116_v48  ;;  %v12213_v47 = vld [vmem:[%s13740_s22 + $0x1bf4] ss:$8 sps:$4 sm:$0xff]   ;;  %v12208_v48 = vld [vmem:[%s13740_s22 + $0x7f0] ss:$8 sps:$4 sm:$0xff]  }
 0x236   : > { %9181 = vmatpush1.bf16.msra.mxu0 %v12121_v49  ;;  %8362 = vmatprep.subr.bf16.mxu1 %v12126_v50  ;;  %v12211_v49 = vld [vmem:[%s13740_s22 + $0x1bf0] ss:$8 sps:$4 sm:$0xff]   ;;  %v12218_v50 = vld [vmem:[%s13740_s22 + $0x804] ss:$8 sps:$4 sm:$0xff]  }
 0x237   : > { %9182 = vmatprep.subr.bf16.mxu0 %v12129_v51  ;;  %8392 = vmatprep.mubr.bf16.mxu1 %v9869_v52  ;;  %v12223_v51 = vld [vmem:[%s13740_s22 + $0x1c04] ss:$8 sps:$4 sm:$0xff]  }
 0x238   : > { %9212 = vmatprep.mubr.bf16.mxu0 %v9909_v40  ;;  %v14340_v52 = vld [vmem:[#allocation2 + $0x40] sm:$0xff] }
 0x239   : > { %8363 = vmatpush1.bf16.msra.mxu1 %v12124_v18  ;;  %v14342_v40 = vld [vmem:[#allocation2 + $0xe0] sm:$0xff]  ;;  %v9868_v18 = vcombine.low %v14264_v46, %v14264_v46 }
 0x23a   : > { %9183 = vmatpush1.bf16.msra.mxu0 %v12127_v53  ;;  %8364 = vmatprep.subr.bf16.mxu1 %v12132_v54  ;;  %v9908_v53 = vcombine.low %v14266_v24, %v14266_v24  ;;  %v12216_v54 = vld [vmem:[%s13740_s22 + $0x800] ss:$8 sps:$4 sm:$0xff]   ;;  %v9911_v46 = vcombine.high %v14342_v40, %v14342_v40  ;;  %v12224_v24 = vld [vmem:[%s13740_s22 + $0x810] ss:$8 sps:$4 sm:$0xff]  }
 0x23b   : > { %9184 = vmatprep.subr.bf16.mxu0 %v12135_v55  ;;  %v12221_v55 = vld [vmem:[%s13740_s22 + $0x1c00] ss:$8 sps:$4 sm:$0xff]  }
 0x23d   : > { %8365 = vmatpush1.bf16.msra.mxu1 %v12130_v56  ;;  %v12226_v56 = vld [vmem:[%s13740_s22 + $0x814] ss:$8 sps:$4 sm:$0xff]  }
 0x23e   : > { %9185 = vmatpush1.bf16.msra.mxu0 %v12133_v57  ;;  %8366 = vmatprep.subr.bf16.mxu1 %v12138_v58  ;;  %v12229_v57 = vld [vmem:[%s13740_s22 + $0x1c14] ss:$8 sps:$4 sm:$0xff]   ;;  %v9871_v58 = vcombine.high %v14340_v52, %v14340_v52 }
 0x23f   : > { %9186 = vmatprep.subr.bf16.mxu0 %v12141_v59  ;;  %v12227_v59 = vld [vmem:[%s13740_s22 + $0x1c10] ss:$8 sps:$4 sm:$0xff]  }
 0x241   : > { %8367 = vmatpush1.bf16.msra.mxu1 %v12136_v60  ;;  %v12232_v60 = vld [vmem:[%s13740_s22 + $0x824] ss:$8 sps:$4 sm:$0xff]  }
 0x242   : > { %9187 = vmatpush1.bf16.msra.mxu0 %v12139_v61  ;;  %8368 = vmatprep.subr.bf16.mxu1 %v12144_v62  ;;  %v12235_v61 = vld [vmem:[%s13740_s22 + $0x1c24] ss:$8 sps:$4 sm:$0xff]   ;;  %v12230_v62 = vld [vmem:[%s13740_s22 + $0x820] ss:$8 sps:$4 sm:$0xff]  }
 0x243   : > { %9188 = vmatprep.subr.bf16.mxu0 %v12147_v63  ;;  %v12233_v63 = vld [vmem:[%s13740_s22 + $0x1c20] ss:$8 sps:$4 sm:$0xff]  }
 0x245   : > { %8369 = vmatpush1.bf16.msra.mxu1 %v12142_v0  ;;  %v12238_v0 = vld [vmem:[%s13740_s22 + $0x834] ss:$8 sps:$4 sm:$0xff]  }
 0x246   : > { %9189 = vmatpush1.bf16.msra.mxu0 %v12145_v1  ;;  %8370 = vmatprep.subr.bf16.mxu1 %v12150_v2  ;;  %v12241_v1 = vld [vmem:[%s13740_s22 + $0x1c34] ss:$8 sps:$4 sm:$0xff]   ;;  %v12236_v2 = vld [vmem:[%s13740_s22 + $0x830] ss:$8 sps:$4 sm:$0xff]  }
 0x247   : > { %9190 = vmatprep.subr.bf16.mxu0 %v12153_v3  ;;  %v12239_v3 = vld [vmem:[%s13740_s22 + $0x1c30] ss:$8 sps:$4 sm:$0xff]  }
 0x249   : > { %8371 = vmatpush1.bf16.msra.mxu1 %v12148_v4  ;;  %v12244_v4 = vld [vmem:[%s13740_s22 + $0x844] ss:$8 sps:$4 sm:$0xff]  }
 0x24a   : > { %9191 = vmatpush1.bf16.msra.mxu0 %v12151_v5  ;;  %8372 = vmatprep.subr.bf16.mxu1 %v12156_v6  ;;  %v12247_v5 = vld [vmem:[%s13740_s22 + $0x1c44] ss:$8 sps:$4 sm:$0xff]   ;;  %v12242_v6 = vld [vmem:[%s13740_s22 + $0x840] ss:$8 sps:$4 sm:$0xff]  }
 0x24b   : > { %9192 = vmatprep.subr.bf16.mxu0 %v12159_v7  ;;  %v12245_v7 = vld [vmem:[%s13740_s22 + $0x1c40] ss:$8 sps:$4 sm:$0xff]  }
 0x24d   : > { %8373 = vmatpush1.bf16.msra.mxu1 %v12154_v8  ;;  %v12250_v8 = vld [vmem:[%s13740_s22 + $0x854] ss:$8 sps:$4 sm:$0xff]  }
 0x24e   : > { %9193 = vmatpush1.bf16.msra.mxu0 %v12157_v9  ;;  %8374 = vmatprep.subr.bf16.mxu1 %v12162_v10  ;;  %v12253_v9 = vld [vmem:[%s13740_s22 + $0x1c54] ss:$8 sps:$4 sm:$0xff]   ;;  %v12248_v10 = vld [vmem:[%s13740_s22 + $0x850] ss:$8 sps:$4 sm:$0xff]  }
 0x24f   : > { %9194 = vmatprep.subr.bf16.mxu0 %v12165_v11  ;;  %v12251_v11 = vld [vmem:[%s13740_s22 + $0x1c50] ss:$8 sps:$4 sm:$0xff]  }
 0x251   : > { %8375 = vmatpush1.bf16.msra.mxu1 %v12160_v12  ;;  %v12256_v12 = vld [vmem:[%s13740_s22 + $0x864] ss:$8 sps:$4 sm:$0xff]  }
 0x252   : > { %9195 = vmatpush1.bf16.msra.mxu0 %v12163_v13  ;;  %8376 = vmatprep.subr.bf16.mxu1 %v12168_v14  ;;  %v12259_v13 = vld [vmem:[%s13740_s22 + $0x1c64] ss:$8 sps:$4 sm:$0xff]   ;;  %v12254_v14 = vld [vmem:[%s13740_s22 + $0x860] ss:$8 sps:$4 sm:$0xff]  }
 0x253   : > { %9196 = vmatprep.subr.bf16.mxu0 %v12171_v15  ;;  %v12257_v15 = vld [vmem:[%s13740_s22 + $0x1c60] ss:$8 sps:$4 sm:$0xff]  }
 0x255   : > { %8377 = vmatpush1.bf16.msra.mxu1 %v12166_v16  ;;  %v12262_v16 = vld [vmem:[%s13740_s22 + $0x874] ss:$8 sps:$4 sm:$0xff]  }
 0x256   : > { %9197 = vmatpush1.bf16.msra.mxu0 %v12169_v17  ;;  %8378 = vmatprep.subr.bf16.mxu1 %v12174_v19  ;;  %v12265_v17 = vld [vmem:[%s13740_s22 + $0x1c74] ss:$8 sps:$4 sm:$0xff]   ;;  %v12260_v19 = vld [vmem:[%s13740_s22 + $0x870] ss:$8 sps:$4 sm:$0xff]  }
 0x257   : > { %9198 = vmatprep.subr.bf16.mxu0 %v12177_v21  ;;  %v12263_v21 = vld [vmem:[%s13740_s22 + $0x1c70] ss:$8 sps:$4 sm:$0xff]  }
 0x259   : > { %8379 = vmatpush1.bf16.msra.mxu1 %v12172_v22  ;;  %v12268_v22 = vld [vmem:[%s13740_s22 + $0x884] ss:$8 sps:$4 sm:$0xff]  }
 0x25a   : > { %9199 = vmatpush1.bf16.msra.mxu0 %v12175_v23  ;;  %8380 = vmatprep.subr.bf16.mxu1 %v12180_v26  ;;  %v12271_v23 = vld [vmem:[%s13740_s22 + $0x1c84] ss:$8 sps:$4 sm:$0xff]   ;;  %v12266_v26 = vld [vmem:[%s13740_s22 + $0x880] ss:$8 sps:$4 sm:$0xff]  }
 0x25b   : > { %9200 = vmatprep.subr.bf16.mxu0 %v12183_v27  ;;  %v12269_v27 = vld [vmem:[%s13740_s22 + $0x1c80] ss:$8 sps:$4 sm:$0xff]  }
 0x25d   : > { %8381 = vmatpush1.bf16.msra.mxu1 %v12178_v20  ;;  %v12274_v20 = vld [vmem:[%s13740_s22 + $0x894] ss:$8 sps:$4 sm:$0xff]  }
 0x25e   : > { %9201 = vmatpush1.bf16.msra.mxu0 %v12181_v28  ;;  %8382 = vmatprep.subr.bf16.mxu1 %v12186_v30  ;;  %v12277_v28 = vld [vmem:[%s13740_s22 + $0x1c94] ss:$8 sps:$4 sm:$0xff]   ;;  %v12272_v30 = vld [vmem:[%s13740_s22 + $0x890] ss:$8 sps:$4 sm:$0xff]  }
 0x25f   : > { %9202 = vmatprep.subr.bf16.mxu0 %v12189_v31  ;;  %v12275_v31 = vld [vmem:[%s13740_s22 + $0x1c90] ss:$8 sps:$4 sm:$0xff]  }
 0x261   : > { %8383 = vmatpush1.bf16.msra.mxu1 %v12184_v32  ;;  %v12280_v32 = vld [vmem:[%s13740_s22 + $0x8a4] ss:$8 sps:$4 sm:$0xff]  }
 0x262   : > { %9203 = vmatpush1.bf16.msra.mxu0 %v12187_v33  ;;  %8384 = vmatprep.subr.bf16.mxu1 %v12192_v34  ;;  %v12283_v33 = vld [vmem:[%s13740_s22 + $0x1ca4] ss:$8 sps:$4 sm:$0xff]   ;;  %v12278_v34 = vld [vmem:[%s13740_s22 + $0x8a0] ss:$8 sps:$4 sm:$0xff]  }
 0x263   : > { %9204 = vmatprep.subr.bf16.mxu0 %v12195_v35  ;;  %v12281_v35 = vld [vmem:[%s13740_s22 + $0x1ca0] ss:$8 sps:$4 sm:$0xff]  }
 0x265   : > { %8385 = vmatpush1.bf16.msra.mxu1 %v12190_v36  ;;  %v12286_v36 = vld [vmem:[%s13740_s22 + $0x8b4] ss:$8 sps:$4 sm:$0xff]  }
 0x266   : > { %9205 = vmatpush1.bf16.msra.mxu0 %v12193_v37  ;;  %8386 = vmatprep.subr.bf16.mxu1 %v12198_v38  ;;  %v12289_v37 = vld [vmem:[%s13740_s22 + $0x1cb4] ss:$8 sps:$4 sm:$0xff]   ;;  %v12284_v38 = vld [vmem:[%s13740_s22 + $0x8b0] ss:$8 sps:$4 sm:$0xff]  }
 0x267   : > { %9206 = vmatprep.subr.bf16.mxu0 %v12201_v39  ;;  %v12287_v39 = vld [vmem:[%s13740_s22 + $0x1cb0] ss:$8 sps:$4 sm:$0xff]  }
 0x269   : > { %8387 = vmatpush1.bf16.msra.mxu1 %v12196_v29  ;;  %v12292_v29 = vld [vmem:[%s13740_s22 + $0x8c4] ss:$8 sps:$4 sm:$0xff]  }
 0x26a   : > { %9207 = vmatpush1.bf16.msra.mxu0 %v12199_v41  ;;  %8388 = vmatprep.subr.bf16.mxu1 %v12204_v42  ;;  %v12295_v41 = vld [vmem:[%s13740_s22 + $0x1cc4] ss:$8 sps:$4 sm:$0xff]   ;;  %v12290_v42 = vld [vmem:[%s13740_s22 + $0x8c0] ss:$8 sps:$4 sm:$0xff]  }
 0x26b   : > { %9208 = vmatprep.subr.bf16.mxu0 %v12207_v43  ;;  %v12293_v43 = vld [vmem:[%s13740_s22 + $0x1cc0] ss:$8 sps:$4 sm:$0xff]  }
 0x26d   : > { %8389 = vmatpush1.bf16.msra.mxu1 %v12202_v44  ;;  %v12298_v44 = vld [vmem:[%s13740_s22 + $0x8d4] ss:$8 sps:$4 sm:$0xff]  }
 0x26e   : > { %9209 = vmatpush1.bf16.msra.mxu0 %v12205_v45  ;;  %8390 = vmatprep.subr.bf16.mxu1 %v12210_v25  ;;  %v12301_v45 = vld [vmem:[%s13740_s22 + $0x1cd4] ss:$8 sps:$4 sm:$0xff]   ;;  %v12296_v25 = vld [vmem:[%s13740_s22 + $0x8d0] ss:$8 sps:$4 sm:$0xff]  }
 0x26f   : > { %9210 = vmatprep.subr.bf16.mxu0 %v12213_v47  ;;  %v12299_v47 = vld [vmem:[%s13740_s22 + $0x1cd0] ss:$8 sps:$4 sm:$0xff]  }
 0x271   : > { %8391 = vmatpush1.bf16.msra.mxu1 %v12208_v48  ;;  %v12304_v48 = vld [vmem:[%s13740_s22 + $0x8e4] ss:$8 sps:$4 sm:$0xff]  }
 0x272   : > { %9211 = vmatpush1.bf16.msra.mxu0 %v12211_v49  ;;  %8401 = vmatprep.subr.bf16.mxu1 %v12218_v50  ;;  %v12307_v49 = vld [vmem:[%s13740_s22 + $0x1ce4] ss:$8 sps:$4 sm:$0xff]   ;;  %v12302_v50 = vld [vmem:[%s13740_s22 + $0x8e0] ss:$8 sps:$4 sm:$0xff]  }
 0x273   : > { %9221 = vmatprep.subr.bf16.mxu0 %v12223_v51  ;;  %v12305_v51 = vld [vmem:[%s13740_s22 + $0x1ce0] ss:$8 sps:$4 sm:$0xff]  }
 0x274   : > { %8393 = vmatmul.mubr.bf16.vlgmr.msra.gmra.mrb[0].mxu1 %v9868_v18  ;;  %v12310_v18 = vld [vmem:[%s13740_s22 + $0x8f4] ss:$8 sps:$4 sm:$0xff]  }
 0x275   : > { %9213 = vmatmul.mubr.bf16.vlgmr.msra.gmra.mrb[0].mxu0 %v9908_v53  ;;  %8402 = vmatpush1.bf16.msra.mxu1 %v12216_v54  ;;  %v12313_v53 = vld [vmem:[%s13740_s22 + $0x1cf4] ss:$8 sps:$4 sm:$0xff]   ;;  %v12308_v54 = vld [vmem:[%s13740_s22 + $0x8f0] ss:$8 sps:$4 sm:$0xff]  }
 0x276   : > { %9222 = vmatpush1.bf16.msra.mxu0 %v12221_v55  ;;  %8403 = vmatprep.subr.bf16.mxu1 %v12226_v56  ;;  %v12311_v55 = vld [vmem:[%s13740_s22 + $0x1cf0] ss:$8 sps:$4 sm:$0xff]   ;;  %v12318_v56 = vld [vmem:[%s13740_s22 + $0x904] ss:$8 sps:$4 sm:$0xff]  }
 0x277   : > { %9223 = vmatprep.subr.bf16.mxu0 %v12229_v57  ;;  %8433 = vmatprep.mubr.bf16.mxu1 %v9871_v58  ;;  %v12323_v57 = vld [vmem:[%s13740_s22 + $0x1d04] ss:$8 sps:$4 sm:$0xff]  }
 0x278   : > { %9253 = vmatprep.mubr.bf16.mxu0 %v9911_v46  ;;  %v14416_v58 = vld [vmem:[#allocation2 + $0x48] sm:$0xff] }
 0x279   : > { %8404 = vmatpush1.bf16.msra.mxu1 %v12224_v24  ;;  %v14418_v46 = vld [vmem:[#allocation2 + $0xe8] sm:$0xff]  ;;  %v9870_v24 = vcombine.low %v14340_v52, %v14340_v52 }
 0x27a   : > { %9224 = vmatpush1.bf16.msra.mxu0 %v12227_v59  ;;  %8405 = vmatprep.subr.bf16.mxu1 %v12232_v60  ;;  %v9910_v59 = vcombine.low %v14342_v40, %v14342_v40  ;;  %v12316_v60 = vld [vmem:[%s13740_s22 + $0x900] ss:$8 sps:$4 sm:$0xff]   ;;  %v9913_v52 = vcombine.high %v14418_v46, %v14418_v46  ;;  %v12324_v40 = vld [vmem:[%s13740_s22 + $0x910] ss:$8 sps:$4 sm:$0xff]  }
 0x27b   : > { %9225 = vmatprep.subr.bf16.mxu0 %v12235_v61  ;;  %v12321_v61 = vld [vmem:[%s13740_s22 + $0x1d00] ss:$8 sps:$4 sm:$0xff]  }
 0x27d   : > { %8406 = vmatpush1.bf16.msra.mxu1 %v12230_v62  ;;  %v12326_v62 = vld [vmem:[%s13740_s22 + $0x914] ss:$8 sps:$4 sm:$0xff]  }
 0x27e   : > { %9226 = vmatpush1.bf16.msra.mxu0 %v12233_v63  ;;  %8407 = vmatprep.subr.bf16.mxu1 %v12238_v0  ;;  %v12329_v63 = vld [vmem:[%s13740_s22 + $0x1d14] ss:$8 sps:$4 sm:$0xff]   ;;  %v9873_v0 = vcombine.high %v14416_v58, %v14416_v58 }
 0x27f   : > { %9227 = vmatprep.subr.bf16.mxu0 %v12241_v1  ;;  %v12327_v1 = vld [vmem:[%s13740_s22 + $0x1d10] ss:$8 sps:$4 sm:$0xff]  }
 0x281   : > { %8408 = vmatpush1.bf16.msra.mxu1 %v12236_v2  ;;  %v12332_v2 = vld [vmem:[%s13740_s22 + $0x924] ss:$8 sps:$4 sm:$0xff]  }
 0x282   : > { %9228 = vmatpush1.bf16.msra.mxu0 %v12239_v3  ;;  %8409 = vmatprep.subr.bf16.mxu1 %v12244_v4  ;;  %v12335_v3 = vld [vmem:[%s13740_s22 + $0x1d24] ss:$8 sps:$4 sm:$0xff]   ;;  %v12330_v4 = vld [vmem:[%s13740_s22 + $0x920] ss:$8 sps:$4 sm:$0xff]  }
 0x283   : > { %9229 = vmatprep.subr.bf16.mxu0 %v12247_v5  ;;  %v12333_v5 = vld [vmem:[%s13740_s22 + $0x1d20] ss:$8 sps:$4 sm:$0xff]  }
 0x285   : > { %8410 = vmatpush1.bf16.msra.mxu1 %v12242_v6  ;;  %v12338_v6 = vld [vmem:[%s13740_s22 + $0x934] ss:$8 sps:$4 sm:$0xff]  }
 0x286   : > { %9230 = vmatpush1.bf16.msra.mxu0 %v12245_v7  ;;  %8411 = vmatprep.subr.bf16.mxu1 %v12250_v8  ;;  %v12341_v7 = vld [vmem:[%s13740_s22 + $0x1d34] ss:$8 sps:$4 sm:$0xff]   ;;  %v12336_v8 = vld [vmem:[%s13740_s22 + $0x930] ss:$8 sps:$4 sm:$0xff]  }
 0x287   : > { %9231 = vmatprep.subr.bf16.mxu0 %v12253_v9  ;;  %v12339_v9 = vld [vmem:[%s13740_s22 + $0x1d30] ss:$8 sps:$4 sm:$0xff]  }
 0x289   : > { %8412 = vmatpush1.bf16.msra.mxu1 %v12248_v10  ;;  %v12344_v10 = vld [vmem:[%s13740_s22 + $0x944] ss:$8 sps:$4 sm:$0xff]  }
 0x28a   : > { %9232 = vmatpush1.bf16.msra.mxu0 %v12251_v11  ;;  %8413 = vmatprep.subr.bf16.mxu1 %v12256_v12  ;;  %v12347_v11 = vld [vmem:[%s13740_s22 + $0x1d44] ss:$8 sps:$4 sm:$0xff]   ;;  %v12342_v12 = vld [vmem:[%s13740_s22 + $0x940] ss:$8 sps:$4 sm:$0xff]  }
 0x28b   : > { %9233 = vmatprep.subr.bf16.mxu0 %v12259_v13  ;;  %v12345_v13 = vld [vmem:[%s13740_s22 + $0x1d40] ss:$8 sps:$4 sm:$0xff]  }
 0x28d   : > { %8414 = vmatpush1.bf16.msra.mxu1 %v12254_v14  ;;  %v12350_v14 = vld [vmem:[%s13740_s22 + $0x954] ss:$8 sps:$4 sm:$0xff]  }
 0x28e   : > { %9234 = vmatpush1.bf16.msra.mxu0 %v12257_v15  ;;  %8415 = vmatprep.subr.bf16.mxu1 %v12262_v16  ;;  %v12353_v15 = vld [vmem:[%s13740_s22 + $0x1d54] ss:$8 sps:$4 sm:$0xff]   ;;  %v12348_v16 = vld [vmem:[%s13740_s22 + $0x950] ss:$8 sps:$4 sm:$0xff]  }
 0x28f   : > { %9235 = vmatprep.subr.bf16.mxu0 %v12265_v17  ;;  %v12351_v17 = vld [vmem:[%s13740_s22 + $0x1d50] ss:$8 sps:$4 sm:$0xff]  }
 0x291   : > { %8416 = vmatpush1.bf16.msra.mxu1 %v12260_v19  ;;  %v12356_v19 = vld [vmem:[%s13740_s22 + $0x964] ss:$8 sps:$4 sm:$0xff]  }
 0x292   : > { %9236 = vmatpush1.bf16.msra.mxu0 %v12263_v21  ;;  %8417 = vmatprep.subr.bf16.mxu1 %v12268_v22  ;;  %v12359_v21 = vld [vmem:[%s13740_s22 + $0x1d64] ss:$8 sps:$4 sm:$0xff]   ;;  %v12354_v22 = vld [vmem:[%s13740_s22 + $0x960] ss:$8 sps:$4 sm:$0xff]  }
 0x293   : > { %9237 = vmatprep.subr.bf16.mxu0 %v12271_v23  ;;  %v12357_v23 = vld [vmem:[%s13740_s22 + $0x1d60] ss:$8 sps:$4 sm:$0xff]  }
 0x295   : > { %8418 = vmatpush1.bf16.msra.mxu1 %v12266_v26  ;;  %v12362_v26 = vld [vmem:[%s13740_s22 + $0x974] ss:$8 sps:$4 sm:$0xff]  }
 0x296   : > { %9238 = vmatpush1.bf16.msra.mxu0 %v12269_v27  ;;  %8419 = vmatprep.subr.bf16.mxu1 %v12274_v20  ;;  %v12365_v27 = vld [vmem:[%s13740_s22 + $0x1d74] ss:$8 sps:$4 sm:$0xff]   ;;  %v12360_v20 = vld [vmem:[%s13740_s22 + $0x970] ss:$8 sps:$4 sm:$0xff]  }
 0x297   : > { %9239 = vmatprep.subr.bf16.mxu0 %v12277_v28  ;;  %v12363_v28 = vld [vmem:[%s13740_s22 + $0x1d70] ss:$8 sps:$4 sm:$0xff]  }
 0x299   : > { %8420 = vmatpush1.bf16.msra.mxu1 %v12272_v30  ;;  %v12368_v30 = vld [vmem:[%s13740_s22 + $0x984] ss:$8 sps:$4 sm:$0xff]  }
 0x29a   : > { %9240 = vmatpush1.bf16.msra.mxu0 %v12275_v31  ;;  %8421 = vmatprep.subr.bf16.mxu1 %v12280_v32  ;;  %v12371_v31 = vld [vmem:[%s13740_s22 + $0x1d84] ss:$8 sps:$4 sm:$0xff]   ;;  %v12366_v32 = vld [vmem:[%s13740_s22 + $0x980] ss:$8 sps:$4 sm:$0xff]  }
 0x29b   : > { %9241 = vmatprep.subr.bf16.mxu0 %v12283_v33  ;;  %v12369_v33 = vld [vmem:[%s13740_s22 + $0x1d80] ss:$8 sps:$4 sm:$0xff]  }
 0x29d   : > { %8422 = vmatpush1.bf16.msra.mxu1 %v12278_v34  ;;  %v12374_v34 = vld [vmem:[%s13740_s22 + $0x994] ss:$8 sps:$4 sm:$0xff]  }
 0x29e   : > { %9242 = vmatpush1.bf16.msra.mxu0 %v12281_v35  ;;  %8423 = vmatprep.subr.bf16.mxu1 %v12286_v36  ;;  %v12377_v35 = vld [vmem:[%s13740_s22 + $0x1d94] ss:$8 sps:$4 sm:$0xff]   ;;  %v12372_v36 = vld [vmem:[%s13740_s22 + $0x990] ss:$8 sps:$4 sm:$0xff]  }
 0x29f   : > { %9243 = vmatprep.subr.bf16.mxu0 %v12289_v37  ;;  %v12375_v37 = vld [vmem:[%s13740_s22 + $0x1d90] ss:$8 sps:$4 sm:$0xff]  }
 0x2a1   : > { %8424 = vmatpush1.bf16.msra.mxu1 %v12284_v38  ;;  %v12380_v38 = vld [vmem:[%s13740_s22 + $0x9a4] ss:$8 sps:$4 sm:$0xff]  }
 0x2a2   : > { %9244 = vmatpush1.bf16.msra.mxu0 %v12287_v39  ;;  %8425 = vmatprep.subr.bf16.mxu1 %v12292_v29  ;;  %v12383_v39 = vld [vmem:[%s13740_s22 + $0x1da4] ss:$8 sps:$4 sm:$0xff]   ;;  %v12378_v29 = vld [vmem:[%s13740_s22 + $0x9a0] ss:$8 sps:$4 sm:$0xff]  }
 0x2a3   : > { %9245 = vmatprep.subr.bf16.mxu0 %v12295_v41  ;;  %v12381_v41 = vld [vmem:[%s13740_s22 + $0x1da0] ss:$8 sps:$4 sm:$0xff]  }
 0x2a5   : > { %8426 = vmatpush1.bf16.msra.mxu1 %v12290_v42  ;;  %v12386_v42 = vld [vmem:[%s13740_s22 + $0x9b4] ss:$8 sps:$4 sm:$0xff]  }
 0x2a6   : > { %9246 = vmatpush1.bf16.msra.mxu0 %v12293_v43  ;;  %8427 = vmatprep.subr.bf16.mxu1 %v12298_v44  ;;  %v12389_v43 = vld [vmem:[%s13740_s22 + $0x1db4] ss:$8 sps:$4 sm:$0xff]   ;;  %v12384_v44 = vld [vmem:[%s13740_s22 + $0x9b0] ss:$8 sps:$4 sm:$0xff]  }
 0x2a7   : > { %9247 = vmatprep.subr.bf16.mxu0 %v12301_v45  ;;  %v12387_v45 = vld [vmem:[%s13740_s22 + $0x1db0] ss:$8 sps:$4 sm:$0xff]  }
 0x2a9   : > { %8428 = vmatpush1.bf16.msra.mxu1 %v12296_v25  ;;  %v12392_v25 = vld [vmem:[%s13740_s22 + $0x9c4] ss:$8 sps:$4 sm:$0xff]  }
 0x2aa   : > { %9248 = vmatpush1.bf16.msra.mxu0 %v12299_v47  ;;  %8429 = vmatprep.subr.bf16.mxu1 %v12304_v48  ;;  %v12395_v47 = vld [vmem:[%s13740_s22 + $0x1dc4] ss:$8 sps:$4 sm:$0xff]   ;;  %v12390_v48 = vld [vmem:[%s13740_s22 + $0x9c0] ss:$8 sps:$4 sm:$0xff]  }
 0x2ab   : > { %9249 = vmatprep.subr.bf16.mxu0 %v12307_v49  ;;  %v12393_v49 = vld [vmem:[%s13740_s22 + $0x1dc0] ss:$8 sps:$4 sm:$0xff]  }
 0x2ad   : > { %8430 = vmatpush1.bf16.msra.mxu1 %v12302_v50  ;;  %v12398_v50 = vld [vmem:[%s13740_s22 + $0x9d4] ss:$8 sps:$4 sm:$0xff]  }
 0x2ae   : > { %9250 = vmatpush1.bf16.msra.mxu0 %v12305_v51  ;;  %8431 = vmatprep.subr.bf16.mxu1 %v12310_v18  ;;  %v12401_v51 = vld [vmem:[%s13740_s22 + $0x1dd4] ss:$8 sps:$4 sm:$0xff]   ;;  %v12396_v18 = vld [vmem:[%s13740_s22 + $0x9d0] ss:$8 sps:$4 sm:$0xff]  }
 0x2af   : > { %9251 = vmatprep.subr.bf16.mxu0 %v12313_v53  ;;  %v12399_v53 = vld [vmem:[%s13740_s22 + $0x1dd0] ss:$8 sps:$4 sm:$0xff]  }
 0x2b1   : > { %8432 = vmatpush1.bf16.msra.mxu1 %v12308_v54  ;;  %v12404_v54 = vld [vmem:[%s13740_s22 + $0x9e4] ss:$8 sps:$4 sm:$0xff]  }
 0x2b2   : > { %9252 = vmatpush1.bf16.msra.mxu0 %v12311_v55  ;;  %8442 = vmatprep.subr.bf16.mxu1 %v12318_v56  ;;  %v12407_v55 = vld [vmem:[%s13740_s22 + $0x1de4] ss:$8 sps:$4 sm:$0xff]   ;;  %v12402_v56 = vld [vmem:[%s13740_s22 + $0x9e0] ss:$8 sps:$4 sm:$0xff]  }
 0x2b3   : > { %9262 = vmatprep.subr.bf16.mxu0 %v12323_v57  ;;  %v12405_v57 = vld [vmem:[%s13740_s22 + $0x1de0] ss:$8 sps:$4 sm:$0xff]  }
 0x2b4   : > { %8434 = vmatmul.mubr.bf16.vlgmr.msra.gmra.mrb[0].mxu1 %v9870_v24  ;;  %v12410_v24 = vld [vmem:[%s13740_s22 + $0x9f4] ss:$8 sps:$4 sm:$0xff]  }
 0x2b5   : > { %9254 = vmatmul.mubr.bf16.vlgmr.msra.gmra.mrb[0].mxu0 %v9910_v59  ;;  %8443 = vmatpush1.bf16.msra.mxu1 %v12316_v60  ;;  %v12413_v59 = vld [vmem:[%s13740_s22 + $0x1df4] ss:$8 sps:$4 sm:$0xff]   ;;  %v12408_v60 = vld [vmem:[%s13740_s22 + $0x9f0] ss:$8 sps:$4 sm:$0xff]  }
 0x2b6   : > { %9263 = vmatpush1.bf16.msra.mxu0 %v12321_v61  ;;  %8444 = vmatprep.subr.bf16.mxu1 %v12326_v62  ;;  %v12411_v61 = vld [vmem:[%s13740_s22 + $0x1df0] ss:$8 sps:$4 sm:$0xff]   ;;  %v12418_v62 = vld [vmem:[%s13740_s22 + $0xa04] ss:$8 sps:$4 sm:$0xff]  }
 0x2b7   : > { %9264 = vmatprep.subr.bf16.mxu0 %v12329_v63  ;;  %8474 = vmatprep.mubr.bf16.mxu1 %v9873_v0  ;;  %v12423_v63 = vld [vmem:[%s13740_s22 + $0x1e04] ss:$8 sps:$4 sm:$0xff]  }
 0x2b8   : > { %9294 = vmatprep.mubr.bf16.mxu0 %v9913_v52  ;;  %v14492_v0 = vld [vmem:[#allocation2 + $0x50] sm:$0xff] }
 0x2b9   : > { %8445 = vmatpush1.bf16.msra.mxu1 %v12324_v40  ;;  %v14494_v52 = vld [vmem:[#allocation2 + $0xf0] sm:$0xff]  ;;  %v9872_v40 = vcombine.low %v14416_v58, %v14416_v58 }
 0x2ba   : > { %9265 = vmatpush1.bf16.msra.mxu0 %v12327_v1  ;;  %8446 = vmatprep.subr.bf16.mxu1 %v12332_v2  ;;  %v9912_v1 = vcombine.low %v14418_v46, %v14418_v46  ;;  %v12416_v2 = vld [vmem:[%s13740_s22 + $0xa00] ss:$8 sps:$4 sm:$0xff]   ;;  %v9915_v58 = vcombine.high %v14494_v52, %v14494_v52  ;;  %v12424_v46 = vld [vmem:[%s13740_s22 + $0xa10] ss:$8 sps:$4 sm:$0xff]  }
 0x2bb   : > { %9266 = vmatprep.subr.bf16.mxu0 %v12335_v3  ;;  %v12421_v3 = vld [vmem:[%s13740_s22 + $0x1e00] ss:$8 sps:$4 sm:$0xff]  }
 0x2bd   : > { %8447 = vmatpush1.bf16.msra.mxu1 %v12330_v4  ;;  %v12426_v4 = vld [vmem:[%s13740_s22 + $0xa14] ss:$8 sps:$4 sm:$0xff]  }
 0x2be   : > { %9267 = vmatpush1.bf16.msra.mxu0 %v12333_v5  ;;  %8448 = vmatprep.subr.bf16.mxu1 %v12338_v6  ;;  %v12429_v5 = vld [vmem:[%s13740_s22 + $0x1e14] ss:$8 sps:$4 sm:$0xff]   ;;  %v9875_v6 = vcombine.high %v14492_v0, %v14492_v0 }
 0x2bf   : > { %9268 = vmatprep.subr.bf16.mxu0 %v12341_v7  ;;  %v12427_v7 = vld [vmem:[%s13740_s22 + $0x1e10] ss:$8 sps:$4 sm:$0xff]  }
 0x2c1   : > { %8449 = vmatpush1.bf16.msra.mxu1 %v12336_v8  ;;  %v12432_v8 = vld [vmem:[%s13740_s22 + $0xa24] ss:$8 sps:$4 sm:$0xff]  }
 0x2c2   : > { %9269 = vmatpush1.bf16.msra.mxu0 %v12339_v9  ;;  %8450 = vmatprep.subr.bf16.mxu1 %v12344_v10  ;;  %v12435_v9 = vld [vmem:[%s13740_s22 + $0x1e24] ss:$8 sps:$4 sm:$0xff]   ;;  %v12430_v10 = vld [vmem:[%s13740_s22 + $0xa20] ss:$8 sps:$4 sm:$0xff]  }
 0x2c3   : > { %9270 = vmatprep.subr.bf16.mxu0 %v12347_v11  ;;  %v12433_v11 = vld [vmem:[%s13740_s22 + $0x1e20] ss:$8 sps:$4 sm:$0xff]  }
 0x2c5   : > { %8451 = vmatpush1.bf16.msra.mxu1 %v12342_v12  ;;  %v12438_v12 = vld [vmem:[%s13740_s22 + $0xa34] ss:$8 sps:$4 sm:$0xff]  }
 0x2c6   : > { %9271 = vmatpush1.bf16.msra.mxu0 %v12345_v13  ;;  %8452 = vmatprep.subr.bf16.mxu1 %v12350_v14  ;;  %v12441_v13 = vld [vmem:[%s13740_s22 + $0x1e34] ss:$8 sps:$4 sm:$0xff]   ;;  %v12436_v14 = vld [vmem:[%s13740_s22 + $0xa30] ss:$8 sps:$4 sm:$0xff]  }
 0x2c7   : > { %9272 = vmatprep.subr.bf16.mxu0 %v12353_v15  ;;  %v12439_v15 = vld [vmem:[%s13740_s22 + $0x1e30] ss:$8 sps:$4 sm:$0xff]  }
 0x2c9   : > { %8453 = vmatpush1.bf16.msra.mxu1 %v12348_v16  ;;  %v12444_v16 = vld [vmem:[%s13740_s22 + $0xa44] ss:$8 sps:$4 sm:$0xff]  }
 0x2ca   : > { %9273 = vmatpush1.bf16.msra.mxu0 %v12351_v17  ;;  %8454 = vmatprep.subr.bf16.mxu1 %v12356_v19  ;;  %v12447_v17 = vld [vmem:[%s13740_s22 + $0x1e44] ss:$8 sps:$4 sm:$0xff]   ;;  %v12442_v19 = vld [vmem:[%s13740_s22 + $0xa40] ss:$8 sps:$4 sm:$0xff]  }
 0x2cb   : > { %9274 = vmatprep.subr.bf16.mxu0 %v12359_v21  ;;  %v12445_v21 = vld [vmem:[%s13740_s22 + $0x1e40] ss:$8 sps:$4 sm:$0xff]  }
 0x2cd   : > { %8455 = vmatpush1.bf16.msra.mxu1 %v12354_v22  ;;  %v12450_v22 = vld [vmem:[%s13740_s22 + $0xa54] ss:$8 sps:$4 sm:$0xff]  }
 0x2ce   : > { %9275 = vmatpush1.bf16.msra.mxu0 %v12357_v23  ;;  %8456 = vmatprep.subr.bf16.mxu1 %v12362_v26  ;;  %v12453_v23 = vld [vmem:[%s13740_s22 + $0x1e54] ss:$8 sps:$4 sm:$0xff]   ;;  %v12448_v26 = vld [vmem:[%s13740_s22 + $0xa50] ss:$8 sps:$4 sm:$0xff]  }
 0x2cf   : > { %9276 = vmatprep.subr.bf16.mxu0 %v12365_v27  ;;  %v12451_v27 = vld [vmem:[%s13740_s22 + $0x1e50] ss:$8 sps:$4 sm:$0xff]  }
 0x2d1   : > { %8457 = vmatpush1.bf16.msra.mxu1 %v12360_v20  ;;  %v12456_v20 = vld [vmem:[%s13740_s22 + $0xa64] ss:$8 sps:$4 sm:$0xff]  }
 0x2d2   : > { %9277 = vmatpush1.bf16.msra.mxu0 %v12363_v28  ;;  %8458 = vmatprep.subr.bf16.mxu1 %v12368_v30  ;;  %v12459_v28 = vld [vmem:[%s13740_s22 + $0x1e64] ss:$8 sps:$4 sm:$0xff]   ;;  %v12454_v30 = vld [vmem:[%s13740_s22 + $0xa60] ss:$8 sps:$4 sm:$0xff]  }
 0x2d3   : > { %9278 = vmatprep.subr.bf16.mxu0 %v12371_v31  ;;  %v12457_v31 = vld [vmem:[%s13740_s22 + $0x1e60] ss:$8 sps:$4 sm:$0xff]  }
 0x2d5   : > { %8459 = vmatpush1.bf16.msra.mxu1 %v12366_v32  ;;  %v12462_v32 = vld [vmem:[%s13740_s22 + $0xa74] ss:$8 sps:$4 sm:$0xff]  }
 0x2d6   : > { %9279 = vmatpush1.bf16.msra.mxu0 %v12369_v33  ;;  %8460 = vmatprep.subr.bf16.mxu1 %v12374_v34  ;;  %v12465_v33 = vld [vmem:[%s13740_s22 + $0x1e74] ss:$8 sps:$4 sm:$0xff]   ;;  %v12460_v34 = vld [vmem:[%s13740_s22 + $0xa70] ss:$8 sps:$4 sm:$0xff]  }
 0x2d7   : > { %9280 = vmatprep.subr.bf16.mxu0 %v12377_v35  ;;  %v12463_v35 = vld [vmem:[%s13740_s22 + $0x1e70] ss:$8 sps:$4 sm:$0xff]  }
 0x2d9   : > { %8461 = vmatpush1.bf16.msra.mxu1 %v12372_v36  ;;  %v12468_v36 = vld [vmem:[%s13740_s22 + $0xa84] ss:$8 sps:$4 sm:$0xff]  }
 0x2da   : > { %9281 = vmatpush1.bf16.msra.mxu0 %v12375_v37  ;;  %8462 = vmatprep.subr.bf16.mxu1 %v12380_v38  ;;  %v12471_v37 = vld [vmem:[%s13740_s22 + $0x1e84] ss:$8 sps:$4 sm:$0xff]   ;;  %v12466_v38 = vld [vmem:[%s13740_s22 + $0xa80] ss:$8 sps:$4 sm:$0xff]  }
 0x2db   : > { %9282 = vmatprep.subr.bf16.mxu0 %v12383_v39  ;;  %v12469_v39 = vld [vmem:[%s13740_s22 + $0x1e80] ss:$8 sps:$4 sm:$0xff]  }
 0x2dd   : > { %8463 = vmatpush1.bf16.msra.mxu1 %v12378_v29  ;;  %v12474_v29 = vld [vmem:[%s13740_s22 + $0xa94] ss:$8 sps:$4 sm:$0xff]  }
 0x2de   : > { %9283 = vmatpush1.bf16.msra.mxu0 %v12381_v41  ;;  %8464 = vmatprep.subr.bf16.mxu1 %v12386_v42  ;;  %v12477_v41 = vld [vmem:[%s13740_s22 + $0x1e94] ss:$8 sps:$4 sm:$0xff]   ;;  %v12472_v42 = vld [vmem:[%s13740_s22 + $0xa90] ss:$8 sps:$4 sm:$0xff]  }
 0x2df   : > { %9284 = vmatprep.subr.bf16.mxu0 %v12389_v43  ;;  %v12475_v43 = vld [vmem:[%s13740_s22 + $0x1e90] ss:$8 sps:$4 sm:$0xff]  }
 0x2e1   : > { %8465 = vmatpush1.bf16.msra.mxu1 %v12384_v44  ;;  %v12480_v44 = vld [vmem:[%s13740_s22 + $0xaa4] ss:$8 sps:$4 sm:$0xff]  }
 0x2e2   : > { %9285 = vmatpush1.bf16.msra.mxu0 %v12387_v45  ;;  %8466 = vmatprep.subr.bf16.mxu1 %v12392_v25  ;;  %v12483_v45 = vld [vmem:[%s13740_s22 + $0x1ea4] ss:$8 sps:$4 sm:$0xff]   ;;  %v12478_v25 = vld [vmem:[%s13740_s22 + $0xaa0] ss:$8 sps:$4 sm:$0xff]  }
 0x2e3   : > { %9286 = vmatprep.subr.bf16.mxu0 %v12395_v47  ;;  %v12481_v47 = vld [vmem:[%s13740_s22 + $0x1ea0] ss:$8 sps:$4 sm:$0xff]  }
 0x2e5   : > { %8467 = vmatpush1.bf16.msra.mxu1 %v12390_v48  ;;  %v12486_v48 = vld [vmem:[%s13740_s22 + $0xab4] ss:$8 sps:$4 sm:$0xff]  }
 0x2e6   : > { %9287 = vmatpush1.bf16.msra.mxu0 %v12393_v49  ;;  %8468 = vmatprep.subr.bf16.mxu1 %v12398_v50  ;;  %v12489_v49 = vld [vmem:[%s13740_s22 + $0x1eb4] ss:$8 sps:$4 sm:$0xff]   ;;  %v12484_v50 = vld [vmem:[%s13740_s22 + $0xab0] ss:$8 sps:$4 sm:$0xff]  }
 0x2e7   : > { %9288 = vmatprep.subr.bf16.mxu0 %v12401_v51  ;;  %v12487_v51 = vld [vmem:[%s13740_s22 + $0x1eb0] ss:$8 sps:$4 sm:$0xff]  }
 0x2e9   : > { %8469 = vmatpush1.bf16.msra.mxu1 %v12396_v18  ;;  %v12492_v18 = vld [vmem:[%s13740_s22 + $0xac4] ss:$8 sps:$4 sm:$0xff]  }
 0x2ea   : > { %9289 = vmatpush1.bf16.msra.mxu0 %v12399_v53  ;;  %8470 = vmatprep.subr.bf16.mxu1 %v12404_v54  ;;  %v12495_v53 = vld [vmem:[%s13740_s22 + $0x1ec4] ss:$8 sps:$4 sm:$0xff]   ;;  %v12490_v54 = vld [vmem:[%s13740_s22 + $0xac0] ss:$8 sps:$4 sm:$0xff]  }
 0x2eb   : > { %9290 = vmatprep.subr.bf16.mxu0 %v12407_v55  ;;  %v12493_v55 = vld [vmem:[%s13740_s22 + $0x1ec0] ss:$8 sps:$4 sm:$0xff]  }
 0x2ed   : > { %8471 = vmatpush1.bf16.msra.mxu1 %v12402_v56  ;;  %v12498_v56 = vld [vmem:[%s13740_s22 + $0xad4] ss:$8 sps:$4 sm:$0xff]  }
 0x2ee   : > { %9291 = vmatpush1.bf16.msra.mxu0 %v12405_v57  ;;  %8472 = vmatprep.subr.bf16.mxu1 %v12410_v24  ;;  %v12501_v57 = vld [vmem:[%s13740_s22 + $0x1ed4] ss:$8 sps:$4 sm:$0xff]   ;;  %v12496_v24 = vld [vmem:[%s13740_s22 + $0xad0] ss:$8 sps:$4 sm:$0xff]  }
 0x2ef   : > { %9292 = vmatprep.subr.bf16.mxu0 %v12413_v59  ;;  %v12499_v59 = vld [vmem:[%s13740_s22 + $0x1ed0] ss:$8 sps:$4 sm:$0xff]  }
 0x2f1   : > { %8473 = vmatpush1.bf16.msra.mxu1 %v12408_v60  ;;  %v12504_v60 = vld [vmem:[%s13740_s22 + $0xae4] ss:$8 sps:$4 sm:$0xff]  }
 0x2f2   : > { %9293 = vmatpush1.bf16.msra.mxu0 %v12411_v61  ;;  %8483 = vmatprep.subr.bf16.mxu1 %v12418_v62  ;;  %v12507_v61 = vld [vmem:[%s13740_s22 + $0x1ee4] ss:$8 sps:$4 sm:$0xff]   ;;  %v12502_v62 = vld [vmem:[%s13740_s22 + $0xae0] ss:$8 sps:$4 sm:$0xff]  }
 0x2f3   : > { %9303 = vmatprep.subr.bf16.mxu0 %v12423_v63  ;;  %v12505_v63 = vld [vmem:[%s13740_s22 + $0x1ee0] ss:$8 sps:$4 sm:$0xff]  }
 0x2f4   : > { %8475 = vmatmul.mubr.bf16.vlgmr.msra.gmra.mrb[0].mxu1 %v9872_v40  ;;  %v12510_v40 = vld [vmem:[%s13740_s22 + $0xaf4] ss:$8 sps:$4 sm:$0xff]  }
 0x2f5   : > { %9295 = vmatmul.mubr.bf16.vlgmr.msra.gmra.mrb[0].mxu0 %v9912_v1  ;;  %8484 = vmatpush1.bf16.msra.mxu1 %v12416_v2  ;;  %v12513_v1 = vld [vmem:[%s13740_s22 + $0x1ef4] ss:$8 sps:$4 sm:$0xff]   ;;  %v12508_v2 = vld [vmem:[%s13740_s22 + $0xaf0] ss:$8 sps:$4 sm:$0xff]  }
 0x2f6   : > { %9304 = vmatpush1.bf16.msra.mxu0 %v12421_v3  ;;  %8485 = vmatprep.subr.bf16.mxu1 %v12426_v4  ;;  %v12511_v3 = vld [vmem:[%s13740_s22 + $0x1ef0] ss:$8 sps:$4 sm:$0xff]   ;;  %v12518_v4 = vld [vmem:[%s13740_s22 + $0xb04] ss:$8 sps:$4 sm:$0xff]  }
 0x2f7   : > { %9305 = vmatprep.subr.bf16.mxu0 %v12429_v5  ;;  %8515 = vmatprep.mubr.bf16.mxu1 %v9875_v6  ;;  %v12523_v5 = vld [vmem:[%s13740_s22 + $0x1f04] ss:$8 sps:$4 sm:$0xff]   ;;  %v9874_v6 = vcombine.low %v14492_v0, %v14492_v0 }
 0x2f8   : > { %9335 = vmatprep.mubr.bf16.mxu0 %v9915_v58  ;;  %v9914_v58 = vcombine.low %v14494_v52, %v14494_v52 }
 0x2f9   : > { %8486 = vmatpush1.bf16.msra.mxu1 %v12424_v46  ;;  %v14572_v46 = vld [vmem:[#allocation2 + $0x58] sm:$0xff] }
 0x2fa   : > { %9306 = vmatpush1.bf16.msra.mxu0 %v12427_v7  ;;  %8487 = vmatprep.subr.bf16.mxu1 %v12432_v8  ;;  %v14574_v7 = vld [vmem:[#allocation2 + $0xf8] sm:$0xff]  ;;  %v9877_v0 = vcombine.high %v14572_v46, %v14572_v46 }
 0x2fb   : > { %9307 = vmatprep.subr.bf16.mxu0 %v12435_v9  ;;  %v12516_v8 = vld [vmem:[%s13740_s22 + $0xb00] ss:$8 sps:$4 sm:$0xff]   ;;  %v9917_v52 = vcombine.high %v14574_v7, %v14574_v7 }
 0x2fc   : > { %v12521_v9 = vld [vmem:[%s13740_s22 + $0x1f00] ss:$8 sps:$4 sm:$0xff]  }
 0x2fd   : > { %8488 = vmatpush1.bf16.msra.mxu1 %v12430_v10  ;;  %v12526_v10 = vld [vmem:[%s13740_s22 + $0xb14] ss:$8 sps:$4 sm:$0xff]  }
 0x2fe   : > { %9308 = vmatpush1.bf16.msra.mxu0 %v12433_v11  ;;  %8489 = vmatprep.subr.bf16.mxu1 %v12438_v12  ;;  %v12529_v11 = vld [vmem:[%s13740_s22 + $0x1f14] ss:$8 sps:$4 sm:$0xff]   ;;  %v12524_v12 = vld [vmem:[%s13740_s22 + $0xb10] ss:$8 sps:$4 sm:$0xff]  }
 0x2ff   : > { %9309 = vmatprep.subr.bf16.mxu0 %v12441_v13  ;;  %v12527_v13 = vld [vmem:[%s13740_s22 + $0x1f10] ss:$8 sps:$4 sm:$0xff]  }
 0x301   : > { %8490 = vmatpush1.bf16.msra.mxu1 %v12436_v14  ;;  %v12532_v14 = vld [vmem:[%s13740_s22 + $0xb24] ss:$8 sps:$4 sm:$0xff]  }
 0x302   : > { %9310 = vmatpush1.bf16.msra.mxu0 %v12439_v15  ;;  %8491 = vmatprep.subr.bf16.mxu1 %v12444_v16  ;;  %v12535_v15 = vld [vmem:[%s13740_s22 + $0x1f24] ss:$8 sps:$4 sm:$0xff]   ;;  %v12530_v16 = vld [vmem:[%s13740_s22 + $0xb20] ss:$8 sps:$4 sm:$0xff]  }
 0x303   : > { %9311 = vmatprep.subr.bf16.mxu0 %v12447_v17  ;;  %v12533_v17 = vld [vmem:[%s13740_s22 + $0x1f20] ss:$8 sps:$4 sm:$0xff]  }
 0x305   : > { %8492 = vmatpush1.bf16.msra.mxu1 %v12442_v19  ;;  %v12538_v19 = vld [vmem:[%s13740_s22 + $0xb34] ss:$8 sps:$4 sm:$0xff]  }
 0x306   : > { %9312 = vmatpush1.bf16.msra.mxu0 %v12445_v21  ;;  %8493 = vmatprep.subr.bf16.mxu1 %v12450_v22  ;;  %v12541_v21 = vld [vmem:[%s13740_s22 + $0x1f34] ss:$8 sps:$4 sm:$0xff]   ;;  %v12536_v22 = vld [vmem:[%s13740_s22 + $0xb30] ss:$8 sps:$4 sm:$0xff]  }
 0x307   : > { %9313 = vmatprep.subr.bf16.mxu0 %v12453_v23  ;;  %v12539_v23 = vld [vmem:[%s13740_s22 + $0x1f30] ss:$8 sps:$4 sm:$0xff]  }
 0x309   : > { %8494 = vmatpush1.bf16.msra.mxu1 %v12448_v26  ;;  %v12544_v26 = vld [vmem:[%s13740_s22 + $0xb44] ss:$8 sps:$4 sm:$0xff]  }
 0x30a   : > { %9314 = vmatpush1.bf16.msra.mxu0 %v12451_v27  ;;  %8495 = vmatprep.subr.bf16.mxu1 %v12456_v20  ;;  %v12547_v27 = vld [vmem:[%s13740_s22 + $0x1f44] ss:$8 sps:$4 sm:$0xff]   ;;  %v12542_v20 = vld [vmem:[%s13740_s22 + $0xb40] ss:$8 sps:$4 sm:$0xff]  }
 0x30b   : > { %9315 = vmatprep.subr.bf16.mxu0 %v12459_v28  ;;  %v12545_v28 = vld [vmem:[%s13740_s22 + $0x1f40] ss:$8 sps:$4 sm:$0xff]  }
 0x30d   : > { %8496 = vmatpush1.bf16.msra.mxu1 %v12454_v30  ;;  %v12550_v30 = vld [vmem:[%s13740_s22 + $0xb54] ss:$8 sps:$4 sm:$0xff]  }
 0x30e   : > { %9316 = vmatpush1.bf16.msra.mxu0 %v12457_v31  ;;  %8497 = vmatprep.subr.bf16.mxu1 %v12462_v32  ;;  %v12553_v31 = vld [vmem:[%s13740_s22 + $0x1f54] ss:$8 sps:$4 sm:$0xff]   ;;  %v12548_v32 = vld [vmem:[%s13740_s22 + $0xb50] ss:$8 sps:$4 sm:$0xff]  }
 0x30f   : > { %9317 = vmatprep.subr.bf16.mxu0 %v12465_v33  ;;  %v12551_v33 = vld [vmem:[%s13740_s22 + $0x1f50] ss:$8 sps:$4 sm:$0xff]  }
 0x311   : > { %8498 = vmatpush1.bf16.msra.mxu1 %v12460_v34  ;;  %v12556_v34 = vld [vmem:[%s13740_s22 + $0xb64] ss:$8 sps:$4 sm:$0xff]  }
 0x312   : > { %9318 = vmatpush1.bf16.msra.mxu0 %v12463_v35  ;;  %8499 = vmatprep.subr.bf16.mxu1 %v12468_v36  ;;  %v12559_v35 = vld [vmem:[%s13740_s22 + $0x1f64] ss:$8 sps:$4 sm:$0xff]   ;;  %v12554_v36 = vld [vmem:[%s13740_s22 + $0xb60] ss:$8 sps:$4 sm:$0xff]  }
 0x313   : > { %9319 = vmatprep.subr.bf16.mxu0 %v12471_v37  ;;  %v12557_v37 = vld [vmem:[%s13740_s22 + $0x1f60] ss:$8 sps:$4 sm:$0xff]  }
 0x315   : > { %8500 = vmatpush1.bf16.msra.mxu1 %v12466_v38  ;;  %v12562_v38 = vld [vmem:[%s13740_s22 + $0xb74] ss:$8 sps:$4 sm:$0xff]  }
 0x316   : > { %9320 = vmatpush1.bf16.msra.mxu0 %v12469_v39  ;;  %8501 = vmatprep.subr.bf16.mxu1 %v12474_v29  ;;  %v12565_v39 = vld [vmem:[%s13740_s22 + $0x1f74] ss:$8 sps:$4 sm:$0xff]   ;;  %v12560_v29 = vld [vmem:[%s13740_s22 + $0xb70] ss:$8 sps:$4 sm:$0xff]  }
 0x317   : > { %9321 = vmatprep.subr.bf16.mxu0 %v12477_v41  ;;  %v12563_v41 = vld [vmem:[%s13740_s22 + $0x1f70] ss:$8 sps:$4 sm:$0xff]  }
 0x319   : > { %8502 = vmatpush1.bf16.msra.mxu1 %v12472_v42  ;;  %v12568_v42 = vld [vmem:[%s13740_s22 + $0xb84] ss:$8 sps:$4 sm:$0xff]  }
 0x31a   : > { %9322 = vmatpush1.bf16.msra.mxu0 %v12475_v43  ;;  %8503 = vmatprep.subr.bf16.mxu1 %v12480_v44  ;;  %v12571_v43 = vld [vmem:[%s13740_s22 + $0x1f84] ss:$8 sps:$4 sm:$0xff]   ;;  %v12566_v44 = vld [vmem:[%s13740_s22 + $0xb80] ss:$8 sps:$4 sm:$0xff]  }
 0x31b   : > { %9323 = vmatprep.subr.bf16.mxu0 %v12483_v45  ;;  %v12569_v45 = vld [vmem:[%s13740_s22 + $0x1f80] ss:$8 sps:$4 sm:$0xff]  }
 0x31d   : > { %8504 = vmatpush1.bf16.msra.mxu1 %v12478_v25  ;;  %v12574_v25 = vld [vmem:[%s13740_s22 + $0xb94] ss:$8 sps:$4 sm:$0xff]  }
 0x31e   : > { %9324 = vmatpush1.bf16.msra.mxu0 %v12481_v47  ;;  %8505 = vmatprep.subr.bf16.mxu1 %v12486_v48  ;;  %v12577_v47 = vld [vmem:[%s13740_s22 + $0x1f94] ss:$8 sps:$4 sm:$0xff]   ;;  %v12572_v48 = vld [vmem:[%s13740_s22 + $0xb90] ss:$8 sps:$4 sm:$0xff]  }
 0x31f   : > { %9325 = vmatprep.subr.bf16.mxu0 %v12489_v49  ;;  %v12575_v49 = vld [vmem:[%s13740_s22 + $0x1f90] ss:$8 sps:$4 sm:$0xff]  }
 0x321   : > { %8506 = vmatpush1.bf16.msra.mxu1 %v12484_v50  ;;  %v12580_v50 = vld [vmem:[%s13740_s22 + $0xba4] ss:$8 sps:$4 sm:$0xff]  }
 0x322   : > { %9326 = vmatpush1.bf16.msra.mxu0 %v12487_v51  ;;  %8507 = vmatprep.subr.bf16.mxu1 %v12492_v18  ;;  %v12583_v51 = vld [vmem:[%s13740_s22 + $0x1fa4] ss:$8 sps:$4 sm:$0xff]   ;;  %v12578_v18 = vld [vmem:[%s13740_s22 + $0xba0] ss:$8 sps:$4 sm:$0xff]  }
 0x323   : > { %9327 = vmatprep.subr.bf16.mxu0 %v12495_v53  ;;  %v12581_v53 = vld [vmem:[%s13740_s22 + $0x1fa0] ss:$8 sps:$4 sm:$0xff]  }
 0x325   : > { %8508 = vmatpush1.bf16.msra.mxu1 %v12490_v54  ;;  %v12586_v54 = vld [vmem:[%s13740_s22 + $0xbb4] ss:$8 sps:$4 sm:$0xff]  }
 0x326   : > { %9328 = vmatpush1.bf16.msra.mxu0 %v12493_v55  ;;  %8509 = vmatprep.subr.bf16.mxu1 %v12498_v56  ;;  %v12589_v55 = vld [vmem:[%s13740_s22 + $0x1fb4] ss:$8 sps:$4 sm:$0xff]   ;;  %v12584_v56 = vld [vmem:[%s13740_s22 + $0xbb0] ss:$8 sps:$4 sm:$0xff]  }
 0x327   : > { %9329 = vmatprep.subr.bf16.mxu0 %v12501_v57  ;;  %v12587_v57 = vld [vmem:[%s13740_s22 + $0x1fb0] ss:$8 sps:$4 sm:$0xff]  }
 0x329   : > { %8510 = vmatpush1.bf16.msra.mxu1 %v12496_v24  ;;  %v12592_v24 = vld [vmem:[%s13740_s22 + $0xbc4] ss:$8 sps:$4 sm:$0xff]  }
 0x32a   : > { %9330 = vmatpush1.bf16.msra.mxu0 %v12499_v59  ;;  %8511 = vmatprep.subr.bf16.mxu1 %v12504_v60  ;;  %v12595_v59 = vld [vmem:[%s13740_s22 + $0x1fc4] ss:$8 sps:$4 sm:$0xff]   ;;  %v12590_v60 = vld [vmem:[%s13740_s22 + $0xbc0] ss:$8 sps:$4 sm:$0xff]  }
 0x32b   : > { %9331 = vmatprep.subr.bf16.mxu0 %v12507_v61  ;;  %v12593_v61 = vld [vmem:[%s13740_s22 + $0x1fc0] ss:$8 sps:$4 sm:$0xff]  }
 0x32d   : > { %8512 = vmatpush1.bf16.msra.mxu1 %v12502_v62  ;;  %v12598_v62 = vld [vmem:[%s13740_s22 + $0xbd4] ss:$8 sps:$4 sm:$0xff]  }
 0x32e   : > { %9332 = vmatpush1.bf16.msra.mxu0 %v12505_v63  ;;  %8513 = vmatprep.subr.bf16.mxu1 %v12510_v40  ;;  %v12601_v63 = vld [vmem:[%s13740_s22 + $0x1fd4] ss:$8 sps:$4 sm:$0xff]   ;;  %v12596_v40 = vld [vmem:[%s13740_s22 + $0xbd0] ss:$8 sps:$4 sm:$0xff]  }
 0x32f   : > { %9333 = vmatprep.subr.bf16.mxu0 %v12513_v1  ;;  %v12599_v1 = vld [vmem:[%s13740_s22 + $0x1fd0] ss:$8 sps:$4 sm:$0xff]  }
 0x331   : > { %8514 = vmatpush1.bf16.msra.mxu1 %v12508_v2  ;;  %v12604_v2 = vld [vmem:[%s13740_s22 + $0xbe4] ss:$8 sps:$4 sm:$0xff]  }
 0x332   : > { %9334 = vmatpush1.bf16.msra.mxu0 %v12511_v3  ;;  %8524 = vmatprep.subr.bf16.mxu1 %v12518_v4  ;;  %v12607_v3 = vld [vmem:[%s13740_s22 + $0x1fe4] ss:$8 sps:$4 sm:$0xff]   ;;  %v12602_v4 = vld [vmem:[%s13740_s22 + $0xbe0] ss:$8 sps:$4 sm:$0xff]  }
 0x333   : > { %9344 = vmatprep.subr.bf16.mxu0 %v12523_v5  ;;  %v12605_v5 = vld [vmem:[%s13740_s22 + $0x1fe0] ss:$8 sps:$4 sm:$0xff]  }
 0x334   : > { %8516 = vmatmul.mubr.bf16.vlgmr.msra.gmra.mrb[0].mxu1 %v9874_v6  ;;  %v12610_v6 = vld [vmem:[%s13740_s22 + $0xbf4] ss:$8 sps:$4 sm:$0xff]  }
 0x335   : > { %9336 = vmatmul.mubr.bf16.vlgmr.msra.gmra.mrb[0].mxu0 %v9914_v58  ;;  %8525 = vmatpush1.bf16.msra.mxu1 %v12516_v8  ;;  %v12613_v58 = vld [vmem:[%s13740_s22 + $0x1ff4] ss:$8 sps:$4 sm:$0xff]   ;;  %v12608_v8 = vld [vmem:[%s13740_s22 + $0xbf0] ss:$8 sps:$4 sm:$0xff]  }
 0x336   : > { %9345 = vmatpush1.bf16.msra.mxu0 %v12521_v9  ;;  %8526 = vmatprep.subr.bf16.mxu1 %v12526_v10  ;;  %v12611_v9 = vld [vmem:[%s13740_s22 + $0x1ff0] ss:$8 sps:$4 sm:$0xff]   ;;  %v12618_v10 = vld [vmem:[%s13740_s22 + $0xc04] ss:$8 sps:$4 sm:$0xff]  }
 0x337   : > { %9346 = vmatprep.subr.bf16.mxu0 %v12529_v11  ;;  %8556 = vmatprep.mubr.bf16.mxu1 %v9877_v0  ;;  %v12623_v11 = vld [vmem:[%s13740_s22 + $0x2004] ss:$8 sps:$4 sm:$0xff]   ;;  %v9876_v0 = vcombine.low %v14572_v46, %v14572_v46 }
 0x338   : > { %9376 = vmatprep.mubr.bf16.mxu0 %v9917_v52  ;;  %v9916_v52 = vcombine.low %v14574_v7, %v14574_v7 }
 0x339   : > { %8527 = vmatpush1.bf16.msra.mxu1 %v12524_v12  ;;  %v14648_v12 = vld [vmem:[#allocation2 + $0x60] sm:$0xff] }
 0x33a   : > { %9347 = vmatpush1.bf16.msra.mxu0 %v12527_v13  ;;  %8528 = vmatprep.subr.bf16.mxu1 %v12532_v14  ;;  %v14650_v13 = vld [vmem:[#allocation2 + $0x100] sm:$0xff]  ;;  %v9879_v46 = vcombine.high %v14648_v12, %v14648_v12 }
 0x33b   : > { %9348 = vmatprep.subr.bf16.mxu0 %v12535_v15  ;;  %v12616_v14 = vld [vmem:[%s13740_s22 + $0xc00] ss:$8 sps:$4 sm:$0xff]   ;;  %v9919_v7 = vcombine.high %v14650_v13, %v14650_v13 }
 0x33c   : > { %v12621_v15 = vld [vmem:[%s13740_s22 + $0x2000] ss:$8 sps:$4 sm:$0xff]  }
 0x33d   : > { %8529 = vmatpush1.bf16.msra.mxu1 %v12530_v16  ;;  %v12626_v16 = vld [vmem:[%s13740_s22 + $0xc14] ss:$8 sps:$4 sm:$0xff]  }
 0x33e   : > { %9349 = vmatpush1.bf16.msra.mxu0 %v12533_v17  ;;  %8530 = vmatprep.subr.bf16.mxu1 %v12538_v19  ;;  %v12629_v17 = vld [vmem:[%s13740_s22 + $0x2014] ss:$8 sps:$4 sm:$0xff]   ;;  %v12624_v19 = vld [vmem:[%s13740_s22 + $0xc10] ss:$8 sps:$4 sm:$0xff]  }
 0x33f   : > { %9350 = vmatprep.subr.bf16.mxu0 %v12541_v21  ;;  %v12627_v21 = vld [vmem:[%s13740_s22 + $0x2010] ss:$8 sps:$4 sm:$0xff]  }
 0x341   : > { %8531 = vmatpush1.bf16.msra.mxu1 %v12536_v22  ;;  %v12632_v22 = vld [vmem:[%s13740_s22 + $0xc24] ss:$8 sps:$4 sm:$0xff]  }
 0x342   : > { %9351 = vmatpush1.bf16.msra.mxu0 %v12539_v23  ;;  %8532 = vmatprep.subr.bf16.mxu1 %v12544_v26  ;;  %v12635_v23 = vld [vmem:[%s13740_s22 + $0x2024] ss:$8 sps:$4 sm:$0xff]   ;;  %v12630_v26 = vld [vmem:[%s13740_s22 + $0xc20] ss:$8 sps:$4 sm:$0xff]  }
 0x343   : > { %9352 = vmatprep.subr.bf16.mxu0 %v12547_v27  ;;  %v12633_v27 = vld [vmem:[%s13740_s22 + $0x2020] ss:$8 sps:$4 sm:$0xff]  }
 0x345   : > { %8533 = vmatpush1.bf16.msra.mxu1 %v12542_v20  ;;  %v12638_v20 = vld [vmem:[%s13740_s22 + $0xc34] ss:$8 sps:$4 sm:$0xff]  }
 0x346   : > { %9353 = vmatpush1.bf16.msra.mxu0 %v12545_v28  ;;  %8534 = vmatprep.subr.bf16.mxu1 %v12550_v30  ;;  %v12641_v28 = vld [vmem:[%s13740_s22 + $0x2034] ss:$8 sps:$4 sm:$0xff]   ;;  %v12636_v30 = vld [vmem:[%s13740_s22 + $0xc30] ss:$8 sps:$4 sm:$0xff]  }
 0x347   : > { %9354 = vmatprep.subr.bf16.mxu0 %v12553_v31  ;;  %v12639_v31 = vld [vmem:[%s13740_s22 + $0x2030] ss:$8 sps:$4 sm:$0xff]  }
 0x349   : > { %8535 = vmatpush1.bf16.msra.mxu1 %v12548_v32  ;;  %v12644_v32 = vld [vmem:[%s13740_s22 + $0xc44] ss:$8 sps:$4 sm:$0xff]  }
 0x34a   : > { %9355 = vmatpush1.bf16.msra.mxu0 %v12551_v33  ;;  %8536 = vmatprep.subr.bf16.mxu1 %v12556_v34  ;;  %v12647_v33 = vld [vmem:[%s13740_s22 + $0x2044] ss:$8 sps:$4 sm:$0xff]   ;;  %v12642_v34 = vld [vmem:[%s13740_s22 + $0xc40] ss:$8 sps:$4 sm:$0xff]  }
 0x34b   : > { %9356 = vmatprep.subr.bf16.mxu0 %v12559_v35  ;;  %v12645_v35 = vld [vmem:[%s13740_s22 + $0x2040] ss:$8 sps:$4 sm:$0xff]  }
 0x34d   : > { %8537 = vmatpush1.bf16.msra.mxu1 %v12554_v36  ;;  %v12650_v36 = vld [vmem:[%s13740_s22 + $0xc54] ss:$8 sps:$4 sm:$0xff]  }
 0x34e   : > { %9357 = vmatpush1.bf16.msra.mxu0 %v12557_v37  ;;  %8538 = vmatprep.subr.bf16.mxu1 %v12562_v38  ;;  %v12653_v37 = vld [vmem:[%s13740_s22 + $0x2054] ss:$8 sps:$4 sm:$0xff]   ;;  %v12648_v38 = vld [vmem:[%s13740_s22 + $0xc50] ss:$8 sps:$4 sm:$0xff]  }
 0x34f   : > { %9358 = vmatprep.subr.bf16.mxu0 %v12565_v39  ;;  %v12651_v39 = vld [vmem:[%s13740_s22 + $0x2050] ss:$8 sps:$4 sm:$0xff]  }
 0x351   : > { %8539 = vmatpush1.bf16.msra.mxu1 %v12560_v29  ;;  %v12656_v29 = vld [vmem:[%s13740_s22 + $0xc64] ss:$8 sps:$4 sm:$0xff]  }
 0x352   : > { %9359 = vmatpush1.bf16.msra.mxu0 %v12563_v41  ;;  %8540 = vmatprep.subr.bf16.mxu1 %v12568_v42  ;;  %v12659_v41 = vld [vmem:[%s13740_s22 + $0x2064] ss:$8 sps:$4 sm:$0xff]   ;;  %v12654_v42 = vld [vmem:[%s13740_s22 + $0xc60] ss:$8 sps:$4 sm:$0xff]  }
 0x353   : > { %9360 = vmatprep.subr.bf16.mxu0 %v12571_v43  ;;  %v12657_v43 = vld [vmem:[%s13740_s22 + $0x2060] ss:$8 sps:$4 sm:$0xff]  }
 0x355   : > { %8541 = vmatpush1.bf16.msra.mxu1 %v12566_v44  ;;  %v12662_v44 = vld [vmem:[%s13740_s22 + $0xc74] ss:$8 sps:$4 sm:$0xff]  }
 0x356   : > { %9361 = vmatpush1.bf16.msra.mxu0 %v12569_v45  ;;  %8542 = vmatprep.subr.bf16.mxu1 %v12574_v25  ;;  %v12665_v45 = vld [vmem:[%s13740_s22 + $0x2074] ss:$8 sps:$4 sm:$0xff]   ;;  %v12660_v25 = vld [vmem:[%s13740_s22 + $0xc70] ss:$8 sps:$4 sm:$0xff]  }
 0x357   : > { %9362 = vmatprep.subr.bf16.mxu0 %v12577_v47  ;;  %v12663_v47 = vld [vmem:[%s13740_s22 + $0x2070] ss:$8 sps:$4 sm:$0xff]  }
 0x359   : > { %8543 = vmatpush1.bf16.msra.mxu1 %v12572_v48  ;;  %v12668_v48 = vld [vmem:[%s13740_s22 + $0xc84] ss:$8 sps:$4 sm:$0xff]  }
 0x35a   : > { %9363 = vmatpush1.bf16.msra.mxu0 %v12575_v49  ;;  %8544 = vmatprep.subr.bf16.mxu1 %v12580_v50  ;;  %v12671_v49 = vld [vmem:[%s13740_s22 + $0x2084] ss:$8 sps:$4 sm:$0xff]   ;;  %v12666_v50 = vld [vmem:[%s13740_s22 + $0xc80] ss:$8 sps:$4 sm:$0xff]  }
 0x35b   : > { %9364 = vmatprep.subr.bf16.mxu0 %v12583_v51  ;;  %v12669_v51 = vld [vmem:[%s13740_s22 + $0x2080] ss:$8 sps:$4 sm:$0xff]  }
 0x35d   : > { %8545 = vmatpush1.bf16.msra.mxu1 %v12578_v18  ;;  %v12674_v18 = vld [vmem:[%s13740_s22 + $0xc94] ss:$8 sps:$4 sm:$0xff]  }
 0x35e   : > { %9365 = vmatpush1.bf16.msra.mxu0 %v12581_v53  ;;  %8546 = vmatprep.subr.bf16.mxu1 %v12586_v54  ;;  %v12677_v53 = vld [vmem:[%s13740_s22 + $0x2094] ss:$8 sps:$4 sm:$0xff]   ;;  %v12672_v54 = vld [vmem:[%s13740_s22 + $0xc90] ss:$8 sps:$4 sm:$0xff]  }
 0x35f   : > { %9366 = vmatprep.subr.bf16.mxu0 %v12589_v55  ;;  %v12675_v55 = vld [vmem:[%s13740_s22 + $0x2090] ss:$8 sps:$4 sm:$0xff]  }
 0x361   : > { %8547 = vmatpush1.bf16.msra.mxu1 %v12584_v56  ;;  %v12680_v56 = vld [vmem:[%s13740_s22 + $0xca4] ss:$8 sps:$4 sm:$0xff]  }
 0x362   : > { %9367 = vmatpush1.bf16.msra.mxu0 %v12587_v57  ;;  %8548 = vmatprep.subr.bf16.mxu1 %v12592_v24  ;;  %v12683_v57 = vld [vmem:[%s13740_s22 + $0x20a4] ss:$8 sps:$4 sm:$0xff]   ;;  %v12678_v24 = vld [vmem:[%s13740_s22 + $0xca0] ss:$8 sps:$4 sm:$0xff]  }
 0x363   : > { %9368 = vmatprep.subr.bf16.mxu0 %v12595_v59  ;;  %v12681_v59 = vld [vmem:[%s13740_s22 + $0x20a0] ss:$8 sps:$4 sm:$0xff]  }
 0x365   : > { %8549 = vmatpush1.bf16.msra.mxu1 %v12590_v60  ;;  %v12686_v60 = vld [vmem:[%s13740_s22 + $0xcb4] ss:$8 sps:$4 sm:$0xff]  }
 0x366   : > { %9369 = vmatpush1.bf16.msra.mxu0 %v12593_v61  ;;  %8550 = vmatprep.subr.bf16.mxu1 %v12598_v62  ;;  %v12689_v61 = vld [vmem:[%s13740_s22 + $0x20b4] ss:$8 sps:$4 sm:$0xff]   ;;  %v12684_v62 = vld [vmem:[%s13740_s22 + $0xcb0] ss:$8 sps:$4 sm:$0xff]  }
 0x367   : > { %9370 = vmatprep.subr.bf16.mxu0 %v12601_v63  ;;  %v12687_v63 = vld [vmem:[%s13740_s22 + $0x20b0] ss:$8 sps:$4 sm:$0xff]  }
 0x369   : > { %8551 = vmatpush1.bf16.msra.mxu1 %v12596_v40  ;;  %v12692_v40 = vld [vmem:[%s13740_s22 + $0xcc4] ss:$8 sps:$4 sm:$0xff]  }
 0x36a   : > { %9371 = vmatpush1.bf16.msra.mxu0 %v12599_v1  ;;  %8552 = vmatprep.subr.bf16.mxu1 %v12604_v2  ;;  %v12695_v1 = vld [vmem:[%s13740_s22 + $0x20c4] ss:$8 sps:$4 sm:$0xff]   ;;  %v12690_v2 = vld [vmem:[%s13740_s22 + $0xcc0] ss:$8 sps:$4 sm:$0xff]  }
 0x36b   : > { %9372 = vmatprep.subr.bf16.mxu0 %v12607_v3  ;;  %v12693_v3 = vld [vmem:[%s13740_s22 + $0x20c0] ss:$8 sps:$4 sm:$0xff]  }
 0x36d   : > { %8553 = vmatpush1.bf16.msra.mxu1 %v12602_v4  ;;  %v12698_v4 = vld [vmem:[%s13740_s22 + $0xcd4] ss:$8 sps:$4 sm:$0xff]  }
 0x36e   : > { %9373 = vmatpush1.bf16.msra.mxu0 %v12605_v5  ;;  %8554 = vmatprep.subr.bf16.mxu1 %v12610_v6  ;;  %v12701_v5 = vld [vmem:[%s13740_s22 + $0x20d4] ss:$8 sps:$4 sm:$0xff]   ;;  %v12696_v6 = vld [vmem:[%s13740_s22 + $0xcd0] ss:$8 sps:$4 sm:$0xff]  }
 0x36f   : > { %9374 = vmatprep.subr.bf16.mxu0 %v12613_v58  ;;  %v12699_v58 = vld [vmem:[%s13740_s22 + $0x20d0] ss:$8 sps:$4 sm:$0xff]  }
 0x371   : > { %8555 = vmatpush1.bf16.msra.mxu1 %v12608_v8  ;;  %v12704_v8 = vld [vmem:[%s13740_s22 + $0xce4] ss:$8 sps:$4 sm:$0xff]  }
 0x372   : > { %9375 = vmatpush1.bf16.msra.mxu0 %v12611_v9  ;;  %8565 = vmatprep.subr.bf16.mxu1 %v12618_v10  ;;  %v12707_v9 = vld [vmem:[%s13740_s22 + $0x20e4] ss:$8 sps:$4 sm:$0xff]   ;;  %v12702_v10 = vld [vmem:[%s13740_s22 + $0xce0] ss:$8 sps:$4 sm:$0xff]  }
 0x373   : > { %9385 = vmatprep.subr.bf16.mxu0 %v12623_v11  ;;  %v12705_v11 = vld [vmem:[%s13740_s22 + $0x20e0] ss:$8 sps:$4 sm:$0xff]  }
 0x374   : > { %8557 = vmatmul.mubr.bf16.vlgmr.msra.gmra.mrb[0].mxu1 %v9876_v0  ;;  %v12710_v0 = vld [vmem:[%s13740_s22 + $0xcf4] ss:$8 sps:$4 sm:$0xff]  }
 0x375   : > { %9377 = vmatmul.mubr.bf16.vlgmr.msra.gmra.mrb[0].mxu0 %v9916_v52  ;;  %8566 = vmatpush1.bf16.msra.mxu1 %v12616_v14  ;;  %v12713_v52 = vld [vmem:[%s13740_s22 + $0x20f4] ss:$8 sps:$4 sm:$0xff]   ;;  %v12708_v14 = vld [vmem:[%s13740_s22 + $0xcf0] ss:$8 sps:$4 sm:$0xff]  }
 0x376   : > { %9386 = vmatpush1.bf16.msra.mxu0 %v12621_v15  ;;  %8567 = vmatprep.subr.bf16.mxu1 %v12626_v16  ;;  %v12711_v15 = vld [vmem:[%s13740_s22 + $0x20f0] ss:$8 sps:$4 sm:$0xff]   ;;  %v12718_v16 = vld [vmem:[%s13740_s22 + $0xd04] ss:$8 sps:$4 sm:$0xff]  }
 0x377   : > { %9387 = vmatprep.subr.bf16.mxu0 %v12629_v17  ;;  %8597 = vmatprep.mubr.bf16.mxu1 %v9879_v46  ;;  %v12723_v17 = vld [vmem:[%s13740_s22 + $0x2104] ss:$8 sps:$4 sm:$0xff]   ;;  %v9878_v46 = vcombine.low %v14648_v12, %v14648_v12 }
 0x378   : > { %9417 = vmatprep.mubr.bf16.mxu0 %v9919_v7  ;;  %v9918_v7 = vcombine.low %v14650_v13, %v14650_v13 }
 0x379   : > { %8568 = vmatpush1.bf16.msra.mxu1 %v12624_v19  ;;  %v14724_v19 = vld [vmem:[#allocation2 + $0x68] sm:$0xff] }
 0x37a   : > { %9388 = vmatpush1.bf16.msra.mxu0 %v12627_v21  ;;  %8569 = vmatprep.subr.bf16.mxu1 %v12632_v22  ;;  %v14726_v21 = vld [vmem:[#allocation2 + $0x108] sm:$0xff]  ;;  %v9881_v12 = vcombine.high %v14724_v19, %v14724_v19 }
 0x37b   : > { %9389 = vmatprep.subr.bf16.mxu0 %v12635_v23  ;;  %v12716_v22 = vld [vmem:[%s13740_s22 + $0xd00] ss:$8 sps:$4 sm:$0xff]   ;;  %v9921_v13 = vcombine.high %v14726_v21, %v14726_v21 }
 0x37c   : > { %v12721_v23 = vld [vmem:[%s13740_s22 + $0x2100] ss:$8 sps:$4 sm:$0xff]  }
 0x37d   : > { %8570 = vmatpush1.bf16.msra.mxu1 %v12630_v26  ;;  %v12726_v26 = vld [vmem:[%s13740_s22 + $0xd14] ss:$8 sps:$4 sm:$0xff]  }
 0x37e   : > { %9390 = vmatpush1.bf16.msra.mxu0 %v12633_v27  ;;  %8571 = vmatprep.subr.bf16.mxu1 %v12638_v20  ;;  %v12729_v27 = vld [vmem:[%s13740_s22 + $0x2114] ss:$8 sps:$4 sm:$0xff]   ;;  %v12724_v20 = vld [vmem:[%s13740_s22 + $0xd10] ss:$8 sps:$4 sm:$0xff]  }
 0x37f   : > { %9391 = vmatprep.subr.bf16.mxu0 %v12641_v28  ;;  %v12727_v28 = vld [vmem:[%s13740_s22 + $0x2110] ss:$8 sps:$4 sm:$0xff]  }
 0x381   : > { %8572 = vmatpush1.bf16.msra.mxu1 %v12636_v30  ;;  %v12732_v30 = vld [vmem:[%s13740_s22 + $0xd24] ss:$8 sps:$4 sm:$0xff]  }
 0x382   : > { %9392 = vmatpush1.bf16.msra.mxu0 %v12639_v31  ;;  %8573 = vmatprep.subr.bf16.mxu1 %v12644_v32  ;;  %v12735_v31 = vld [vmem:[%s13740_s22 + $0x2124] ss:$8 sps:$4 sm:$0xff]   ;;  %v12730_v32 = vld [vmem:[%s13740_s22 + $0xd20] ss:$8 sps:$4 sm:$0xff]  }
 0x383   : > { %9393 = vmatprep.subr.bf16.mxu0 %v12647_v33  ;;  %v12733_v33 = vld [vmem:[%s13740_s22 + $0x2120] ss:$8 sps:$4 sm:$0xff]  }
 0x385   : > { %8574 = vmatpush1.bf16.msra.mxu1 %v12642_v34  ;;  %v12738_v34 = vld [vmem:[%s13740_s22 + $0xd34] ss:$8 sps:$4 sm:$0xff]  }
 0x386   : > { %9394 = vmatpush1.bf16.msra.mxu0 %v12645_v35  ;;  %8575 = vmatprep.subr.bf16.mxu1 %v12650_v36  ;;  %v12741_v35 = vld [vmem:[%s13740_s22 + $0x2134] ss:$8 sps:$4 sm:$0xff]   ;;  %v12736_v36 = vld [vmem:[%s13740_s22 + $0xd30] ss:$8 sps:$4 sm:$0xff]  }
 0x387   : > { %9395 = vmatprep.subr.bf16.mxu0 %v12653_v37  ;;  %v12739_v37 = vld [vmem:[%s13740_s22 + $0x2130] ss:$8 sps:$4 sm:$0xff]  }
 0x389   : > { %8576 = vmatpush1.bf16.msra.mxu1 %v12648_v38  ;;  %v12744_v38 = vld [vmem:[%s13740_s22 + $0xd44] ss:$8 sps:$4 sm:$0xff]  }
 0x38a   : > { %9396 = vmatpush1.bf16.msra.mxu0 %v12651_v39  ;;  %8577 = vmatprep.subr.bf16.mxu1 %v12656_v29  ;;  %v12747_v39 = vld [vmem:[%s13740_s22 + $0x2144] ss:$8 sps:$4 sm:$0xff]   ;;  %v12742_v29 = vld [vmem:[%s13740_s22 + $0xd40] ss:$8 sps:$4 sm:$0xff]  }
 0x38b   : > { %9397 = vmatprep.subr.bf16.mxu0 %v12659_v41  ;;  %v12745_v41 = vld [vmem:[%s13740_s22 + $0x2140] ss:$8 sps:$4 sm:$0xff]  }
 0x38d   : > { %8578 = vmatpush1.bf16.msra.mxu1 %v12654_v42  ;;  %v12750_v42 = vld [vmem:[%s13740_s22 + $0xd54] ss:$8 sps:$4 sm:$0xff]  }
 0x38e   : > { %9398 = vmatpush1.bf16.msra.mxu0 %v12657_v43  ;;  %8579 = vmatprep.subr.bf16.mxu1 %v12662_v44  ;;  %v12753_v43 = vld [vmem:[%s13740_s22 + $0x2154] ss:$8 sps:$4 sm:$0xff]   ;;  %v12748_v44 = vld [vmem:[%s13740_s22 + $0xd50] ss:$8 sps:$4 sm:$0xff]  }
 0x38f   : > { %9399 = vmatprep.subr.bf16.mxu0 %v12665_v45  ;;  %v12751_v45 = vld [vmem:[%s13740_s22 + $0x2150] ss:$8 sps:$4 sm:$0xff]  }
 0x391   : > { %8580 = vmatpush1.bf16.msra.mxu1 %v12660_v25  ;;  %v12756_v25 = vld [vmem:[%s13740_s22 + $0xd64] ss:$8 sps:$4 sm:$0xff]  }
 0x392   : > { %9400 = vmatpush1.bf16.msra.mxu0 %v12663_v47  ;;  %8581 = vmatprep.subr.bf16.mxu1 %v12668_v48  ;;  %v12759_v47 = vld [vmem:[%s13740_s22 + $0x2164] ss:$8 sps:$4 sm:$0xff]   ;;  %v12754_v48 = vld [vmem:[%s13740_s22 + $0xd60] ss:$8 sps:$4 sm:$0xff]  }
 0x393   : > { %9401 = vmatprep.subr.bf16.mxu0 %v12671_v49  ;;  %v12757_v49 = vld [vmem:[%s13740_s22 + $0x2160] ss:$8 sps:$4 sm:$0xff]  }
 0x395   : > { %8582 = vmatpush1.bf16.msra.mxu1 %v12666_v50  ;;  %v12762_v50 = vld [vmem:[%s13740_s22 + $0xd74] ss:$8 sps:$4 sm:$0xff]  }
 0x396   : > { %9402 = vmatpush1.bf16.msra.mxu0 %v12669_v51  ;;  %8583 = vmatprep.subr.bf16.mxu1 %v12674_v18  ;;  %v12765_v51 = vld [vmem:[%s13740_s22 + $0x2174] ss:$8 sps:$4 sm:$0xff]   ;;  %v12760_v18 = vld [vmem:[%s13740_s22 + $0xd70] ss:$8 sps:$4 sm:$0xff]  }
 0x397   : > { %9403 = vmatprep.subr.bf16.mxu0 %v12677_v53  ;;  %v12763_v53 = vld [vmem:[%s13740_s22 + $0x2170] ss:$8 sps:$4 sm:$0xff]  }
 0x399   : > { %8584 = vmatpush1.bf16.msra.mxu1 %v12672_v54  ;;  %v12768_v54 = vld [vmem:[%s13740_s22 + $0xd84] ss:$8 sps:$4 sm:$0xff]  }
 0x39a   : > { %9404 = vmatpush1.bf16.msra.mxu0 %v12675_v55  ;;  %8585 = vmatprep.subr.bf16.mxu1 %v12680_v56  ;;  %v12771_v55 = vld [vmem:[%s13740_s22 + $0x2184] ss:$8 sps:$4 sm:$0xff]   ;;  %v12766_v56 = vld [vmem:[%s13740_s22 + $0xd80] ss:$8 sps:$4 sm:$0xff]  }
 0x39b   : > { %9405 = vmatprep.subr.bf16.mxu0 %v12683_v57  ;;  %v12769_v57 = vld [vmem:[%s13740_s22 + $0x2180] ss:$8 sps:$4 sm:$0xff]  }
 0x39d   : > { %8586 = vmatpush1.bf16.msra.mxu1 %v12678_v24  ;;  %v12774_v24 = vld [vmem:[%s13740_s22 + $0xd94] ss:$8 sps:$4 sm:$0xff]  }
 0x39e   : > { %9406 = vmatpush1.bf16.msra.mxu0 %v12681_v59  ;;  %8587 = vmatprep.subr.bf16.mxu1 %v12686_v60  ;;  %v12777_v59 = vld [vmem:[%s13740_s22 + $0x2194] ss:$8 sps:$4 sm:$0xff]   ;;  %v12772_v60 = vld [vmem:[%s13740_s22 + $0xd90] ss:$8 sps:$4 sm:$0xff]  }
 0x39f   : > { %9407 = vmatprep.subr.bf16.mxu0 %v12689_v61  ;;  %v12775_v61 = vld [vmem:[%s13740_s22 + $0x2190] ss:$8 sps:$4 sm:$0xff]  }
 0x3a1   : > { %8588 = vmatpush1.bf16.msra.mxu1 %v12684_v62  ;;  %v12780_v62 = vld [vmem:[%s13740_s22 + $0xda4] ss:$8 sps:$4 sm:$0xff]  }
 0x3a2   : > { %9408 = vmatpush1.bf16.msra.mxu0 %v12687_v63  ;;  %8589 = vmatprep.subr.bf16.mxu1 %v12692_v40  ;;  %v12783_v63 = vld [vmem:[%s13740_s22 + $0x21a4] ss:$8 sps:$4 sm:$0xff]   ;;  %v12778_v40 = vld [vmem:[%s13740_s22 + $0xda0] ss:$8 sps:$4 sm:$0xff]  }
 0x3a3   : > { %9409 = vmatprep.subr.bf16.mxu0 %v12695_v1  ;;  %v12781_v1 = vld [vmem:[%s13740_s22 + $0x21a0] ss:$8 sps:$4 sm:$0xff]  }
 0x3a5   : > { %8590 = vmatpush1.bf16.msra.mxu1 %v12690_v2  ;;  %v12786_v2 = vld [vmem:[%s13740_s22 + $0xdb4] ss:$8 sps:$4 sm:$0xff]  }
 0x3a6   : > { %9410 = vmatpush1.bf16.msra.mxu0 %v12693_v3  ;;  %8591 = vmatprep.subr.bf16.mxu1 %v12698_v4  ;;  %v12789_v3 = vld [vmem:[%s13740_s22 + $0x21b4] ss:$8 sps:$4 sm:$0xff]   ;;  %v12784_v4 = vld [vmem:[%s13740_s22 + $0xdb0] ss:$8 sps:$4 sm:$0xff]  }
 0x3a7   : > { %9411 = vmatprep.subr.bf16.mxu0 %v12701_v5  ;;  %v12787_v5 = vld [vmem:[%s13740_s22 + $0x21b0] ss:$8 sps:$4 sm:$0xff]  }
 0x3a9   : > { %8592 = vmatpush1.bf16.msra.mxu1 %v12696_v6  ;;  %v12792_v6 = vld [vmem:[%s13740_s22 + $0xdc4] ss:$8 sps:$4 sm:$0xff]  }
 0x3aa   : > { %9412 = vmatpush1.bf16.msra.mxu0 %v12699_v58  ;;  %8593 = vmatprep.subr.bf16.mxu1 %v12704_v8  ;;  %v12795_v58 = vld [vmem:[%s13740_s22 + $0x21c4] ss:$8 sps:$4 sm:$0xff]   ;;  %v12790_v8 = vld [vmem:[%s13740_s22 + $0xdc0] ss:$8 sps:$4 sm:$0xff]  }
 0x3ab   : > { %9413 = vmatprep.subr.bf16.mxu0 %v12707_v9  ;;  %v12793_v9 = vld [vmem:[%s13740_s22 + $0x21c0] ss:$8 sps:$4 sm:$0xff]  }
 0x3ad   : > { %8594 = vmatpush1.bf16.msra.mxu1 %v12702_v10  ;;  %v12798_v10 = vld [vmem:[%s13740_s22 + $0xdd4] ss:$8 sps:$4 sm:$0xff]  }
 0x3ae   : > { %9414 = vmatpush1.bf16.msra.mxu0 %v12705_v11  ;;  %8595 = vmatprep.subr.bf16.mxu1 %v12710_v0  ;;  %v12801_v11 = vld [vmem:[%s13740_s22 + $0x21d4] ss:$8 sps:$4 sm:$0xff]   ;;  %v12796_v0 = vld [vmem:[%s13740_s22 + $0xdd0] ss:$8 sps:$4 sm:$0xff]  }
 0x3af   : > { %9415 = vmatprep.subr.bf16.mxu0 %v12713_v52  ;;  %v12799_v52 = vld [vmem:[%s13740_s22 + $0x21d0] ss:$8 sps:$4 sm:$0xff]  }
 0x3b1   : > { %8596 = vmatpush1.bf16.msra.mxu1 %v12708_v14  ;;  %v12804_v14 = vld [vmem:[%s13740_s22 + $0xde4] ss:$8 sps:$4 sm:$0xff]  }
 0x3b2   : > { %9416 = vmatpush1.bf16.msra.mxu0 %v12711_v15  ;;  %8606 = vmatprep.subr.bf16.mxu1 %v12718_v16  ;;  %v12807_v15 = vld [vmem:[%s13740_s22 + $0x21e4] ss:$8 sps:$4 sm:$0xff]   ;;  %v12802_v16 = vld [vmem:[%s13740_s22 + $0xde0] ss:$8 sps:$4 sm:$0xff]  }
 0x3b3   : > { %9426 = vmatprep.subr.bf16.mxu0 %v12723_v17  ;;  %v12805_v17 = vld [vmem:[%s13740_s22 + $0x21e0] ss:$8 sps:$4 sm:$0xff]  }
 0x3b4   : > { %8598 = vmatmul.mubr.bf16.vlgmr.msra.gmra.mrb[0].mxu1 %v9878_v46  ;;  %v12810_v46 = vld [vmem:[%s13740_s22 + $0xdf4] ss:$8 sps:$4 sm:$0xff]  }
 0x3b5   : > { %9418 = vmatmul.mubr.bf16.vlgmr.msra.gmra.mrb[0].mxu0 %v9918_v7  ;;  %8607 = vmatpush1.bf16.msra.mxu1 %v12716_v22  ;;  %v12813_v7 = vld [vmem:[%s13740_s22 + $0x21f4] ss:$8 sps:$4 sm:$0xff]   ;;  %v12808_v22 = vld [vmem:[%s13740_s22 + $0xdf0] ss:$8 sps:$4 sm:$0xff]  }
 0x3b6   : > { %9427 = vmatpush1.bf16.msra.mxu0 %v12721_v23  ;;  %8608 = vmatprep.subr.bf16.mxu1 %v12726_v26  ;;  %v12811_v23 = vld [vmem:[%s13740_s22 + $0x21f0] ss:$8 sps:$4 sm:$0xff]   ;;  %v12818_v26 = vld [vmem:[%s13740_s22 + $0xe04] ss:$8 sps:$4 sm:$0xff]  }
 0x3b7   : > { %9428 = vmatprep.subr.bf16.mxu0 %v12729_v27  ;;  %8638 = vmatprep.mubr.bf16.mxu1 %v9881_v12  ;;  %v12823_v27 = vld [vmem:[%s13740_s22 + $0x2204] ss:$8 sps:$4 sm:$0xff]   ;;  %v9880_v12 = vcombine.low %v14724_v19, %v14724_v19 }
 0x3b8   : > { %9458 = vmatprep.mubr.bf16.mxu0 %v9921_v13  ;;  %v9920_v13 = vcombine.low %v14726_v21, %v14726_v21 }
 0x3b9   : > { %8609 = vmatpush1.bf16.msra.mxu1 %v12724_v20  ;;  %v14800_v20 = vld [vmem:[#allocation2 + $0x70] sm:$0xff] }
 0x3ba   : > { %9429 = vmatpush1.bf16.msra.mxu0 %v12727_v28  ;;  %8610 = vmatprep.subr.bf16.mxu1 %v12732_v30  ;;  %v14802_v28 = vld [vmem:[#allocation2 + $0x110] sm:$0xff]  ;;  %v9883_v19 = vcombine.high %v14800_v20, %v14800_v20 }
 0x3bb   : > { %9430 = vmatprep.subr.bf16.mxu0 %v12735_v31  ;;  %v12816_v30 = vld [vmem:[%s13740_s22 + $0xe00] ss:$8 sps:$4 sm:$0xff]   ;;  %v9923_v21 = vcombine.high %v14802_v28, %v14802_v28 }
 0x3bc   : > { %v12821_v31 = vld [vmem:[%s13740_s22 + $0x2200] ss:$8 sps:$4 sm:$0xff]  }
 0x3bd   : > { %8611 = vmatpush1.bf16.msra.mxu1 %v12730_v32  ;;  %v12826_v32 = vld [vmem:[%s13740_s22 + $0xe14] ss:$8 sps:$4 sm:$0xff]  }
 0x3be   : > { %9431 = vmatpush1.bf16.msra.mxu0 %v12733_v33  ;;  %8612 = vmatprep.subr.bf16.mxu1 %v12738_v34  ;;  %v12829_v33 = vld [vmem:[%s13740_s22 + $0x2214] ss:$8 sps:$4 sm:$0xff]   ;;  %v12824_v34 = vld [vmem:[%s13740_s22 + $0xe10] ss:$8 sps:$4 sm:$0xff]  }
 0x3bf   : > { %9432 = vmatprep.subr.bf16.mxu0 %v12741_v35  ;;  %v12827_v35 = vld [vmem:[%s13740_s22 + $0x2210] ss:$8 sps:$4 sm:$0xff]  }
 0x3c1   : > { %8613 = vmatpush1.bf16.msra.mxu1 %v12736_v36  ;;  %v12832_v36 = vld [vmem:[%s13740_s22 + $0xe24] ss:$8 sps:$4 sm:$0xff]  }
 0x3c2   : > { %9433 = vmatpush1.bf16.msra.mxu0 %v12739_v37  ;;  %8614 = vmatprep.subr.bf16.mxu1 %v12744_v38  ;;  %v12835_v37 = vld [vmem:[%s13740_s22 + $0x2224] ss:$8 sps:$4 sm:$0xff]   ;;  %v12830_v38 = vld [vmem:[%s13740_s22 + $0xe20] ss:$8 sps:$4 sm:$0xff]  }
 0x3c3   : > { %9434 = vmatprep.subr.bf16.mxu0 %v12747_v39  ;;  %v12833_v39 = vld [vmem:[%s13740_s22 + $0x2220] ss:$8 sps:$4 sm:$0xff]  }
 0x3c5   : > { %8615 = vmatpush1.bf16.msra.mxu1 %v12742_v29  ;;  %v12838_v29 = vld [vmem:[%s13740_s22 + $0xe34] ss:$8 sps:$4 sm:$0xff]  }
 0x3c6   : > { %9435 = vmatpush1.bf16.msra.mxu0 %v12745_v41  ;;  %8616 = vmatprep.subr.bf16.mxu1 %v12750_v42  ;;  %v12841_v41 = vld [vmem:[%s13740_s22 + $0x2234] ss:$8 sps:$4 sm:$0xff]   ;;  %v12836_v42 = vld [vmem:[%s13740_s22 + $0xe30] ss:$8 sps:$4 sm:$0xff]  }
 0x3c7   : > { %9436 = vmatprep.subr.bf16.mxu0 %v12753_v43  ;;  %v12839_v43 = vld [vmem:[%s13740_s22 + $0x2230] ss:$8 sps:$4 sm:$0xff]  }
 0x3c9   : > { %8617 = vmatpush1.bf16.msra.mxu1 %v12748_v44  ;;  %v12844_v44 = vld [vmem:[%s13740_s22 + $0xe44] ss:$8 sps:$4 sm:$0xff]  }
 0x3ca   : > { %9437 = vmatpush1.bf16.msra.mxu0 %v12751_v45  ;;  %8618 = vmatprep.subr.bf16.mxu1 %v12756_v25  ;;  %v12847_v45 = vld [vmem:[%s13740_s22 + $0x2244] ss:$8 sps:$4 sm:$0xff]   ;;  %v12842_v25 = vld [vmem:[%s13740_s22 + $0xe40] ss:$8 sps:$4 sm:$0xff]  }
 0x3cb   : > { %9438 = vmatprep.subr.bf16.mxu0 %v12759_v47  ;;  %v12845_v47 = vld [vmem:[%s13740_s22 + $0x2240] ss:$8 sps:$4 sm:$0xff]  }
 0x3cd   : > { %8619 = vmatpush1.bf16.msra.mxu1 %v12754_v48  ;;  %v12850_v48 = vld [vmem:[%s13740_s22 + $0xe54] ss:$8 sps:$4 sm:$0xff]  }
 0x3ce   : > { %9439 = vmatpush1.bf16.msra.mxu0 %v12757_v49  ;;  %8620 = vmatprep.subr.bf16.mxu1 %v12762_v50  ;;  %v12853_v49 = vld [vmem:[%s13740_s22 + $0x2254] ss:$8 sps:$4 sm:$0xff]   ;;  %v12848_v50 = vld [vmem:[%s13740_s22 + $0xe50] ss:$8 sps:$4 sm:$0xff]  }
 0x3cf   : > { %9440 = vmatprep.subr.bf16.mxu0 %v12765_v51  ;;  %v12851_v51 = vld [vmem:[%s13740_s22 + $0x2250] ss:$8 sps:$4 sm:$0xff]  }
 0x3d1   : > { %8621 = vmatpush1.bf16.msra.mxu1 %v12760_v18  ;;  %v12856_v18 = vld [vmem:[%s13740_s22 + $0xe64] ss:$8 sps:$4 sm:$0xff]  }
 0x3d2   : > { %9441 = vmatpush1.bf16.msra.mxu0 %v12763_v53  ;;  %8622 = vmatprep.subr.bf16.mxu1 %v12768_v54  ;;  %v12859_v53 = vld [vmem:[%s13740_s22 + $0x2264] ss:$8 sps:$4 sm:$0xff]   ;;  %v12854_v54 = vld [vmem:[%s13740_s22 + $0xe60] ss:$8 sps:$4 sm:$0xff]  }
 0x3d3   : > { %9442 = vmatprep.subr.bf16.mxu0 %v12771_v55  ;;  %v12857_v55 = vld [vmem:[%s13740_s22 + $0x2260] ss:$8 sps:$4 sm:$0xff]  }
 0x3d5   : > { %8623 = vmatpush1.bf16.msra.mxu1 %v12766_v56  ;;  %v12862_v56 = vld [vmem:[%s13740_s22 + $0xe74] ss:$8 sps:$4 sm:$0xff]  }
 0x3d6   : > { %9443 = vmatpush1.bf16.msra.mxu0 %v12769_v57  ;;  %8624 = vmatprep.subr.bf16.mxu1 %v12774_v24  ;;  %v12865_v57 = vld [vmem:[%s13740_s22 + $0x2274] ss:$8 sps:$4 sm:$0xff]   ;;  %v12860_v24 = vld [vmem:[%s13740_s22 + $0xe70] ss:$8 sps:$4 sm:$0xff]  }
 0x3d7   : > { %9444 = vmatprep.subr.bf16.mxu0 %v12777_v59  ;;  %v12863_v59 = vld [vmem:[%s13740_s22 + $0x2270] ss:$8 sps:$4 sm:$0xff]  }
 0x3d9   : > { %8625 = vmatpush1.bf16.msra.mxu1 %v12772_v60  ;;  %v12868_v60 = vld [vmem:[%s13740_s22 + $0xe84] ss:$8 sps:$4 sm:$0xff]  }
 0x3da   : > { %9445 = vmatpush1.bf16.msra.mxu0 %v12775_v61  ;;  %8626 = vmatprep.subr.bf16.mxu1 %v12780_v62  ;;  %v12871_v61 = vld [vmem:[%s13740_s22 + $0x2284] ss:$8 sps:$4 sm:$0xff]   ;;  %v12866_v62 = vld [vmem:[%s13740_s22 + $0xe80] ss:$8 sps:$4 sm:$0xff]  }
 0x3db   : > { %9446 = vmatprep.subr.bf16.mxu0 %v12783_v63  ;;  %v12869_v63 = vld [vmem:[%s13740_s22 + $0x2280] ss:$8 sps:$4 sm:$0xff]  }
 0x3dd   : > { %8627 = vmatpush1.bf16.msra.mxu1 %v12778_v40  ;;  %v12874_v40 = vld [vmem:[%s13740_s22 + $0xe94] ss:$8 sps:$4 sm:$0xff]  }
 0x3de   : > { %9447 = vmatpush1.bf16.msra.mxu0 %v12781_v1  ;;  %8628 = vmatprep.subr.bf16.mxu1 %v12786_v2  ;;  %v12877_v1 = vld [vmem:[%s13740_s22 + $0x2294] ss:$8 sps:$4 sm:$0xff]   ;;  %v12872_v2 = vld [vmem:[%s13740_s22 + $0xe90] ss:$8 sps:$4 sm:$0xff]  }
 0x3df   : > { %9448 = vmatprep.subr.bf16.mxu0 %v12789_v3  ;;  %v12875_v3 = vld [vmem:[%s13740_s22 + $0x2290] ss:$8 sps:$4 sm:$0xff]  }
 0x3e1   : > { %8629 = vmatpush1.bf16.msra.mxu1 %v12784_v4  ;;  %v12880_v4 = vld [vmem:[%s13740_s22 + $0xea4] ss:$8 sps:$4 sm:$0xff]  }
 0x3e2   : > { %9449 = vmatpush1.bf16.msra.mxu0 %v12787_v5  ;;  %8630 = vmatprep.subr.bf16.mxu1 %v12792_v6  ;;  %v12883_v5 = vld [vmem:[%s13740_s22 + $0x22a4] ss:$8 sps:$4 sm:$0xff]   ;;  %v12878_v6 = vld [vmem:[%s13740_s22 + $0xea0] ss:$8 sps:$4 sm:$0xff]  }
 0x3e3   : > { %9450 = vmatprep.subr.bf16.mxu0 %v12795_v58  ;;  %v12881_v58 = vld [vmem:[%s13740_s22 + $0x22a0] ss:$8 sps:$4 sm:$0xff]  }
 0x3e5   : > { %8631 = vmatpush1.bf16.msra.mxu1 %v12790_v8  ;;  %v12886_v8 = vld [vmem:[%s13740_s22 + $0xeb4] ss:$8 sps:$4 sm:$0xff]  }
 0x3e6   : > { %9451 = vmatpush1.bf16.msra.mxu0 %v12793_v9  ;;  %8632 = vmatprep.subr.bf16.mxu1 %v12798_v10  ;;  %v12889_v9 = vld [vmem:[%s13740_s22 + $0x22b4] ss:$8 sps:$4 sm:$0xff]   ;;  %v12884_v10 = vld [vmem:[%s13740_s22 + $0xeb0] ss:$8 sps:$4 sm:$0xff]  }
 0x3e7   : > { %9452 = vmatprep.subr.bf16.mxu0 %v12801_v11  ;;  %v12887_v11 = vld [vmem:[%s13740_s22 + $0x22b0] ss:$8 sps:$4 sm:$0xff]  }
 0x3e9   : > { %8633 = vmatpush1.bf16.msra.mxu1 %v12796_v0  ;;  %v12892_v0 = vld [vmem:[%s13740_s22 + $0xec4] ss:$8 sps:$4 sm:$0xff]  }
 0x3ea   : > { %9453 = vmatpush1.bf16.msra.mxu0 %v12799_v52  ;;  %8634 = vmatprep.subr.bf16.mxu1 %v12804_v14  ;;  %v12895_v52 = vld [vmem:[%s13740_s22 + $0x22c4] ss:$8 sps:$4 sm:$0xff]   ;;  %v12890_v14 = vld [vmem:[%s13740_s22 + $0xec0] ss:$8 sps:$4 sm:$0xff]  }
 0x3eb   : > { %9454 = vmatprep.subr.bf16.mxu0 %v12807_v15  ;;  %v12893_v15 = vld [vmem:[%s13740_s22 + $0x22c0] ss:$8 sps:$4 sm:$0xff]  }
 0x3ed   : > { %8635 = vmatpush1.bf16.msra.mxu1 %v12802_v16  ;;  %v12898_v16 = vld [vmem:[%s13740_s22 + $0xed4] ss:$8 sps:$4 sm:$0xff]  }
 0x3ee   : > { %9455 = vmatpush1.bf16.msra.mxu0 %v12805_v17  ;;  %8636 = vmatprep.subr.bf16.mxu1 %v12810_v46  ;;  %v12901_v17 = vld [vmem:[%s13740_s22 + $0x22d4] ss:$8 sps:$4 sm:$0xff]   ;;  %v12896_v46 = vld [vmem:[%s13740_s22 + $0xed0] ss:$8 sps:$4 sm:$0xff]  }
 0x3ef   : > { %9456 = vmatprep.subr.bf16.mxu0 %v12813_v7  ;;  %v12899_v7 = vld [vmem:[%s13740_s22 + $0x22d0] ss:$8 sps:$4 sm:$0xff]  }
 0x3f1   : > { %8637 = vmatpush1.bf16.msra.mxu1 %v12808_v22  ;;  %v12904_v22 = vld [vmem:[%s13740_s22 + $0xee4] ss:$8 sps:$4 sm:$0xff]  }
 0x3f2   : > { %9457 = vmatpush1.bf16.msra.mxu0 %v12811_v23  ;;  %8647 = vmatprep.subr.bf16.mxu1 %v12818_v26  ;;  %v12907_v23 = vld [vmem:[%s13740_s22 + $0x22e4] ss:$8 sps:$4 sm:$0xff]   ;;  %v12902_v26 = vld [vmem:[%s13740_s22 + $0xee0] ss:$8 sps:$4 sm:$0xff]  }
 0x3f3   : > { %9467 = vmatprep.subr.bf16.mxu0 %v12823_v27  ;;  %v12905_v27 = vld [vmem:[%s13740_s22 + $0x22e0] ss:$8 sps:$4 sm:$0xff]  }
 0x3f4   : > { %8639 = vmatmul.mubr.bf16.vlgmr.msra.gmra.mrb[0].mxu1 %v9880_v12  ;;  %v12910_v12 = vld [vmem:[%s13740_s22 + $0xef4] ss:$8 sps:$4 sm:$0xff]  }
 0x3f5   : > { %9459 = vmatmul.mubr.bf16.vlgmr.msra.gmra.mrb[0].mxu0 %v9920_v13  ;;  %8648 = vmatpush1.bf16.msra.mxu1 %v12816_v30  ;;  %v12913_v13 = vld [vmem:[%s13740_s22 + $0x22f4] ss:$8 sps:$4 sm:$0xff]   ;;  %v12908_v30 = vld [vmem:[%s13740_s22 + $0xef0] ss:$8 sps:$4 sm:$0xff]  }
 0x3f6   : > { %9468 = vmatpush1.bf16.msra.mxu0 %v12821_v31  ;;  %8649 = vmatprep.subr.bf16.mxu1 %v12826_v32  ;;  %v12911_v31 = vld [vmem:[%s13740_s22 + $0x22f0] ss:$8 sps:$4 sm:$0xff]   ;;  %v12918_v32 = vld [vmem:[%s13740_s22 + $0xf04] ss:$8 sps:$4 sm:$0xff]  }
 0x3f7   : > { %9469 = vmatprep.subr.bf16.mxu0 %v12829_v33  ;;  %8679 = vmatprep.mubr.bf16.mxu1 %v9883_v19  ;;  %v12923_v33 = vld [vmem:[%s13740_s22 + $0x2304] ss:$8 sps:$4 sm:$0xff]   ;;  %v9882_v19 = vcombine.low %v14800_v20, %v14800_v20 }
 0x3f8   : > { %9499 = vmatprep.mubr.bf16.mxu0 %v9923_v21  ;;  %v9922_v21 = vcombine.low %v14802_v28, %v14802_v28 }
 0x3f9   : > { %8650 = vmatpush1.bf16.msra.mxu1 %v12824_v34  ;;  %v14876_v34 = vld [vmem:[#allocation2 + $0x78] sm:$0xff] }
 0x3fa   : > { %9470 = vmatpush1.bf16.msra.mxu0 %v12827_v35  ;;  %8651 = vmatprep.subr.bf16.mxu1 %v12832_v36  ;;  %v14878_v35 = vld [vmem:[#allocation2 + $0x118] sm:$0xff]  ;;  %v9885_v20 = vcombine.high %v14876_v34, %v14876_v34 }
 0x3fb   : > { %9471 = vmatprep.subr.bf16.mxu0 %v12835_v37  ;;  %v12916_v36 = vld [vmem:[%s13740_s22 + $0xf00] ss:$8 sps:$4 sm:$0xff]   ;;  %v9925_v28 = vcombine.high %v14878_v35, %v14878_v35 }
 0x3fc   : > { %v12921_v37 = vld [vmem:[%s13740_s22 + $0x2300] ss:$8 sps:$4 sm:$0xff]  }
 0x3fd   : > { %8652 = vmatpush1.bf16.msra.mxu1 %v12830_v38  ;;  %v12926_v38 = vld [vmem:[%s13740_s22 + $0xf14] ss:$8 sps:$4 sm:$0xff]  }
 0x3fe   : > { %9472 = vmatpush1.bf16.msra.mxu0 %v12833_v39  ;;  %8653 = vmatprep.subr.bf16.mxu1 %v12838_v29  ;;  %v12929_v39 = vld [vmem:[%s13740_s22 + $0x2314] ss:$8 sps:$4 sm:$0xff]   ;;  %v12924_v29 = vld [vmem:[%s13740_s22 + $0xf10] ss:$8 sps:$4 sm:$0xff]  }
 0x3ff   : > { %9473 = vmatprep.subr.bf16.mxu0 %v12841_v41  ;;  %v12927_v41 = vld [vmem:[%s13740_s22 + $0x2310] ss:$8 sps:$4 sm:$0xff]  }
 0x401   : > { %8654 = vmatpush1.bf16.msra.mxu1 %v12836_v42  ;;  %v12932_v42 = vld [vmem:[%s13740_s22 + $0xf24] ss:$8 sps:$4 sm:$0xff]  }
 0x402   : > { %9474 = vmatpush1.bf16.msra.mxu0 %v12839_v43  ;;  %8655 = vmatprep.subr.bf16.mxu1 %v12844_v44  ;;  %v12935_v43 = vld [vmem:[%s13740_s22 + $0x2324] ss:$8 sps:$4 sm:$0xff]   ;;  %v12930_v44 = vld [vmem:[%s13740_s22 + $0xf20] ss:$8 sps:$4 sm:$0xff]  }
 0x403   : > { %9475 = vmatprep.subr.bf16.mxu0 %v12847_v45  ;;  %v12933_v45 = vld [vmem:[%s13740_s22 + $0x2320] ss:$8 sps:$4 sm:$0xff]  }
 0x405   : > { %8656 = vmatpush1.bf16.msra.mxu1 %v12842_v25  ;;  %v12938_v25 = vld [vmem:[%s13740_s22 + $0xf34] ss:$8 sps:$4 sm:$0xff]  }
 0x406   : > { %9476 = vmatpush1.bf16.msra.mxu0 %v12845_v47  ;;  %8657 = vmatprep.subr.bf16.mxu1 %v12850_v48  ;;  %v12941_v47 = vld [vmem:[%s13740_s22 + $0x2334] ss:$8 sps:$4 sm:$0xff]   ;;  %v12936_v48 = vld [vmem:[%s13740_s22 + $0xf30] ss:$8 sps:$4 sm:$0xff]  }
 0x407   : > { %9477 = vmatprep.subr.bf16.mxu0 %v12853_v49  ;;  %v12939_v49 = vld [vmem:[%s13740_s22 + $0x2330] ss:$8 sps:$4 sm:$0xff]  }
 0x409   : > { %8658 = vmatpush1.bf16.msra.mxu1 %v12848_v50  ;;  %v12944_v50 = vld [vmem:[%s13740_s22 + $0xf44] ss:$8 sps:$4 sm:$0xff]  }
 0x40a   : > { %9478 = vmatpush1.bf16.msra.mxu0 %v12851_v51  ;;  %8659 = vmatprep.subr.bf16.mxu1 %v12856_v18  ;;  %v12947_v51 = vld [vmem:[%s13740_s22 + $0x2344] ss:$8 sps:$4 sm:$0xff]   ;;  %v12942_v18 = vld [vmem:[%s13740_s22 + $0xf40] ss:$8 sps:$4 sm:$0xff]  }
 0x40b   : > { %9479 = vmatprep.subr.bf16.mxu0 %v12859_v53  ;;  %v12945_v53 = vld [vmem:[%s13740_s22 + $0x2340] ss:$8 sps:$4 sm:$0xff]  }
 0x40d   : > { %8660 = vmatpush1.bf16.msra.mxu1 %v12854_v54  ;;  %v12950_v54 = vld [vmem:[%s13740_s22 + $0xf54] ss:$8 sps:$4 sm:$0xff]  }
 0x40e   : > { %9480 = vmatpush1.bf16.msra.mxu0 %v12857_v55  ;;  %8661 = vmatprep.subr.bf16.mxu1 %v12862_v56  ;;  %v12953_v55 = vld [vmem:[%s13740_s22 + $0x2354] ss:$8 sps:$4 sm:$0xff]   ;;  %v12948_v56 = vld [vmem:[%s13740_s22 + $0xf50] ss:$8 sps:$4 sm:$0xff]  }
 0x40f   : > { %9481 = vmatprep.subr.bf16.mxu0 %v12865_v57  ;;  %v12951_v57 = vld [vmem:[%s13740_s22 + $0x2350] ss:$8 sps:$4 sm:$0xff]  }
 0x411   : > { %8662 = vmatpush1.bf16.msra.mxu1 %v12860_v24  ;;  %v12956_v24 = vld [vmem:[%s13740_s22 + $0xf64] ss:$8 sps:$4 sm:$0xff]  }
 0x412   : > { %9482 = vmatpush1.bf16.msra.mxu0 %v12863_v59  ;;  %8663 = vmatprep.subr.bf16.mxu1 %v12868_v60  ;;  %v12959_v59 = vld [vmem:[%s13740_s22 + $0x2364] ss:$8 sps:$4 sm:$0xff]   ;;  %v12954_v60 = vld [vmem:[%s13740_s22 + $0xf60] ss:$8 sps:$4 sm:$0xff]  }
 0x413   : > { %9483 = vmatprep.subr.bf16.mxu0 %v12871_v61  ;;  %v12957_v61 = vld [vmem:[%s13740_s22 + $0x2360] ss:$8 sps:$4 sm:$0xff]  }
 0x415   : > { %8664 = vmatpush1.bf16.msra.mxu1 %v12866_v62  ;;  %v12962_v62 = vld [vmem:[%s13740_s22 + $0xf74] ss:$8 sps:$4 sm:$0xff]  }
 0x416   : > { %9484 = vmatpush1.bf16.msra.mxu0 %v12869_v63  ;;  %8665 = vmatprep.subr.bf16.mxu1 %v12874_v40  ;;  %v12965_v63 = vld [vmem:[%s13740_s22 + $0x2374] ss:$8 sps:$4 sm:$0xff]   ;;  %v12960_v40 = vld [vmem:[%s13740_s22 + $0xf70] ss:$8 sps:$4 sm:$0xff]  }
 0x417   : > { %9485 = vmatprep.subr.bf16.mxu0 %v12877_v1  ;;  %v12963_v1 = vld [vmem:[%s13740_s22 + $0x2370] ss:$8 sps:$4 sm:$0xff]  }
 0x419   : > { %8666 = vmatpush1.bf16.msra.mxu1 %v12872_v2  ;;  %v12968_v2 = vld [vmem:[%s13740_s22 + $0xf84] ss:$8 sps:$4 sm:$0xff]  }
 0x41a   : > { %9486 = vmatpush1.bf16.msra.mxu0 %v12875_v3  ;;  %8667 = vmatprep.subr.bf16.mxu1 %v12880_v4  ;;  %v12971_v3 = vld [vmem:[%s13740_s22 + $0x2384] ss:$8 sps:$4 sm:$0xff]   ;;  %v12966_v4 = vld [vmem:[%s13740_s22 + $0xf80] ss:$8 sps:$4 sm:$0xff]  }
 0x41b   : > { %9487 = vmatprep.subr.bf16.mxu0 %v12883_v5  ;;  %v12969_v5 = vld [vmem:[%s13740_s22 + $0x2380] ss:$8 sps:$4 sm:$0xff]  }
 0x41d   : > { %8668 = vmatpush1.bf16.msra.mxu1 %v12878_v6  ;;  %v12974_v6 = vld [vmem:[%s13740_s22 + $0xf94] ss:$8 sps:$4 sm:$0xff]  }
 0x41e   : > { %9488 = vmatpush1.bf16.msra.mxu0 %v12881_v58  ;;  %8669 = vmatprep.subr.bf16.mxu1 %v12886_v8  ;;  %v12977_v58 = vld [vmem:[%s13740_s22 + $0x2394] ss:$8 sps:$4 sm:$0xff]   ;;  %v12972_v8 = vld [vmem:[%s13740_s22 + $0xf90] ss:$8 sps:$4 sm:$0xff]  }
 0x41f   : > { %9489 = vmatprep.subr.bf16.mxu0 %v12889_v9  ;;  %v12975_v9 = vld [vmem:[%s13740_s22 + $0x2390] ss:$8 sps:$4 sm:$0xff]  }
 0x421   : > { %8670 = vmatpush1.bf16.msra.mxu1 %v12884_v10  ;;  %v12980_v10 = vld [vmem:[%s13740_s22 + $0xfa4] ss:$8 sps:$4 sm:$0xff]  }
 0x422   : > { %9490 = vmatpush1.bf16.msra.mxu0 %v12887_v11  ;;  %8671 = vmatprep.subr.bf16.mxu1 %v12892_v0  ;;  %v12983_v11 = vld [vmem:[%s13740_s22 + $0x23a4] ss:$8 sps:$4 sm:$0xff]   ;;  %v12978_v0 = vld [vmem:[%s13740_s22 + $0xfa0] ss:$8 sps:$4 sm:$0xff]  }
 0x423   : > { %9491 = vmatprep.subr.bf16.mxu0 %v12895_v52  ;;  %v12981_v52 = vld [vmem:[%s13740_s22 + $0x23a0] ss:$8 sps:$4 sm:$0xff]  }
 0x425   : > { %8672 = vmatpush1.bf16.msra.mxu1 %v12890_v14  ;;  %v12986_v14 = vld [vmem:[%s13740_s22 + $0xfb4] ss:$8 sps:$4 sm:$0xff]  }
 0x426   : > { %9492 = vmatpush1.bf16.msra.mxu0 %v12893_v15  ;;  %8673 = vmatprep.subr.bf16.mxu1 %v12898_v16  ;;  %v12989_v15 = vld [vmem:[%s13740_s22 + $0x23b4] ss:$8 sps:$4 sm:$0xff]   ;;  %v12984_v16 = vld [vmem:[%s13740_s22 + $0xfb0] ss:$8 sps:$4 sm:$0xff]  }
 0x427   : > { %9493 = vmatprep.subr.bf16.mxu0 %v12901_v17  ;;  %v12987_v17 = vld [vmem:[%s13740_s22 + $0x23b0] ss:$8 sps:$4 sm:$0xff]  }
 0x429   : > { %8674 = vmatpush1.bf16.msra.mxu1 %v12896_v46  ;;  %v12992_v46 = vld [vmem:[%s13740_s22 + $0xfc4] ss:$8 sps:$4 sm:$0xff]  }
 0x42a   : > { %9494 = vmatpush1.bf16.msra.mxu0 %v12899_v7  ;;  %8675 = vmatprep.subr.bf16.mxu1 %v12904_v22  ;;  %v12995_v7 = vld [vmem:[%s13740_s22 + $0x23c4] ss:$8 sps:$4 sm:$0xff]   ;;  %v12990_v22 = vld [vmem:[%s13740_s22 + $0xfc0] ss:$8 sps:$4 sm:$0xff]  }
 0x42b   : > { %9495 = vmatprep.subr.bf16.mxu0 %v12907_v23  ;;  %v12993_v23 = vld [vmem:[%s13740_s22 + $0x23c0] ss:$8 sps:$4 sm:$0xff]  }
 0x42d   : > { %8676 = vmatpush1.bf16.msra.mxu1 %v12902_v26  ;;  %v12998_v26 = vld [vmem:[%s13740_s22 + $0xfd4] ss:$8 sps:$4 sm:$0xff]  }
 0x42e   : > { %9496 = vmatpush1.bf16.msra.mxu0 %v12905_v27  ;;  %8677 = vmatprep.subr.bf16.mxu1 %v12910_v12  ;;  %v13001_v27 = vld [vmem:[%s13740_s22 + $0x23d4] ss:$8 sps:$4 sm:$0xff]   ;;  %v12996_v12 = vld [vmem:[%s13740_s22 + $0xfd0] ss:$8 sps:$4 sm:$0xff]  }
 0x42f   : > { %9497 = vmatprep.subr.bf16.mxu0 %v12913_v13  ;;  %v12999_v13 = vld [vmem:[%s13740_s22 + $0x23d0] ss:$8 sps:$4 sm:$0xff]  }
 0x431   : > { %8678 = vmatpush1.bf16.msra.mxu1 %v12908_v30  ;;  %v13004_v30 = vld [vmem:[%s13740_s22 + $0xfe4] ss:$8 sps:$4 sm:$0xff]  }
 0x432   : > { %9498 = vmatpush1.bf16.msra.mxu0 %v12911_v31  ;;  %8688 = vmatprep.subr.bf16.mxu1 %v12918_v32  ;;  %v13007_v31 = vld [vmem:[%s13740_s22 + $0x23e4] ss:$8 sps:$4 sm:$0xff]   ;;  %v13002_v32 = vld [vmem:[%s13740_s22 + $0xfe0] ss:$8 sps:$4 sm:$0xff]  }
 0x433   : > { %9508 = vmatprep.subr.bf16.mxu0 %v12923_v33  ;;  %v13005_v33 = vld [vmem:[%s13740_s22 + $0x23e0] ss:$8 sps:$4 sm:$0xff]  }
 0x434   : > { %8680 = vmatmul.mubr.bf16.vlgmr.msra.gmra.mrb[0].mxu1 %v9882_v19  ;;  %v13010_v19 = vld [vmem:[%s13740_s22 + $0xff4] ss:$8 sps:$4 sm:$0xff]  }
 0x435   : > { %9500 = vmatmul.mubr.bf16.vlgmr.msra.gmra.mrb[0].mxu0 %v9922_v21  ;;  %8689 = vmatpush1.bf16.msra.mxu1 %v12916_v36  ;;  %v13013_v21 = vld [vmem:[%s13740_s22 + $0x23f4] ss:$8 sps:$4 sm:$0xff]   ;;  %v13008_v36 = vld [vmem:[%s13740_s22 + $0xff0] ss:$8 sps:$4 sm:$0xff]  }
 0x436   : > { %9509 = vmatpush1.bf16.msra.mxu0 %v12921_v37  ;;  %8690 = vmatprep.subr.bf16.mxu1 %v12926_v38  ;;  %v13011_v37 = vld [vmem:[%s13740_s22 + $0x23f0] ss:$8 sps:$4 sm:$0xff]   ;;  %v13018_v38 = vld [vmem:[%s13740_s22 + $0x1004] ss:$8 sps:$4 sm:$0xff]  }
 0x437   : > { %9510 = vmatprep.subr.bf16.mxu0 %v12929_v39  ;;  %8720 = vmatprep.mubr.bf16.mxu1 %v9885_v20  ;;  %v13023_v39 = vld [vmem:[%s13740_s22 + $0x2404] ss:$8 sps:$4 sm:$0xff]   ;;  %v9884_v20 = vcombine.low %v14876_v34, %v14876_v34 }
 0x438   : > { %9540 = vmatprep.mubr.bf16.mxu0 %v9925_v28  ;;  %v9924_v28 = vcombine.low %v14878_v35, %v14878_v35 }
 0x439   : > { %8691 = vmatpush1.bf16.msra.mxu1 %v12924_v29  ;;  %v14952_v29 = vld [vmem:[#allocation2 + $0x80] sm:$0xff] }
 0x43a   : > { %9511 = vmatpush1.bf16.msra.mxu0 %v12927_v41  ;;  %8692 = vmatprep.subr.bf16.mxu1 %v12932_v42  ;;  %v14954_v41 = vld [vmem:[#allocation2 + $0x120] sm:$0xff]  ;;  %v9887_v34 = vcombine.high %v14952_v29, %v14952_v29 }
 0x43b   : > { %9512 = vmatprep.subr.bf16.mxu0 %v12935_v43  ;;  %v13016_v42 = vld [vmem:[%s13740_s22 + $0x1000] ss:$8 sps:$4 sm:$0xff]   ;;  %v9927_v35 = vcombine.high %v14954_v41, %v14954_v41 }
 0x43c   : > { %v13021_v43 = vld [vmem:[%s13740_s22 + $0x2400] ss:$8 sps:$4 sm:$0xff]  }
 0x43d   : > { %8693 = vmatpush1.bf16.msra.mxu1 %v12930_v44  ;;  %v13026_v44 = vld [vmem:[%s13740_s22 + $0x1014] ss:$8 sps:$4 sm:$0xff]  }
 0x43e   : > { %9513 = vmatpush1.bf16.msra.mxu0 %v12933_v45  ;;  %8694 = vmatprep.subr.bf16.mxu1 %v12938_v25  ;;  %v13029_v45 = vld [vmem:[%s13740_s22 + $0x2414] ss:$8 sps:$4 sm:$0xff]   ;;  %v13024_v25 = vld [vmem:[%s13740_s22 + $0x1010] ss:$8 sps:$4 sm:$0xff]  }
 0x43f   : > { %9514 = vmatprep.subr.bf16.mxu0 %v12941_v47  ;;  %v13027_v47 = vld [vmem:[%s13740_s22 + $0x2410] ss:$8 sps:$4 sm:$0xff]  }
 0x441   : > { %8695 = vmatpush1.bf16.msra.mxu1 %v12936_v48  ;;  %v13032_v48 = vld [vmem:[%s13740_s22 + $0x1024] ss:$8 sps:$4 sm:$0xff]  }
 0x442   : > { %9515 = vmatpush1.bf16.msra.mxu0 %v12939_v49  ;;  %8696 = vmatprep.subr.bf16.mxu1 %v12944_v50  ;;  %v13035_v49 = vld [vmem:[%s13740_s22 + $0x2424] ss:$8 sps:$4 sm:$0xff]   ;;  %v13030_v50 = vld [vmem:[%s13740_s22 + $0x1020] ss:$8 sps:$4 sm:$0xff]  }
 0x443   : > { %9516 = vmatprep.subr.bf16.mxu0 %v12947_v51  ;;  %v13033_v51 = vld [vmem:[%s13740_s22 + $0x2420] ss:$8 sps:$4 sm:$0xff]  }
 0x445   : > { %8697 = vmatpush1.bf16.msra.mxu1 %v12942_v18  ;;  %v13038_v18 = vld [vmem:[%s13740_s22 + $0x1034] ss:$8 sps:$4 sm:$0xff]  }
 0x446   : > { %9517 = vmatpush1.bf16.msra.mxu0 %v12945_v53  ;;  %8698 = vmatprep.subr.bf16.mxu1 %v12950_v54  ;;  %v13041_v53 = vld [vmem:[%s13740_s22 + $0x2434] ss:$8 sps:$4 sm:$0xff]   ;;  %v13036_v54 = vld [vmem:[%s13740_s22 + $0x1030] ss:$8 sps:$4 sm:$0xff]  }
 0x447   : > { %9518 = vmatprep.subr.bf16.mxu0 %v12953_v55  ;;  %v13039_v55 = vld [vmem:[%s13740_s22 + $0x2430] ss:$8 sps:$4 sm:$0xff]  }
 0x449   : > { %8699 = vmatpush1.bf16.msra.mxu1 %v12948_v56  ;;  %v13044_v56 = vld [vmem:[%s13740_s22 + $0x1044] ss:$8 sps:$4 sm:$0xff]  }
 0x44a   : > { %9519 = vmatpush1.bf16.msra.mxu0 %v12951_v57  ;;  %8700 = vmatprep.subr.bf16.mxu1 %v12956_v24  ;;  %v13047_v57 = vld [vmem:[%s13740_s22 + $0x2444] ss:$8 sps:$4 sm:$0xff]   ;;  %v13042_v24 = vld [vmem:[%s13740_s22 + $0x1040] ss:$8 sps:$4 sm:$0xff]  }
 0x44b   : > { %9520 = vmatprep.subr.bf16.mxu0 %v12959_v59  ;;  %v13045_v59 = vld [vmem:[%s13740_s22 + $0x2440] ss:$8 sps:$4 sm:$0xff]  }
 0x44d   : > { %8701 = vmatpush1.bf16.msra.mxu1 %v12954_v60  ;;  %v13050_v60 = vld [vmem:[%s13740_s22 + $0x1054] ss:$8 sps:$4 sm:$0xff]  }
 0x44e   : > { %9521 = vmatpush1.bf16.msra.mxu0 %v12957_v61  ;;  %8702 = vmatprep.subr.bf16.mxu1 %v12962_v62  ;;  %v13053_v61 = vld [vmem:[%s13740_s22 + $0x2454] ss:$8 sps:$4 sm:$0xff]   ;;  %v13048_v62 = vld [vmem:[%s13740_s22 + $0x1050] ss:$8 sps:$4 sm:$0xff]  }
 0x44f   : > { %9522 = vmatprep.subr.bf16.mxu0 %v12965_v63  ;;  %v13051_v63 = vld [vmem:[%s13740_s22 + $0x2450] ss:$8 sps:$4 sm:$0xff]  }
 0x451   : > { %8703 = vmatpush1.bf16.msra.mxu1 %v12960_v40  ;;  %v13056_v40 = vld [vmem:[%s13740_s22 + $0x1064] ss:$8 sps:$4 sm:$0xff]  }
 0x452   : > { %9523 = vmatpush1.bf16.msra.mxu0 %v12963_v1  ;;  %8704 = vmatprep.subr.bf16.mxu1 %v12968_v2  ;;  %v13059_v1 = vld [vmem:[%s13740_s22 + $0x2464] ss:$8 sps:$4 sm:$0xff]   ;;  %v13054_v2 = vld [vmem:[%s13740_s22 + $0x1060] ss:$8 sps:$4 sm:$0xff]  }
 0x453   : > { %9524 = vmatprep.subr.bf16.mxu0 %v12971_v3  ;;  %v13057_v3 = vld [vmem:[%s13740_s22 + $0x2460] ss:$8 sps:$4 sm:$0xff]  }
 0x455   : > { %8705 = vmatpush1.bf16.msra.mxu1 %v12966_v4  ;;  %v13062_v4 = vld [vmem:[%s13740_s22 + $0x1074] ss:$8 sps:$4 sm:$0xff]  }
 0x456   : > { %9525 = vmatpush1.bf16.msra.mxu0 %v12969_v5  ;;  %8706 = vmatprep.subr.bf16.mxu1 %v12974_v6  ;;  %v13065_v5 = vld [vmem:[%s13740_s22 + $0x2474] ss:$8 sps:$4 sm:$0xff]   ;;  %v13060_v6 = vld [vmem:[%s13740_s22 + $0x1070] ss:$8 sps:$4 sm:$0xff]  }
 0x457   : > { %9526 = vmatprep.subr.bf16.mxu0 %v12977_v58  ;;  %v13063_v58 = vld [vmem:[%s13740_s22 + $0x2470] ss:$8 sps:$4 sm:$0xff]  }
 0x459   : > { %8707 = vmatpush1.bf16.msra.mxu1 %v12972_v8  ;;  %v13068_v8 = vld [vmem:[%s13740_s22 + $0x1084] ss:$8 sps:$4 sm:$0xff]  }
 0x45a   : > { %9527 = vmatpush1.bf16.msra.mxu0 %v12975_v9  ;;  %8708 = vmatprep.subr.bf16.mxu1 %v12980_v10  ;;  %v13071_v9 = vld [vmem:[%s13740_s22 + $0x2484] ss:$8 sps:$4 sm:$0xff]   ;;  %v13066_v10 = vld [vmem:[%s13740_s22 + $0x1080] ss:$8 sps:$4 sm:$0xff]  }
 0x45b   : > { %9528 = vmatprep.subr.bf16.mxu0 %v12983_v11  ;;  %v13069_v11 = vld [vmem:[%s13740_s22 + $0x2480] ss:$8 sps:$4 sm:$0xff]  }
 0x45d   : > { %8709 = vmatpush1.bf16.msra.mxu1 %v12978_v0  ;;  %v13074_v0 = vld [vmem:[%s13740_s22 + $0x1094] ss:$8 sps:$4 sm:$0xff]  }
 0x45e   : > { %9529 = vmatpush1.bf16.msra.mxu0 %v12981_v52  ;;  %8710 = vmatprep.subr.bf16.mxu1 %v12986_v14  ;;  %v13077_v52 = vld [vmem:[%s13740_s22 + $0x2494] ss:$8 sps:$4 sm:$0xff]   ;;  %v13072_v14 = vld [vmem:[%s13740_s22 + $0x1090] ss:$8 sps:$4 sm:$0xff]  }
 0x45f   : > { %9530 = vmatprep.subr.bf16.mxu0 %v12989_v15  ;;  %v13075_v15 = vld [vmem:[%s13740_s22 + $0x2490] ss:$8 sps:$4 sm:$0xff]  }
 0x461   : > { %8711 = vmatpush1.bf16.msra.mxu1 %v12984_v16  ;;  %v13080_v16 = vld [vmem:[%s13740_s22 + $0x10a4] ss:$8 sps:$4 sm:$0xff]  }
 0x462   : > { %9531 = vmatpush1.bf16.msra.mxu0 %v12987_v17  ;;  %8712 = vmatprep.subr.bf16.mxu1 %v12992_v46  ;;  %v13083_v17 = vld [vmem:[%s13740_s22 + $0x24a4] ss:$8 sps:$4 sm:$0xff]   ;;  %v13078_v46 = vld [vmem:[%s13740_s22 + $0x10a0] ss:$8 sps:$4 sm:$0xff]  }
 0x463   : > { %9532 = vmatprep.subr.bf16.mxu0 %v12995_v7  ;;  %v13081_v7 = vld [vmem:[%s13740_s22 + $0x24a0] ss:$8 sps:$4 sm:$0xff]  }
 0x465   : > { %8713 = vmatpush1.bf16.msra.mxu1 %v12990_v22  ;;  %v13086_v22 = vld [vmem:[%s13740_s22 + $0x10b4] ss:$8 sps:$4 sm:$0xff]  }
 0x466   : > { %9533 = vmatpush1.bf16.msra.mxu0 %v12993_v23  ;;  %8714 = vmatprep.subr.bf16.mxu1 %v12998_v26  ;;  %v13089_v23 = vld [vmem:[%s13740_s22 + $0x24b4] ss:$8 sps:$4 sm:$0xff]   ;;  %v13084_v26 = vld [vmem:[%s13740_s22 + $0x10b0] ss:$8 sps:$4 sm:$0xff]  }
 0x467   : > { %9534 = vmatprep.subr.bf16.mxu0 %v13001_v27  ;;  %v13087_v27 = vld [vmem:[%s13740_s22 + $0x24b0] ss:$8 sps:$4 sm:$0xff]  }
 0x469   : > { %8715 = vmatpush1.bf16.msra.mxu1 %v12996_v12  ;;  %v13092_v12 = vld [vmem:[%s13740_s22 + $0x10c4] ss:$8 sps:$4 sm:$0xff]  }
 0x46a   : > { %9535 = vmatpush1.bf16.msra.mxu0 %v12999_v13  ;;  %8716 = vmatprep.subr.bf16.mxu1 %v13004_v30  ;;  %v13095_v13 = vld [vmem:[%s13740_s22 + $0x24c4] ss:$8 sps:$4 sm:$0xff]   ;;  %v13090_v30 = vld [vmem:[%s13740_s22 + $0x10c0] ss:$8 sps:$4 sm:$0xff]  }
 0x46b   : > { %9536 = vmatprep.subr.bf16.mxu0 %v13007_v31  ;;  %v13093_v31 = vld [vmem:[%s13740_s22 + $0x24c0] ss:$8 sps:$4 sm:$0xff]  }
 0x46d   : > { %8717 = vmatpush1.bf16.msra.mxu1 %v13002_v32  ;;  %v13098_v32 = vld [vmem:[%s13740_s22 + $0x10d4] ss:$8 sps:$4 sm:$0xff]  }
 0x46e   : > { %9537 = vmatpush1.bf16.msra.mxu0 %v13005_v33  ;;  %8718 = vmatprep.subr.bf16.mxu1 %v13010_v19  ;;  %v13101_v33 = vld [vmem:[%s13740_s22 + $0x24d4] ss:$8 sps:$4 sm:$0xff]   ;;  %v13096_v19 = vld [vmem:[%s13740_s22 + $0x10d0] ss:$8 sps:$4 sm:$0xff]  }
 0x46f   : > { %9538 = vmatprep.subr.bf16.mxu0 %v13013_v21  ;;  %v13099_v21 = vld [vmem:[%s13740_s22 + $0x24d0] ss:$8 sps:$4 sm:$0xff]  }
 0x471   : > { %8719 = vmatpush1.bf16.msra.mxu1 %v13008_v36  ;;  %v13104_v36 = vld [vmem:[%s13740_s22 + $0x10e4] ss:$8 sps:$4 sm:$0xff]  }
 0x472   : > { %9539 = vmatpush1.bf16.msra.mxu0 %v13011_v37  ;;  %8729 = vmatprep.subr.bf16.mxu1 %v13018_v38  ;;  %v13107_v37 = vld [vmem:[%s13740_s22 + $0x24e4] ss:$8 sps:$4 sm:$0xff]   ;;  %v13102_v38 = vld [vmem:[%s13740_s22 + $0x10e0] ss:$8 sps:$4 sm:$0xff]  }
 0x473   : > { %9549 = vmatprep.subr.bf16.mxu0 %v13023_v39  ;;  %v13105_v39 = vld [vmem:[%s13740_s22 + $0x24e0] ss:$8 sps:$4 sm:$0xff]  }
 0x474   : > { %8721 = vmatmul.mubr.bf16.vlgmr.msra.gmra.mrb[0].mxu1 %v9884_v20  ;;  %v13110_v20 = vld [vmem:[%s13740_s22 + $0x10f4] ss:$8 sps:$4 sm:$0xff]  }
 0x475   : > { %9541 = vmatmul.mubr.bf16.vlgmr.msra.gmra.mrb[0].mxu0 %v9924_v28  ;;  %8730 = vmatpush1.bf16.msra.mxu1 %v13016_v42  ;;  %v13113_v28 = vld [vmem:[%s13740_s22 + $0x24f4] ss:$8 sps:$4 sm:$0xff]   ;;  %v13108_v42 = vld [vmem:[%s13740_s22 + $0x10f0] ss:$8 sps:$4 sm:$0xff]  }
 0x476   : > { %9550 = vmatpush1.bf16.msra.mxu0 %v13021_v43  ;;  %8731 = vmatprep.subr.bf16.mxu1 %v13026_v44  ;;  %v13111_v43 = vld [vmem:[%s13740_s22 + $0x24f0] ss:$8 sps:$4 sm:$0xff]   ;;  %v13118_v44 = vld [vmem:[%s13740_s22 + $0x1104] ss:$8 sps:$4 sm:$0xff]  }
 0x477   : > { %9551 = vmatprep.subr.bf16.mxu0 %v13029_v45  ;;  %8761 = vmatprep.mubr.bf16.mxu1 %v9887_v34  ;;  %v13123_v45 = vld [vmem:[%s13740_s22 + $0x2504] ss:$8 sps:$4 sm:$0xff]   ;;  %v9886_v34 = vcombine.low %v14952_v29, %v14952_v29 }
 0x478   : > { %9581 = vmatprep.mubr.bf16.mxu0 %v9927_v35  ;;  %v9926_v35 = vcombine.low %v14954_v41, %v14954_v41 }
 0x479   : > { %8732 = vmatpush1.bf16.msra.mxu1 %v13024_v25  ;;  %v15028_v25 = vld [vmem:[#allocation2 + $0x88] sm:$0xff] }
 0x47a   : > { %9552 = vmatpush1.bf16.msra.mxu0 %v13027_v47  ;;  %8733 = vmatprep.subr.bf16.mxu1 %v13032_v48  ;;  %v15030_v47 = vld [vmem:[#allocation2 + $0x128] sm:$0xff]  ;;  %v9889_v29 = vcombine.high %v15028_v25, %v15028_v25 }
 0x47b   : > { %9553 = vmatprep.subr.bf16.mxu0 %v13035_v49  ;;  %v13116_v48 = vld [vmem:[%s13740_s22 + $0x1100] ss:$8 sps:$4 sm:$0xff]   ;;  %v9929_v41 = vcombine.high %v15030_v47, %v15030_v47 }
 0x47c   : > { %v13121_v49 = vld [vmem:[%s13740_s22 + $0x2500] ss:$8 sps:$4 sm:$0xff]  }
 0x47d   : > { %8734 = vmatpush1.bf16.msra.mxu1 %v13030_v50  ;;  %v13126_v50 = vld [vmem:[%s13740_s22 + $0x1114] ss:$8 sps:$4 sm:$0xff]  }
 0x47e   : > { %9554 = vmatpush1.bf16.msra.mxu0 %v13033_v51  ;;  %8735 = vmatprep.subr.bf16.mxu1 %v13038_v18  ;;  %v13129_v51 = vld [vmem:[%s13740_s22 + $0x2514] ss:$8 sps:$4 sm:$0xff]   ;;  %v13124_v18 = vld [vmem:[%s13740_s22 + $0x1110] ss:$8 sps:$4 sm:$0xff]  }
 0x47f   : > { %9555 = vmatprep.subr.bf16.mxu0 %v13041_v53  ;;  %v13127_v53 = vld [vmem:[%s13740_s22 + $0x2510] ss:$8 sps:$4 sm:$0xff]  }
 0x481   : > { %8736 = vmatpush1.bf16.msra.mxu1 %v13036_v54  ;;  %v13132_v54 = vld [vmem:[%s13740_s22 + $0x1124] ss:$8 sps:$4 sm:$0xff]  }
 0x482   : > { %9556 = vmatpush1.bf16.msra.mxu0 %v13039_v55  ;;  %8737 = vmatprep.subr.bf16.mxu1 %v13044_v56  ;;  %v13135_v55 = vld [vmem:[%s13740_s22 + $0x2524] ss:$8 sps:$4 sm:$0xff]   ;;  %v13130_v56 = vld [vmem:[%s13740_s22 + $0x1120] ss:$8 sps:$4 sm:$0xff]  }
 0x483   : > { %9557 = vmatprep.subr.bf16.mxu0 %v13047_v57  ;;  %v13133_v57 = vld [vmem:[%s13740_s22 + $0x2520] ss:$8 sps:$4 sm:$0xff]  }
 0x485   : > { %8738 = vmatpush1.bf16.msra.mxu1 %v13042_v24  ;;  %v13138_v24 = vld [vmem:[%s13740_s22 + $0x1134] ss:$8 sps:$4 sm:$0xff]  }
 0x486   : > { %9558 = vmatpush1.bf16.msra.mxu0 %v13045_v59  ;;  %8739 = vmatprep.subr.bf16.mxu1 %v13050_v60  ;;  %v13141_v59 = vld [vmem:[%s13740_s22 + $0x2534] ss:$8 sps:$4 sm:$0xff]   ;;  %v13136_v60 = vld [vmem:[%s13740_s22 + $0x1130] ss:$8 sps:$4 sm:$0xff]  }
 0x487   : > { %9559 = vmatprep.subr.bf16.mxu0 %v13053_v61  ;;  %v13139_v61 = vld [vmem:[%s13740_s22 + $0x2530] ss:$8 sps:$4 sm:$0xff]  }
 0x489   : > { %8740 = vmatpush1.bf16.msra.mxu1 %v13048_v62  ;;  %v13144_v62 = vld [vmem:[%s13740_s22 + $0x1144] ss:$8 sps:$4 sm:$0xff]  }
 0x48a   : > { %9560 = vmatpush1.bf16.msra.mxu0 %v13051_v63  ;;  %8741 = vmatprep.subr.bf16.mxu1 %v13056_v40  ;;  %v13147_v63 = vld [vmem:[%s13740_s22 + $0x2544] ss:$8 sps:$4 sm:$0xff]   ;;  %v13142_v40 = vld [vmem:[%s13740_s22 + $0x1140] ss:$8 sps:$4 sm:$0xff]  }
 0x48b   : > { %9561 = vmatprep.subr.bf16.mxu0 %v13059_v1  ;;  %v13145_v1 = vld [vmem:[%s13740_s22 + $0x2540] ss:$8 sps:$4 sm:$0xff]  }
 0x48d   : > { %8742 = vmatpush1.bf16.msra.mxu1 %v13054_v2  ;;  %v13150_v2 = vld [vmem:[%s13740_s22 + $0x1154] ss:$8 sps:$4 sm:$0xff]  }
 0x48e   : > { %9562 = vmatpush1.bf16.msra.mxu0 %v13057_v3  ;;  %8743 = vmatprep.subr.bf16.mxu1 %v13062_v4  ;;  %v13153_v3 = vld [vmem:[%s13740_s22 + $0x2554] ss:$8 sps:$4 sm:$0xff]   ;;  %v13148_v4 = vld [vmem:[%s13740_s22 + $0x1150] ss:$8 sps:$4 sm:$0xff]  }
 0x48f   : > { %9563 = vmatprep.subr.bf16.mxu0 %v13065_v5  ;;  %v13151_v5 = vld [vmem:[%s13740_s22 + $0x2550] ss:$8 sps:$4 sm:$0xff]  }
 0x491   : > { %8744 = vmatpush1.bf16.msra.mxu1 %v13060_v6  ;;  %v13156_v6 = vld [vmem:[%s13740_s22 + $0x1164] ss:$8 sps:$4 sm:$0xff]  }
 0x492   : > { %9564 = vmatpush1.bf16.msra.mxu0 %v13063_v58  ;;  %8745 = vmatprep.subr.bf16.mxu1 %v13068_v8  ;;  %v13159_v58 = vld [vmem:[%s13740_s22 + $0x2564] ss:$8 sps:$4 sm:$0xff]   ;;  %v13154_v8 = vld [vmem:[%s13740_s22 + $0x1160] ss:$8 sps:$4 sm:$0xff]  }
 0x493   : > { %9565 = vmatprep.subr.bf16.mxu0 %v13071_v9  ;;  %v13157_v9 = vld [vmem:[%s13740_s22 + $0x2560] ss:$8 sps:$4 sm:$0xff]  }
 0x495   : > { %8746 = vmatpush1.bf16.msra.mxu1 %v13066_v10  ;;  %v13162_v10 = vld [vmem:[%s13740_s22 + $0x1174] ss:$8 sps:$4 sm:$0xff]  }
 0x496   : > { %9566 = vmatpush1.bf16.msra.mxu0 %v13069_v11  ;;  %8747 = vmatprep.subr.bf16.mxu1 %v13074_v0  ;;  %v13165_v11 = vld [vmem:[%s13740_s22 + $0x2574] ss:$8 sps:$4 sm:$0xff]   ;;  %v13160_v0 = vld [vmem:[%s13740_s22 + $0x1170] ss:$8 sps:$4 sm:$0xff]  }
 0x497   : > { %9567 = vmatprep.subr.bf16.mxu0 %v13077_v52  ;;  %v13163_v52 = vld [vmem:[%s13740_s22 + $0x2570] ss:$8 sps:$4 sm:$0xff]  }
 0x499   : > { %8748 = vmatpush1.bf16.msra.mxu1 %v13072_v14  ;;  %v13168_v14 = vld [vmem:[%s13740_s22 + $0x1184] ss:$8 sps:$4 sm:$0xff]  }
 0x49a   : > { %9568 = vmatpush1.bf16.msra.mxu0 %v13075_v15  ;;  %8749 = vmatprep.subr.bf16.mxu1 %v13080_v16  ;;  %v13171_v15 = vld [vmem:[%s13740_s22 + $0x2584] ss:$8 sps:$4 sm:$0xff]   ;;  %v13166_v16 = vld [vmem:[%s13740_s22 + $0x1180] ss:$8 sps:$4 sm:$0xff]  }
 0x49b   : > { %9569 = vmatprep.subr.bf16.mxu0 %v13083_v17  ;;  %v13169_v17 = vld [vmem:[%s13740_s22 + $0x2580] ss:$8 sps:$4 sm:$0xff]  }
 0x49d   : > { %8750 = vmatpush1.bf16.msra.mxu1 %v13078_v46  ;;  %v13174_v46 = vld [vmem:[%s13740_s22 + $0x1194] ss:$8 sps:$4 sm:$0xff]  }
 0x49e   : > { %9570 = vmatpush1.bf16.msra.mxu0 %v13081_v7  ;;  %8751 = vmatprep.subr.bf16.mxu1 %v13086_v22  ;;  %v13177_v7 = vld [vmem:[%s13740_s22 + $0x2594] ss:$8 sps:$4 sm:$0xff]   ;;  %v13172_v22 = vld [vmem:[%s13740_s22 + $0x1190] ss:$8 sps:$4 sm:$0xff]  }
 0x49f   : > { %9571 = vmatprep.subr.bf16.mxu0 %v13089_v23  ;;  %v13175_v23 = vld [vmem:[%s13740_s22 + $0x2590] ss:$8 sps:$4 sm:$0xff]  }
 0x4a1   : > { %8752 = vmatpush1.bf16.msra.mxu1 %v13084_v26  ;;  %v13180_v26 = vld [vmem:[%s13740_s22 + $0x11a4] ss:$8 sps:$4 sm:$0xff]  }
 0x4a2   : > { %9572 = vmatpush1.bf16.msra.mxu0 %v13087_v27  ;;  %8753 = vmatprep.subr.bf16.mxu1 %v13092_v12  ;;  %v13183_v27 = vld [vmem:[%s13740_s22 + $0x25a4] ss:$8 sps:$4 sm:$0xff]   ;;  %v13178_v12 = vld [vmem:[%s13740_s22 + $0x11a0] ss:$8 sps:$4 sm:$0xff]  }
 0x4a3   : > { %9573 = vmatprep.subr.bf16.mxu0 %v13095_v13  ;;  %v13181_v13 = vld [vmem:[%s13740_s22 + $0x25a0] ss:$8 sps:$4 sm:$0xff]  }
 0x4a5   : > { %8754 = vmatpush1.bf16.msra.mxu1 %v13090_v30  ;;  %v13186_v30 = vld [vmem:[%s13740_s22 + $0x11b4] ss:$8 sps:$4 sm:$0xff]  }
 0x4a6   : > { %9574 = vmatpush1.bf16.msra.mxu0 %v13093_v31  ;;  %8755 = vmatprep.subr.bf16.mxu1 %v13098_v32  ;;  %v13189_v31 = vld [vmem:[%s13740_s22 + $0x25b4] ss:$8 sps:$4 sm:$0xff]   ;;  %v13184_v32 = vld [vmem:[%s13740_s22 + $0x11b0] ss:$8 sps:$4 sm:$0xff]  }
 0x4a7   : > { %9575 = vmatprep.subr.bf16.mxu0 %v13101_v33  ;;  %v13187_v33 = vld [vmem:[%s13740_s22 + $0x25b0] ss:$8 sps:$4 sm:$0xff]  }
 0x4a9   : > { %8756 = vmatpush1.bf16.msra.mxu1 %v13096_v19  ;;  %v13192_v19 = vld [vmem:[%s13740_s22 + $0x11c4] ss:$8 sps:$4 sm:$0xff]  }
 0x4aa   : > { %9576 = vmatpush1.bf16.msra.mxu0 %v13099_v21  ;;  %8757 = vmatprep.subr.bf16.mxu1 %v13104_v36  ;;  %v13195_v21 = vld [vmem:[%s13740_s22 + $0x25c4] ss:$8 sps:$4 sm:$0xff]   ;;  %v13190_v36 = vld [vmem:[%s13740_s22 + $0x11c0] ss:$8 sps:$4 sm:$0xff]  }
 0x4ab   : > { %9577 = vmatprep.subr.bf16.mxu0 %v13107_v37  ;;  %v13193_v37 = vld [vmem:[%s13740_s22 + $0x25c0] ss:$8 sps:$4 sm:$0xff]  }
 0x4ad   : > { %8758 = vmatpush1.bf16.msra.mxu1 %v13102_v38  ;;  %v13198_v38 = vld [vmem:[%s13740_s22 + $0x11d4] ss:$8 sps:$4 sm:$0xff]  }
 0x4ae   : > { %9578 = vmatpush1.bf16.msra.mxu0 %v13105_v39  ;;  %8759 = vmatprep.subr.bf16.mxu1 %v13110_v20  ;;  %v13201_v39 = vld [vmem:[%s13740_s22 + $0x25d4] ss:$8 sps:$4 sm:$0xff]   ;;  %v13196_v20 = vld [vmem:[%s13740_s22 + $0x11d0] ss:$8 sps:$4 sm:$0xff]  }
 0x4af   : > { %9579 = vmatprep.subr.bf16.mxu0 %v13113_v28  ;;  %v13199_v28 = vld [vmem:[%s13740_s22 + $0x25d0] ss:$8 sps:$4 sm:$0xff]  }
 0x4b1   : > { %8760 = vmatpush1.bf16.msra.mxu1 %v13108_v42  ;;  %v13204_v42 = vld [vmem:[%s13740_s22 + $0x11e4] ss:$8 sps:$4 sm:$0xff]  }
 0x4b2   : > { %9580 = vmatpush1.bf16.msra.mxu0 %v13111_v43  ;;  %8770 = vmatprep.subr.bf16.mxu1 %v13118_v44  ;;  %v13207_v43 = vld [vmem:[%s13740_s22 + $0x25e4] ss:$8 sps:$4 sm:$0xff]   ;;  %v13202_v44 = vld [vmem:[%s13740_s22 + $0x11e0] ss:$8 sps:$4 sm:$0xff]  }
 0x4b3   : > { %9590 = vmatprep.subr.bf16.mxu0 %v13123_v45  ;;  %v13205_v45 = vld [vmem:[%s13740_s22 + $0x25e0] ss:$8 sps:$4 sm:$0xff]  }
 0x4b4   : > { %8762 = vmatmul.mubr.bf16.vlgmr.msra.gmra.mrb[0].mxu1 %v9886_v34  ;;  %v13210_v34 = vld [vmem:[%s13740_s22 + $0x11f4] ss:$8 sps:$4 sm:$0xff]  }
 0x4b5   : > { %9582 = vmatmul.mubr.bf16.vlgmr.msra.gmra.mrb[0].mxu0 %v9926_v35  ;;  %8771 = vmatpush1.bf16.msra.mxu1 %v13116_v48  ;;  %v13213_v35 = vld [vmem:[%s13740_s22 + $0x25f4] ss:$8 sps:$4 sm:$0xff]   ;;  %v13208_v48 = vld [vmem:[%s13740_s22 + $0x11f0] ss:$8 sps:$4 sm:$0xff]  }
 0x4b6   : > { %9591 = vmatpush1.bf16.msra.mxu0 %v13121_v49  ;;  %8772 = vmatprep.subr.bf16.mxu1 %v13126_v50  ;;  %v13211_v49 = vld [vmem:[%s13740_s22 + $0x25f0] ss:$8 sps:$4 sm:$0xff]   ;;  %v13218_v50 = vld [vmem:[%s13740_s22 + $0x1204] ss:$8 sps:$4 sm:$0xff]  }
 0x4b7   : > { %9592 = vmatprep.subr.bf16.mxu0 %v13129_v51  ;;  %8802 = vmatprep.mubr.bf16.mxu1 %v9889_v29  ;;  %v13223_v51 = vld [vmem:[%s13740_s22 + $0x2604] ss:$8 sps:$4 sm:$0xff]   ;;  %v9888_v29 = vcombine.low %v15028_v25, %v15028_v25 }
 0x4b8   : > { %9622 = vmatprep.mubr.bf16.mxu0 %v9929_v41  ;;  %v9928_v41 = vcombine.low %v15030_v47, %v15030_v47 }
 0x4b9   : > { %8773 = vmatpush1.bf16.msra.mxu1 %v13124_v18  ;;  %v15104_v18 = vld [vmem:[#allocation2 + $0x130] sm:$0xff] }
 0x4ba   : > { %9593 = vmatpush1.bf16.msra.mxu0 %v13127_v53  ;;  %8774 = vmatprep.subr.bf16.mxu1 %v13132_v54  ;;  %v15106_v53 = vld [vmem:[#allocation2 + $0x90] sm:$0xff]  ;;  %v9931_v25 = vcombine.high %v15104_v18, %v15104_v18 }
 0x4bb   : > { %9594 = vmatprep.subr.bf16.mxu0 %v13135_v55  ;;  %v13216_v54 = vld [vmem:[%s13740_s22 + $0x1200] ss:$8 sps:$4 sm:$0xff]   ;;  %v9891_v47 = vcombine.high %v15106_v53, %v15106_v53 }
 0x4bc   : > { %v13221_v55 = vld [vmem:[%s13740_s22 + $0x2600] ss:$8 sps:$4 sm:$0xff]  }
 0x4bd   : > { %8775 = vmatpush1.bf16.msra.mxu1 %v13130_v56  ;;  %v13226_v56 = vld [vmem:[%s13740_s22 + $0x1214] ss:$8 sps:$4 sm:$0xff]  }
 0x4be   : > { %9595 = vmatpush1.bf16.msra.mxu0 %v13133_v57  ;;  %8776 = vmatprep.subr.bf16.mxu1 %v13138_v24  ;;  %v13229_v57 = vld [vmem:[%s13740_s22 + $0x2614] ss:$8 sps:$4 sm:$0xff]   ;;  %v13224_v24 = vld [vmem:[%s13740_s22 + $0x1210] ss:$8 sps:$4 sm:$0xff]  }
 0x4bf   : > { %9596 = vmatprep.subr.bf16.mxu0 %v13141_v59  ;;  %v13227_v59 = vld [vmem:[%s13740_s22 + $0x2610] ss:$8 sps:$4 sm:$0xff]  }
 0x4c1   : > { %8777 = vmatpush1.bf16.msra.mxu1 %v13136_v60  ;;  %v13232_v60 = vld [vmem:[%s13740_s22 + $0x1224] ss:$8 sps:$4 sm:$0xff]  }
 0x4c2   : > { %9597 = vmatpush1.bf16.msra.mxu0 %v13139_v61  ;;  %8778 = vmatprep.subr.bf16.mxu1 %v13144_v62  ;;  %v13235_v61 = vld [vmem:[%s13740_s22 + $0x2624] ss:$8 sps:$4 sm:$0xff]   ;;  %v13230_v62 = vld [vmem:[%s13740_s22 + $0x1220] ss:$8 sps:$4 sm:$0xff]  }
 0x4c3   : > { %9598 = vmatprep.subr.bf16.mxu0 %v13147_v63  ;;  %v13233_v63 = vld [vmem:[%s13740_s22 + $0x2620] ss:$8 sps:$4 sm:$0xff]  }
 0x4c5   : > { %8779 = vmatpush1.bf16.msra.mxu1 %v13142_v40  ;;  %v13238_v40 = vld [vmem:[%s13740_s22 + $0x1234] ss:$8 sps:$4 sm:$0xff]  }
 0x4c6   : > { %9599 = vmatpush1.bf16.msra.mxu0 %v13145_v1  ;;  %8780 = vmatprep.subr.bf16.mxu1 %v13150_v2  ;;  %v13241_v1 = vld [vmem:[%s13740_s22 + $0x2634] ss:$8 sps:$4 sm:$0xff]   ;;  %v13236_v2 = vld [vmem:[%s13740_s22 + $0x1230] ss:$8 sps:$4 sm:$0xff]  }
 0x4c7   : > { %9600 = vmatprep.subr.bf16.mxu0 %v13153_v3  ;;  %v13239_v3 = vld [vmem:[%s13740_s22 + $0x2630] ss:$8 sps:$4 sm:$0xff]  }
 0x4c9   : > { %8781 = vmatpush1.bf16.msra.mxu1 %v13148_v4  ;;  %v13244_v4 = vld [vmem:[%s13740_s22 + $0x1244] ss:$8 sps:$4 sm:$0xff]  }
 0x4ca   : > { %9601 = vmatpush1.bf16.msra.mxu0 %v13151_v5  ;;  %8782 = vmatprep.subr.bf16.mxu1 %v13156_v6  ;;  %v13247_v5 = vld [vmem:[%s13740_s22 + $0x2644] ss:$8 sps:$4 sm:$0xff]   ;;  %v13242_v6 = vld [vmem:[%s13740_s22 + $0x1240] ss:$8 sps:$4 sm:$0xff]  }
 0x4cb   : > { %9602 = vmatprep.subr.bf16.mxu0 %v13159_v58  ;;  %v13245_v58 = vld [vmem:[%s13740_s22 + $0x2640] ss:$8 sps:$4 sm:$0xff]  }
 0x4cd   : > { %8783 = vmatpush1.bf16.msra.mxu1 %v13154_v8  ;;  %v13250_v8 = vld [vmem:[%s13740_s22 + $0x1254] ss:$8 sps:$4 sm:$0xff]  }
 0x4ce   : > { %9603 = vmatpush1.bf16.msra.mxu0 %v13157_v9  ;;  %8784 = vmatprep.subr.bf16.mxu1 %v13162_v10  ;;  %v13253_v9 = vld [vmem:[%s13740_s22 + $0x2654] ss:$8 sps:$4 sm:$0xff]   ;;  %v13248_v10 = vld [vmem:[%s13740_s22 + $0x1250] ss:$8 sps:$4 sm:$0xff]  }
 0x4cf   : > { %9604 = vmatprep.subr.bf16.mxu0 %v13165_v11  ;;  %v13251_v11 = vld [vmem:[%s13740_s22 + $0x2650] ss:$8 sps:$4 sm:$0xff]  }
 0x4d1   : > { %8785 = vmatpush1.bf16.msra.mxu1 %v13160_v0  ;;  %v13256_v0 = vld [vmem:[%s13740_s22 + $0x1264] ss:$8 sps:$4 sm:$0xff]  }
 0x4d2   : > { %9605 = vmatpush1.bf16.msra.mxu0 %v13163_v52  ;;  %8786 = vmatprep.subr.bf16.mxu1 %v13168_v14  ;;  %v13259_v52 = vld [vmem:[%s13740_s22 + $0x2664] ss:$8 sps:$4 sm:$0xff]   ;;  %v13254_v14 = vld [vmem:[%s13740_s22 + $0x1260] ss:$8 sps:$4 sm:$0xff]  }
 0x4d3   : > { %9606 = vmatprep.subr.bf16.mxu0 %v13171_v15  ;;  %v13257_v15 = vld [vmem:[%s13740_s22 + $0x2660] ss:$8 sps:$4 sm:$0xff]  }
 0x4d5   : > { %8787 = vmatpush1.bf16.msra.mxu1 %v13166_v16  ;;  %v13262_v16 = vld [vmem:[%s13740_s22 + $0x1274] ss:$8 sps:$4 sm:$0xff]  }
 0x4d6   : > { %9607 = vmatpush1.bf16.msra.mxu0 %v13169_v17  ;;  %8788 = vmatprep.subr.bf16.mxu1 %v13174_v46  ;;  %v13265_v17 = vld [vmem:[%s13740_s22 + $0x2674] ss:$8 sps:$4 sm:$0xff]   ;;  %v13260_v46 = vld [vmem:[%s13740_s22 + $0x1270] ss:$8 sps:$4 sm:$0xff]  }
 0x4d7   : > { %9608 = vmatprep.subr.bf16.mxu0 %v13177_v7  ;;  %v13263_v7 = vld [vmem:[%s13740_s22 + $0x2670] ss:$8 sps:$4 sm:$0xff]  }
 0x4d9   : > { %8789 = vmatpush1.bf16.msra.mxu1 %v13172_v22  ;;  %v13268_v22 = vld [vmem:[%s13740_s22 + $0x1284] ss:$8 sps:$4 sm:$0xff]  }
 0x4da   : > { %9609 = vmatpush1.bf16.msra.mxu0 %v13175_v23  ;;  %8790 = vmatprep.subr.bf16.mxu1 %v13180_v26  ;;  %v13271_v23 = vld [vmem:[%s13740_s22 + $0x2684] ss:$8 sps:$4 sm:$0xff]   ;;  %v13266_v26 = vld [vmem:[%s13740_s22 + $0x1280] ss:$8 sps:$4 sm:$0xff]  }
 0x4db   : > { %9610 = vmatprep.subr.bf16.mxu0 %v13183_v27  ;;  %v13269_v27 = vld [vmem:[%s13740_s22 + $0x2680] ss:$8 sps:$4 sm:$0xff]  }
 0x4dd   : > { %8791 = vmatpush1.bf16.msra.mxu1 %v13178_v12  ;;  %v13274_v12 = vld [vmem:[%s13740_s22 + $0x1294] ss:$8 sps:$4 sm:$0xff]  }
 0x4de   : > { %9611 = vmatpush1.bf16.msra.mxu0 %v13181_v13  ;;  %8792 = vmatprep.subr.bf16.mxu1 %v13186_v30  ;;  %v13277_v13 = vld [vmem:[%s13740_s22 + $0x2694] ss:$8 sps:$4 sm:$0xff]   ;;  %v13272_v30 = vld [vmem:[%s13740_s22 + $0x1290] ss:$8 sps:$4 sm:$0xff]  }
 0x4df   : > { %9612 = vmatprep.subr.bf16.mxu0 %v13189_v31  ;;  %v13275_v31 = vld [vmem:[%s13740_s22 + $0x2690] ss:$8 sps:$4 sm:$0xff]  }
 0x4e1   : > { %8793 = vmatpush1.bf16.msra.mxu1 %v13184_v32  ;;  %v13280_v32 = vld [vmem:[%s13740_s22 + $0x12a4] ss:$8 sps:$4 sm:$0xff]  }
 0x4e2   : > { %9613 = vmatpush1.bf16.msra.mxu0 %v13187_v33  ;;  %8794 = vmatprep.subr.bf16.mxu1 %v13192_v19  ;;  %v13283_v33 = vld [vmem:[%s13740_s22 + $0x26a4] ss:$8 sps:$4 sm:$0xff]   ;;  %v13278_v19 = vld [vmem:[%s13740_s22 + $0x12a0] ss:$8 sps:$4 sm:$0xff]  }
 0x4e3   : > { %9614 = vmatprep.subr.bf16.mxu0 %v13195_v21  ;;  %v13281_v21 = vld [vmem:[%s13740_s22 + $0x26a0] ss:$8 sps:$4 sm:$0xff]  }
 0x4e5   : > { %8795 = vmatpush1.bf16.msra.mxu1 %v13190_v36  ;;  %v13286_v36 = vld [vmem:[%s13740_s22 + $0x12b4] ss:$8 sps:$4 sm:$0xff]  }
 0x4e6   : > { %9615 = vmatpush1.bf16.msra.mxu0 %v13193_v37  ;;  %8796 = vmatprep.subr.bf16.mxu1 %v13198_v38  ;;  %v13289_v37 = vld [vmem:[%s13740_s22 + $0x26b4] ss:$8 sps:$4 sm:$0xff]   ;;  %v13284_v38 = vld [vmem:[%s13740_s22 + $0x12b0] ss:$8 sps:$4 sm:$0xff]  }
 0x4e7   : > { %9616 = vmatprep.subr.bf16.mxu0 %v13201_v39  ;;  %v13287_v39 = vld [vmem:[%s13740_s22 + $0x26b0] ss:$8 sps:$4 sm:$0xff]  }
 0x4e9   : > { %8797 = vmatpush1.bf16.msra.mxu1 %v13196_v20  ;;  %v13292_v20 = vld [vmem:[%s13740_s22 + $0x12c4] ss:$8 sps:$4 sm:$0xff]  }
 0x4ea   : > { %9617 = vmatpush1.bf16.msra.mxu0 %v13199_v28  ;;  %8798 = vmatprep.subr.bf16.mxu1 %v13204_v42  ;;  %v13295_v28 = vld [vmem:[%s13740_s22 + $0x26c4] ss:$8 sps:$4 sm:$0xff]   ;;  %v13290_v42 = vld [vmem:[%s13740_s22 + $0x12c0] ss:$8 sps:$4 sm:$0xff]  }
 0x4eb   : > { %9618 = vmatprep.subr.bf16.mxu0 %v13207_v43  ;;  %v13293_v43 = vld [vmem:[%s13740_s22 + $0x26c0] ss:$8 sps:$4 sm:$0xff]  }
 0x4ed   : > { %8799 = vmatpush1.bf16.msra.mxu1 %v13202_v44  ;;  %v13298_v44 = vld [vmem:[%s13740_s22 + $0x12d4] ss:$8 sps:$4 sm:$0xff]  }
 0x4ee   : > { %9619 = vmatpush1.bf16.msra.mxu0 %v13205_v45  ;;  %8800 = vmatprep.subr.bf16.mxu1 %v13210_v34  ;;  %v13301_v45 = vld [vmem:[%s13740_s22 + $0x26d4] ss:$8 sps:$4 sm:$0xff]   ;;  %v13296_v34 = vld [vmem:[%s13740_s22 + $0x12d0] ss:$8 sps:$4 sm:$0xff]  }
 0x4ef   : > { %9620 = vmatprep.subr.bf16.mxu0 %v13213_v35  ;;  %v13299_v35 = vld [vmem:[%s13740_s22 + $0x26d0] ss:$8 sps:$4 sm:$0xff]  }
 0x4f1   : > { %8801 = vmatpush1.bf16.msra.mxu1 %v13208_v48  ;;  %v13304_v48 = vld [vmem:[%s13740_s22 + $0x12e4] ss:$8 sps:$4 sm:$0xff]  }
 0x4f2   : > { %9621 = vmatpush1.bf16.msra.mxu0 %v13211_v49  ;;  %8811 = vmatprep.subr.bf16.mxu1 %v13218_v50  ;;  %v13307_v49 = vld [vmem:[%s13740_s22 + $0x26e4] ss:$8 sps:$4 sm:$0xff]   ;;  %v13302_v50 = vld [vmem:[%s13740_s22 + $0x12e0] ss:$8 sps:$4 sm:$0xff]  }
 0x4f3   : > { %9631 = vmatprep.subr.bf16.mxu0 %v13223_v51  ;;  %v13305_v51 = vld [vmem:[%s13740_s22 + $0x26e0] ss:$8 sps:$4 sm:$0xff]  }
 0x4f4   : > { %8803 = vmatmul.mubr.bf16.vlgmr.msra.gmra.mrb[0].mxu1 %v9888_v29  ;;  %v13310_v29 = vld [vmem:[%s13740_s22 + $0x12f4] ss:$8 sps:$4 sm:$0xff]  }
 0x4f5   : > { %9623 = vmatmul.mubr.bf16.vlgmr.msra.gmra.mrb[0].mxu0 %v9928_v41  ;;  %8812 = vmatpush1.bf16.msra.mxu1 %v13216_v54  ;;  %v13313_v41 = vld [vmem:[%s13740_s22 + $0x26f4] ss:$8 sps:$4 sm:$0xff]   ;;  %v13308_v54 = vld [vmem:[%s13740_s22 + $0x12f0] ss:$8 sps:$4 sm:$0xff]  }
 0x4f6   : > { %9632 = vmatpush1.bf16.msra.mxu0 %v13221_v55  ;;  %8813 = vmatprep.subr.bf16.mxu1 %v13226_v56  ;;  %v13311_v55 = vld [vmem:[%s13740_s22 + $0x26f0] ss:$8 sps:$4 sm:$0xff]   ;;  %v13320_v56 = vld [vmem:[%s13740_s22 + $0x1304] ss:$8 sps:$4 sm:$0xff]  }
 0x4f7   : > { %9633 = vmatprep.subr.bf16.mxu0 %v13229_v57  ;;  %9663 = vmatprep.mubr.bf16.mxu0 %v9931_v25  ;;  %v13329_v57 = vld [vmem:[%s13740_s22 + $0x2704] ss:$8 sps:$4 sm:$0xff]   ;;  %v9930_v25 = vcombine.low %v15104_v18, %v15104_v18  ;;  %v13321_v18 = vld [vmem:[%s13740_s22 + $0x1310] ss:$8 sps:$4 sm:$0xff]  }
 0x4f8   : > { %8843 = vmatprep.mubr.bf16.mxu1 %v9891_v47  ;;  %v9890_v47 = vcombine.low %v15106_v53, %v15106_v53  ;;  %v13326_v53 = vld [vmem:[%s13740_s22 + $0x1324] ss:$8 sps:$4 sm:$0xff]  }
 0x4f9   : > { %8814 = vmatpush1.bf16.msra.mxu1 %v13224_v24  ;;  %v15180_v24 = vld [vmem:[#allocation2 + $0x98] sm:$0xff] }
 0x4fa   : > { %9634 = vmatpush1.bf16.msra.mxu0 %v13227_v59  ;;  %8815 = vmatprep.subr.bf16.mxu1 %v13232_v60  ;;  %v13318_v59 = vld [vmem:[%s13740_s22 + $0x1300] ss:$8 sps:$4 sm:$0xff]  }
 0x4fb   : > { %9635 = vmatprep.subr.bf16.mxu0 %v13235_v61  ;;  %v13327_v60 = vld [vmem:[%s13740_s22 + $0x2700] ss:$8 sps:$4 sm:$0xff]   ;;  %v13323_v61 = vld [vmem:[%s13740_s22 + $0x1314] ss:$8 sps:$4 sm:$0xff]  }
 0x4fd   : > { %8816 = vmatpush1.bf16.msra.mxu1 %v13230_v62  ;;  %v9893_v62 = vcombine.high %v15180_v24, %v15180_v24 }
 0x4fe   : > { %9636 = vmatpush1.bf16.msra.mxu0 %v13233_v63  ;;  %8817 = vmatprep.subr.bf16.mxu1 %v13238_v40  ;;  %v13538_v63 = vmov 0   ;;  %v13324_v40 = vld [vmem:[%s13740_s22 + $0x1320] ss:$8 sps:$4 sm:$0xff]  }
 0x4ff   : > { %9637 = vmatprep.subr.bf16.mxu0 %v13241_v1  ;;  %v13332_v1 = vld [vmem:[%s13740_s22 + $0x1334] ss:$8 sps:$4 sm:$0xff]  }
 0x501   : > { %8818 = vmatpush1.bf16.msra.mxu1 %v13236_v2  ;;  %v13333_v2 = vld [vmem:[#allocation2 + $0x138] ss:$0 sps:$4 sm:$0xff]  }
 0x502   : > { %9638 = vmatpush1.bf16.msra.mxu0 %v13239_v3  ;;  %8819 = vmatprep.subr.bf16.mxu1 %v13244_v4  ;;  %v13330_v3 = vld [vmem:[%s13740_s22 + $0x1330] ss:$8 sps:$4 sm:$0xff]   ;;  %v13336_v4 = vld [vmem:[%s13740_s22 + $0x1344] ss:$8 sps:$4 sm:$0xff]  }
 0x503   : > { %9639 = vmatprep.subr.bf16.mxu0 %v13247_v5  ;;  %v13334_v5 = vld [vmem:[%s13740_s22 + $0x1340] ss:$8 sps:$4 sm:$0xff]  }
 0x505   : > { %8820 = vmatpush1.bf16.msra.mxu1 %v13242_v6  ;;  %v13339_v6 = vld [vmem:[%s13740_s22 + $0x1354] ss:$8 sps:$4 sm:$0xff]  }
 0x506   : > { %9640 = vmatpush1.bf16.msra.mxu0 %v13245_v58  ;;  %8821 = vmatprep.subr.bf16.mxu1 %v13250_v8  ;;  %v13337_v58 = vld [vmem:[%s13740_s22 + $0x1350] ss:$8 sps:$4 sm:$0xff]   ;;  %v13342_v8 = vld [vmem:[%s13740_s22 + $0x1364] ss:$8 sps:$4 sm:$0xff]  }
 0x507   : > { %9641 = vmatprep.subr.bf16.mxu0 %v13253_v9  ;;  %v13340_v9 = vld [vmem:[%s13740_s22 + $0x1360] ss:$8 sps:$4 sm:$0xff]  }
 0x509   : > { %8822 = vmatpush1.bf16.msra.mxu1 %v13248_v10  ;;  %v13345_v10 = vld [vmem:[%s13740_s22 + $0x1374] ss:$8 sps:$4 sm:$0xff]  }
 0x50a   : > { %9642 = vmatpush1.bf16.msra.mxu0 %v13251_v11  ;;  %8823 = vmatprep.subr.bf16.mxu1 %v13256_v0  ;;  %v13343_v11 = vld [vmem:[%s13740_s22 + $0x1370] ss:$8 sps:$4 sm:$0xff]   ;;  %v13348_v0 = vld [vmem:[%s13740_s22 + $0x1384] ss:$8 sps:$4 sm:$0xff]  }
 0x50b   : > { %9643 = vmatprep.subr.bf16.mxu0 %v13259_v52  ;;  %v13346_v52 = vld [vmem:[%s13740_s22 + $0x1380] ss:$8 sps:$4 sm:$0xff]  }
 0x50d   : > { %8824 = vmatpush1.bf16.msra.mxu1 %v13254_v14  ;;  %v13351_v14 = vld [vmem:[%s13740_s22 + $0x1394] ss:$8 sps:$4 sm:$0xff]  }
 0x50e   : > { %9644 = vmatpush1.bf16.msra.mxu0 %v13257_v15  ;;  %8825 = vmatprep.subr.bf16.mxu1 %v13262_v16  ;;  %v13349_v15 = vld [vmem:[%s13740_s22 + $0x1390] ss:$8 sps:$4 sm:$0xff]   ;;  %v13354_v16 = vld [vmem:[%s13740_s22 + $0x13a4] ss:$8 sps:$4 sm:$0xff]  }
 0x50f   : > { %9645 = vmatprep.subr.bf16.mxu0 %v13265_v17  ;;  %v13352_v17 = vld [vmem:[%s13740_s22 + $0x13a0] ss:$8 sps:$4 sm:$0xff]  }
 0x511   : > { %8826 = vmatpush1.bf16.msra.mxu1 %v13260_v46  ;;  %v13357_v46 = vld [vmem:[%s13740_s22 + $0x13b4] ss:$8 sps:$4 sm:$0xff]  }
 0x512   : > { %9646 = vmatpush1.bf16.msra.mxu0 %v13263_v7  ;;  %8827 = vmatprep.subr.bf16.mxu1 %v13268_v22  ;;  %v13355_v7 = vld [vmem:[%s13740_s22 + $0x13b0] ss:$8 sps:$4 sm:$0xff]   ;;  %v13360_v22 = vld [vmem:[%s13740_s22 + $0x13c4] ss:$8 sps:$4 sm:$0xff]  }
 0x513   : > { %9647 = vmatprep.subr.bf16.mxu0 %v13271_v23  ;;  %v13358_v23 = vld [vmem:[%s13740_s22 + $0x13c0] ss:$8 sps:$4 sm:$0xff]  }
 0x515   : > { %8828 = vmatpush1.bf16.msra.mxu1 %v13266_v26  ;;  %v13363_v26 = vld [vmem:[%s13740_s22 + $0x13d4] ss:$8 sps:$4 sm:$0xff]  }
 0x516   : > { %9648 = vmatpush1.bf16.msra.mxu0 %v13269_v27  ;;  %8829 = vmatprep.subr.bf16.mxu1 %v13274_v12  ;;  %v13361_v27 = vld [vmem:[%s13740_s22 + $0x13d0] ss:$8 sps:$4 sm:$0xff]   ;;  %v13366_v12 = vld [vmem:[%s13740_s22 + $0x13e4] ss:$8 sps:$4 sm:$0xff]  }
 0x517   : > { %9649 = vmatprep.subr.bf16.mxu0 %v13277_v13  ;;  %v13364_v13 = vld [vmem:[%s13740_s22 + $0x13e0] ss:$8 sps:$4 sm:$0xff]  }
 0x519   : > { %8830 = vmatpush1.bf16.msra.mxu1 %v13272_v30  ;;  %v13369_v30 = vld [vmem:[%s13740_s22 + $0x13f4] ss:$8 sps:$4 sm:$0xff]  }
 0x51a   : > { %9650 = vmatpush1.bf16.msra.mxu0 %v13275_v31  ;;  %8831 = vmatprep.subr.bf16.mxu1 %v13280_v32  ;;  %v13367_v31 = vld [vmem:[%s13740_s22 + $0x13f0] ss:$8 sps:$4 sm:$0xff]   ;;  %v9892_v32 = vcombine.low %v15180_v24, %v15180_v24 }
 0x51b   : > { %9651 = vmatprep.subr.bf16.mxu0 %v13283_v33 }
 0x51d   : > { %8832 = vmatpush1.bf16.msra.mxu1 %v13278_v19 }
 0x51e   : > { %9652 = vmatpush1.bf16.msra.mxu0 %v13281_v21  ;;  %8833 = vmatprep.subr.bf16.mxu1 %v13286_v36 }
 0x51f   : > { %9653 = vmatprep.subr.bf16.mxu0 %v13289_v37  ;;  %v1533_v37 = vlaneseq }
 0x521   : > { %8834 = vmatpush1.bf16.msra.mxu1 %v13284_v38  ;;  %v1534_v38 = vshrl.u32 %v1533_v37, 7 }
 0x522   : > { %9654 = vmatpush1.bf16.msra.mxu0 %v13287_v39  ;;  %8835 = vmatprep.subr.bf16.mxu1 %v13292_v20  ;;  %v1531_v20 = vld [vmem:[%s209_s28] sm:$0x3] }
 0x523   : > { %9655 = vmatprep.subr.bf16.mxu0 %v13295_v28  ;;  %v1535_v39 = vsub.s32 0, %v1534_v38  ;;  %v1539_v28 = vsub.s32 1, %v1534_v38 }
 0x525   : > { %8836 = vmatpush1.bf16.msra.mxu1 %v13290_v42  ;;  %v1536_v42 = vrot.slane %v1531_v20, %v1535_v39 }
 0x526   : > { %9656 = vmatpush1.bf16.msra.mxu0 %v13293_v43  ;;  %8837 = vmatprep.subr.bf16.mxu1 %v13298_v44  ;;  %v1540_v43 = vrot.slane %v1531_v20, %v1539_v28 }
 0x527   : > { %9657 = vmatprep.subr.bf16.mxu0 %v13301_v45 }
 0x529   : > { %8838 = vmatpush1.bf16.msra.mxu1 %v13296_v34 }
 0x52a   : > { %9658 = vmatpush1.bf16.msra.mxu0 %v13299_v35  ;;  %8839 = vmatprep.subr.bf16.mxu1 %v13304_v48 }
 0x52b   : > { %9659 = vmatprep.subr.bf16.mxu0 %v13307_v49 }
 0x52d   : > { %8840 = vmatpush1.bf16.msra.mxu1 %v13302_v50 }
 0x52e   : > { %9660 = vmatpush1.bf16.msra.mxu0 %v13305_v51  ;;  %8841 = vmatprep.subr.bf16.mxu1 %v13310_v29 }
 0x52f   : > { %9661 = vmatprep.subr.bf16.mxu0 %v13313_v41 }
 0x531   : > { %8842 = vmatpush1.bf16.msra.mxu1 %v13308_v54 }
 0x532   : > { %9662 = vmatpush1.bf16.msra.mxu0 %v13311_v55  ;;  %8852 = vmatprep.subr.bf16.mxu1 %v13320_v56 }
 0x533   : > { %9672 = vmatprep.subr.bf16.mxu0 %v13329_v57 }
 0x534   : > { %8844 = vmatmul.mubr.bf16.vlgmr.msra.gmra.mrb[0].mxu1 %v9890_v47 }
 0x535   : > { %9664 = vmatmul.mubr.bf16.vlgmr.msra.gmra.mrb[0].mxu0 %v9930_v25  ;;  %8853 = vmatpush1.bf16.msra.mxu1 %v13318_v59 }
 0x536   : > { %9673 = vmatpush1.bf16.msra.mxu0 %v13327_v60  ;;  %8854 = vmatprep.subr.bf16.mxu1 %v13323_v61 }
 0x537   : > { %9704 = vmatprep.mubr.bf16.mxu0 %v13538_v63  ;;  %8884 = vmatprep.mubr.bf16.mxu1 %v9893_v62 }
 0x539   : > { %8855 = vmatpush1.bf16.msra.mxu1 %v13321_v18 }
 0x53a   : > { %8856 = vmatprep.subr.bf16.mxu1 %v13326_v53 }
 0x53d   : > { %8857 = vmatpush1.bf16.msra.mxu1 %v13324_v40 }
 0x53e   : > { %8858 = vmatprep.subr.bf16.mxu1 %v13332_v1 }
 0x541   : > { %11183 = vmatmul.mubr.msk.bf16.vlgmr.msra.gmra.mrb[0].mxu0 %vm8069_vm0, %v13333_v2  ;;  %8859 = vmatpush1.bf16.msra.mxu1 %v13330_v3 }
 0x542   : > { %8860 = vmatprep.subr.bf16.mxu1 %v13336_v4 }
 0x545   : > { %8861 = vmatpush1.bf16.msra.mxu1 %v13334_v5 }
 0x546   : > { %8862 = vmatprep.subr.bf16.mxu1 %v13339_v6 }
 0x549   : > { %8863 = vmatpush1.bf16.msra.mxu1 %v13337_v58 }
 0x54a   : > { %8864 = vmatprep.subr.bf16.mxu1 %v13342_v8 }
 0x54d   : > { %8865 = vmatpush1.bf16.msra.mxu1 %v13340_v9 }
 0x54e   : > { %8866 = vmatprep.subr.bf16.mxu1 %v13345_v10 }
 0x551   : > { %8867 = vmatpush1.bf16.msra.mxu1 %v13343_v11 }
 0x552   : > { %8868 = vmatprep.subr.bf16.mxu1 %v13348_v0 }
 0x555   : > { %8869 = vmatpush1.bf16.msra.mxu1 %v13346_v52 }
 0x556   : > { %8870 = vmatprep.subr.bf16.mxu1 %v13351_v14 }
 0x559   : > { %8871 = vmatpush1.bf16.msra.mxu1 %v13349_v15 }
 0x55a   : > { %8872 = vmatprep.subr.bf16.mxu1 %v13354_v16 }
 0x55d   : > { %8873 = vmatpush1.bf16.msra.mxu1 %v13352_v17 }
 0x55e   : > { %8874 = vmatprep.subr.bf16.mxu1 %v13357_v46 }
 0x561   : > { %8875 = vmatpush1.bf16.msra.mxu1 %v13355_v7 }
 0x562   : > { %8876 = vmatprep.subr.bf16.mxu1 %v13360_v22 }
 0x565   : > { %8877 = vmatpush1.bf16.msra.mxu1 %v13358_v23 }
 0x566   : > { %8878 = vmatprep.subr.bf16.mxu1 %v13363_v26 }
 0x569   : > { %8879 = vmatpush1.bf16.msra.mxu1 %v13361_v27 }
 0x56a   : > { %8880 = vmatprep.subr.bf16.mxu1 %v13366_v12 }
 0x56d   : > { %8881 = vmatpush1.bf16.msra.mxu1 %v13364_v13 }
 0x56e   : > { %8882 = vmatprep.subr.bf16.mxu1 %v13369_v30 }
 0x571   : > { %8883 = vmatpush1.bf16.msra.mxu1 %v13367_v31 }
 0x574   : > { %8885 = vmatmul.mubr.bf16.vlgmr.msra.gmra.mrb[0].mxu1 %v9892_v32 }
 0x614   : > { %v9706_v33 = vpop.f32.mrb[0].mxu0 }
 0x615   : > { %v9708_v19 = vpop.f32.mrb[1].mxu0 }
 0x616   : > { %v9710_v21 = vpop.f32.mrb[2].mxu0 }
 0x617   : > { %v9711_v36 = vpop.f32.mrb[3].mxu0 }
 0x647   : > { %v8886_v44 = vpop.f32.mrb[0].mxu1 }
 0x648   : > { %v11194_v45 = vadd.f32 %v8886_v44, %v1536_v42  ;;  %v8888_v34 = vpop.f32.mrb[1].mxu1 }
 0x649   : > { %v11196_v35 = vadd.f32 %v8888_v34, %v1540_v43  ;;  %v8890_v48 = vpop.f32.mrb[2].mxu1 }
 0x64a   : > { %v11195_v49 = vadd.f32 %v11194_v45, %v9706_v33  ;;  %v8891_v50 = vpop.f32.mrb[3].mxu1 }
 0x64b   : > { %v11197_v51 = vadd.f32 %v11196_v35, %v9708_v19 }
 0x64c   : > { %v9713_v29 = vmax.f32 %v11195_v49, 0.0 }
 0x64d   : > { %v9714_v41 = vmax.f32 %v11197_v51, 0.0 }
 0x64f   : > { %v11192_v54 = vpack.c.bf16 %v9714_v41, %v9713_v29 }
 0x651   : > { %9723 = vst [vmem:[%s236_s20] sm:$0xff] %v11192_v54 }
 0x652   : > { %13473 = shalt.err (!%p13470_p1)
}
 0x653   : > { %s13474_s17 = scalar_lea.hbm %s15224_s5, 128  ;;  %s13478_s21 = scalar_lea.hbm %s15270_s3, 2560 }
 0x654   : > { %p13475_p5 = scmp.ne.s32.totalorder %s15224_s5, %s13474_s17  ;;  %p13479_p6 = scmp.lt.u32.totalorder %s15224_s5, %s15270_s3 }
 0x655   : > { %p13480_p8 = scmp.lt.u32.totalorder %s13478_s21, %s13474_s17  ;;  %p13482_p11 = scmp.lt.u32.totalorder %s13474_s17, %s15224_s5 }
 0x656   : > { %p13476_p4 = pnand %p13475_p5, %p15291_p3 }
 0x657   : > { %p13481_p13 = por %p13480_p8, %p13479_p6 }
 0x658   : > { %p13477_p2 = pneg %p13476_p4 }
 0x659   : > { %p13483_p0 = por %p13482_p11, %p13481_p13 }
 0x65b   : > { %p13484_p10 = pnand %p13483_p0, %p13477_p2 }
 0x65d   : > { %13487 = shalt.err (!%p13484_p10)
}
 0x65e   : > { %11360 = dma.vmem_to_hbm [thread:$0]  (%p15291_p3), %s15226_s23, 128, %s15224_s5, %s9725_s6  }
 0x65f PF: > { %p11380_p12 = scmp.ge.s32.totalorder %s13530_s15, 2  ;;  %s9751_s28 = sand.u32 1, %s13518_s12  }
 0x660   : > { %p15292_p9 = scmp.ne.s32.totalorder %s15281_s29, 0  ;;  %s9752_s4 = scalar_lea.sflag [#allocation4], %s9751_s28 }
 0x662   : > { %p11374_p7 = pnand %p11380_p12, %p15292_p9 }
 0x664   : > { %13513 = dma.done.wait (!%p11374_p7), %s9752_s4, 128  }
 0x665   : > { %13515 = vsyncadd (!%p11374_p7), %s9752_s4, 4294967168  ;;  %p17_p1 = scmp.ge.s32.totalorder %s13581_s16, 22   ;;  %s15293_s12 = smov %s13522_s13 }
 0x666   : > { %s15294_s13 = smov %s13526_s14  ;;  %s15295_s14 = smov %s13591_s19 }
 0x667   : > { %s15296_s15 = smov %s13581_s16  ;;  %19 = sbr.rel (!%p17_p1) target bundleno = 6 (0x6), region = 93 }
 0x66e   :  { %9757 = vsyncpa [#allocation3], 1 }
 0x66f   :  { %9759 = vsyncpa [#allocation3 + $0x1], 1 }
 0x670   :  { %9760 = vsyncpa [#allocation6], 1 }
 0x671   :  { %9762 = vsyncpa [#allocation6 + $0x1], 1 }
 0x672   :  { %9763 = vsyncpa [#allocation4], 1 }
 0x673   :  { %9765 = vsyncpa [#allocation4 + $0x1], 1 }

</bundles_post_ra>
